<compile_context>
chip_gen: v7x
topology: tpu7x:2x2x1
jax: 0.10.0
libtpu: 0.0.40
codegen_flags: <defaults>
</compile_context>

<pallas_src>
import functools

import jax
import jax.numpy as jnp
from jax.experimental import pallas as pl
from jax.experimental.pallas import tpu as pltpu

C_IN = 1
C_MID = 32    # conv1 out channels
C_OUT = 16    # conv2 out channels
KH = KW = 3
LANE = 128
CHUNK = 512   # conv1 lane-chunk: bounds the live accumulator to <= 16 vregs


def _round_up(x, m):
    return ((x + m - 1) // m) * m


def _fused_conv_kernel(x_ref, w1_ref, b1_ref, w2_ref, b2_ref, o_ref,
                       xp_ref, v1_ref, *, n, h, w, lout):
    """Fused conv3x3(pad=1) + ReLU + conv1x1 + tanh, single gridless invocation.

    x_ref : (1, N*H*W)        row-major flattened raw image (lane axis)
    w1_ref: (32, 9)           conv1 weight, column index = kh*3 + kw
    b1_ref: (32, 1)
    w2_ref: (16, 32)          conv2 (1x1) weight
    b2_ref: (16, 1)
    o_ref : (16, LOUT)        channels-major, lane-dense (128-multiple) output slab
    xp_ref: (1, LOUT+2*Wp+2)  VMEM scratch: per-row zero-padded flat image
    v1_ref: (32, LOUT)        VMEM scratch: ReLU(conv1) activations
    """
    hp, wp = h + 2, w + 2

    # ---- Stage 0: build the per-row zero-padded flat image in VMEM --------
    # xp[b*Hp*Wp + (i+1)*Wp + 1 + j] = x[b, i, j]; everything else is 0.
    # This replaces the wrapper-side jnp.pad (one fewer XLA launch) and makes
    # every conv tap below a pure static slice — no iota, //, %, or jnp.where.
    xp_ref[...] = jnp.zeros_like(xp_ref)
    for b in range(n):
        for i in range(h):
            src = b * h * w + i * w
            dst = b * hp * wp + (i + 1) * wp + 1
            xp_ref[:, dst:dst + w] = x_ref[:, src:src + w]

    # ---- Stage 1: conv1 (3x3) = 9 statically shifted VPU multiply-adds ----
    # Computed over the padded flat domain; chunked along lanes so the f32
    # accumulator stays small (no spill pressure).  Border/tail lanes are
    # garbage-but-finite and get sliced away in the wrapper.
    for c0 in range(0, lout, CHUNK):
        cw = min(CHUNK, lout - c0)
        acc = jnp.zeros((C_MID, cw), jnp.float32)
        for kh in range(KH):
            for kw in range(KW):
                s = c0 + kh * wp + kw                       # static lane offset
                tap = xp_ref[:, s:s + cw]                   # (1, cw), no mask
                wcol = w1_ref[:, kh * KW + kw:kh * KW + kw + 1]   # (32, 1)
                acc = acc + wcol * tap                      # broadcast mul+add
        # ReLU(conv1 + b1) for this lane chunk (aligned, unmasked stores)
        v1_ref[:, c0:c0 + cw] = jnp.maximum(acc + b1_ref[...], 0.0)

    # ---- Stage 2: conv2 (1x1) on the MXU, bias + tanh (EUP) fused ---------
    v2 = jnp.dot(w2_ref[...], v1_ref[...], preferred_element_type=jnp.float32)
    o_ref[...] = jnp.tanh(v2 + b2_ref[...])                 # (16, LOUT), lane-dense


def model_tanh_forward(x_nchw, w1, b1, w2, b2):
    """x_nchw: (N, 1, H, W) float32.  Returns (N, 16, H, W) float32."""
    N, Cin, H, W = x_nchw.shape
    assert Cin == C_IN

    Hp, Wp = H + 2, W + 2
    L = N * Hp * Wp                      # padded flat compute domain
    LOUT = _round_up(L, LANE)            # lane-dense, 128-aligned slab width
    LIN = LOUT + 2 * Wp + 2              # scratch length: max tap shift is 2*Wp+2

    # Layout glue only (free metadata reshapes; no pads, no im2col in HBM).
    x_flat = x_nchw.reshape(1, N * H * W)
    w1m = w1.reshape(C_MID, C_IN * KH * KW)   # (32, 9), col = kh*3 + kw
    b1c = b1.reshape(C_MID, 1)
    w2m = w2.reshape(C_OUT, C_MID)            # (16, 32)
    b2c = b2.reshape(C_OUT, 1)

    kernel = functools.partial(_fused_conv_kernel, n=N, h=H, w=W, lout=LOUT)

    vmem_spec = pl.BlockSpec(memory_space=pltpu.MemorySpace.VMEM)
    out_slab = pl.pallas_call(
        kernel,
        out_shape=jax.ShapeDtypeStruct((C_OUT, LOUT), jnp.float32),
        # Gridless: whole arrays resident in VMEM, no pipeline bookkeeping.
        in_specs=[vmem_spec] * 5,
        out_specs=vmem_spec,
        scratch_shapes=[
            pltpu.VMEM((1, LIN), jnp.float32),        # per-row-padded flat image
            pltpu.VMEM((C_MID, LOUT), jnp.float32),   # ReLU(conv1) activations
        ],
    )(x_flat, w1m, b1c, w2m, b2c)

    # (16, LOUT) lane-dense slab -> (N, 16, H, W): output for pixel (n,i,j)
    # lives at flat column n*Hp*Wp + i*Wp + j, so take the top-left HxW corner
    # of each padded image and drop the 128-alignment tail.  One cheap fusion.
    y = out_slab[:, :L].reshape(C_OUT, N, Hp, Wp)[:, :, :H, :W]
    return jnp.transpose(y, (1, 0, 2, 3))


def _reference(x_nchw, w1, b1, w2, b2):
    dn = jax.lax.conv_dimension_numbers(x_nchw.shape, w1.shape, ("NCHW", "OIHW", "NCHW"))
    v1 = jax.lax.conv_general_dilated(x_nchw, w1, (1, 1), "SAME", dimension_numbers=dn)
    v1 = jax.nn.relu(v1 + b1.reshape(1, -1, 1, 1))
    dn2 = jax.lax.conv_dimension_numbers(v1.shape, w2.shape, ("NCHW", "OIHW", "NCHW"))
    v2 = jax.lax.conv_general_dilated(v1, w2, (1, 1), "VALID", dimension_numbers=dn2)
    return jnp.tanh(v2 + b2.reshape(1, -1, 1, 1))


if __name__ == "__main__":
    key = jax.random.PRNGKey(0)
    kx, k1, k2, k3, k4 = jax.random.split(key, 5)

    # Input matching the PyTorch script: (1, 1, 28, 28)
    x = jax.random.normal(kx, (1, 1, 28, 28), dtype=jnp.float32)

    # Deterministic parameter init (shapes from torch.nn.Conv2d):
    # conv1: weight (32, 1, 3, 3), bias (32,);  conv2: weight (16, 32, 1, 1), bias (16,)
    s1 = 1.0 / jnp.sqrt(jnp.float32(C_IN * KH * KW))
    w1 = jax.random.uniform(k1, (C_MID, C_IN, KH, KW), jnp.float32, -s1, s1)
    b1 = jax.random.uniform(k2, (C_MID,), jnp.float32, -s1, s1)
    s2 = 1.0 / jnp.sqrt(jnp.float32(C_MID))
    w2 = jax.random.uniform(k3, (C_OUT, C_MID, 1, 1), jnp.float32, -s2, s2)
    b2 = jax.random.uniform(k4, (C_OUT,), jnp.float32, -s2, s2)

    out = jax.block_until_ready(model_tanh_forward(x, w1, b1, w2, b2))
    ref = jax.block_until_ready(_reference(x, w1, b1, w2, b2))

    assert out.shape == (1, C_OUT, 28, 28), out.shape
    assert jnp.allclose(out, ref, atol=1e-5, rtol=1e-5), "mismatch vs reference"

    print("KERNEL_OK")
</pallas_src>

<mosaic_0001>
module attributes {stable_mosaic.version = 11 : i64} {
  func.func @_fused_conv_kernel(%arg0: memref<1x784xf32, #tpu.memory_space<vmem>>, %arg1: memref<32x9xf32, #tpu.memory_space<vmem>>, %arg2: memref<32x1xf32, #tpu.memory_space<vmem>>, %arg3: memref<16x32xf32, #tpu.memory_space<vmem>>, %arg4: memref<16x1xf32, #tpu.memory_space<vmem>>, %arg5: memref<16x1024xf32, #tpu.memory_space<vmem>>, %arg6: memref<1x1086xf32, #tpu.memory_space<vmem>>, %arg7: memref<32x1024xf32, #tpu.memory_space<vmem>>) attributes {dimension_semantics = [], scalar_prefetch = 0 : i64, scratch_operands = 2 : i64, tpu.core_type = #tpu.core_type<tc>} {
    %cst = arith.constant 0.000000e+00 : f32
    %0 = vector.broadcast %cst : f32 to vector<1x1086xf32>
    %c0 = arith.constant 0 : index
    %c0_0 = arith.constant 0 : index
    %1 = vector.load %arg6[%c0, %c0_0] : memref<1x1086xf32, #tpu.memory_space<vmem>>, vector<1x1086xf32>
    tpu.vector_store %arg6[%c0, %c0_0], %0 {strides = array<i32>} : memref<1x1086xf32, #tpu.memory_space<vmem>>, vector<1x1086xf32>,
    %c0_1 = arith.constant 0 : index
    %c0_2 = arith.constant 0 : index
    %2 = vector.load %arg0[%c0_1, %c0_2] : memref<1x784xf32, #tpu.memory_space<vmem>>, vector<1x28xf32>
    %c0_3 = arith.constant 0 : index
    %c31 = arith.constant 31 : index
    %3 = vector.load %arg6[%c0_3, %c31] : memref<1x1086xf32, #tpu.memory_space<vmem>>, vector<1x28xf32>
    tpu.vector_store %arg6[%c0_3, %c31], %2 {strides = array<i32>} : memref<1x1086xf32, #tpu.memory_space<vmem>>, vector<1x28xf32>,
    %c0_4 = arith.constant 0 : index
    %c28 = arith.constant 28 : index
    %4 = vector.load %arg0[%c0_4, %c28] : memref<1x784xf32, #tpu.memory_space<vmem>>, vector<1x28xf32>
    %c0_5 = arith.constant 0 : index
    %c61 = arith.constant 61 : index
    %5 = vector.load %arg6[%c0_5, %c61] : memref<1x1086xf32, #tpu.memory_space<vmem>>, vector<1x28xf32>
    tpu.vector_store %arg6[%c0_5, %c61], %4 {strides = array<i32>} : memref<1x1086xf32, #tpu.memory_space<vmem>>, vector<1x28xf32>,
    %c0_6 = arith.constant 0 : index
    %c56 = arith.constant 56 : index
    %6 = vector.load %arg0[%c0_6, %c56] : memref<1x784xf32, #tpu.memory_space<vmem>>, vector<1x28xf32>
    %c0_7 = arith.constant 0 : index
    %c91 = arith.constant 91 : index
    %7 = vector.load %arg6[%c0_7, %c91] : memref<1x1086xf32, #tpu.memory_space<vmem>>, vector<1x28xf32>
    tpu.vector_store %arg6[%c0_7, %c91], %6 {strides = array<i32>} : memref<1x1086xf32, #tpu.memory_space<vmem>>, vector<1x28xf32>,
    %c0_8 = arith.constant 0 : index
    %c84 = arith.constant 84 : index
    %8 = vector.load %arg0[%c0_8, %c84] : memref<1x784xf32, #tpu.memory_space<vmem>>, vector<1x28xf32>
    %c0_9 = arith.constant 0 : index
    %c121 = arith.constant 121 : index
    %9 = vector.load %arg6[%c0_9, %c121] : memref<1x1086xf32, #tpu.memory_space<vmem>>, vector<1x28xf32>
    tpu.vector_store %arg6[%c0_9, %c121], %8 {strides = array<i32>} : memref<1x1086xf32, #tpu.memory_space<vmem>>, vector<1x28xf32>,
    %c0_10 = arith.constant 0 : index
    %c112 = arith.constant 112 : index
    %10 = vector.load %arg0[%c0_10, %c112] : memref<1x784xf32, #tpu.memory_space<vmem>>, vector<1x28xf32>
    %c0_11 = arith.constant 0 : index
    %c151 = arith.constant 151 : index
    %11 = vector.load %arg6[%c0_11, %c151] : memref<1x1086xf32, #tpu.memory_space<vmem>>, vector<1x28xf32>
    tpu.vector_store %arg6[%c0_11, %c151], %10 {strides = array<i32>} : memref<1x1086xf32, #tpu.memory_space<vmem>>, vector<1x28xf32>,
    %c0_12 = arith.constant 0 : index
    %c140 = arith.constant 140 : index
    %12 = vector.load %arg0[%c0_12, %c140] : memref<1x784xf32, #tpu.memory_space<vmem>>, vector<1x28xf32>
    %c0_13 = arith.constant 0 : index
    %c181 = arith.constant 181 : index
    %13 = vector.load %arg6[%c0_13, %c181] : memref<1x1086xf32, #tpu.memory_space<vmem>>, vector<1x28xf32>
    tpu.vector_store %arg6[%c0_13, %c181], %12 {strides = array<i32>} : memref<1x1086xf32, #tpu.memory_space<vmem>>, vector<1x28xf32>,
    %c0_14 = arith.constant 0 : index
    %c168 = arith.constant 168 : index
    %14 = vector.load %arg0[%c0_14, %c168] : memref<1x784xf32, #tpu.memory_space<vmem>>, vector<1x28xf32>
    %c0_15 = arith.constant 0 : index
    %c211 = arith.constant 211 : index
    %15 = vector.load %arg6[%c0_15, %c211] : memref<1x1086xf32, #tpu.memory_space<vmem>>, vector<1x28xf32>
    tpu.vector_store %arg6[%c0_15, %c211], %14 {strides = array<i32>} : memref<1x1086xf32, #tpu.memory_space<vmem>>, vector<1x28xf32>,
    %c0_16 = arith.constant 0 : index
    %c196 = arith.constant 196 : index
    %16 = vector.load %arg0[%c0_16, %c196] : memref<1x784xf32, #tpu.memory_space<vmem>>, vector<1x28xf32>
    %c0_17 = arith.constant 0 : index
    %c241 = arith.constant 241 : index
    %17 = vector.load %arg6[%c0_17, %c241] : memref<1x1086xf32, #tpu.memory_space<vmem>>, vector<1x28xf32>
    tpu.vector_store %arg6[%c0_17, %c241], %16 {strides = array<i32>} : memref<1x1086xf32, #tpu.memory_space<vmem>>, vector<1x28xf32>,
    %c0_18 = arith.constant 0 : index
    %c224 = arith.constant 224 : index
    %18 = vector.load %arg0[%c0_18, %c224] : memref<1x784xf32, #tpu.memory_space<vmem>>, vector<1x28xf32>
    %c0_19 = arith.constant 0 : index
    %c271 = arith.constant 271 : index
    %19 = vector.load %arg6[%c0_19, %c271] : memref<1x1086xf32, #tpu.memory_space<vmem>>, vector<1x28xf32>
    tpu.vector_store %arg6[%c0_19, %c271], %18 {strides = array<i32>} : memref<1x1086xf32, #tpu.memory_space<vmem>>, vector<1x28xf32>,
    %c0_20 = arith.constant 0 : index
    %c252 = arith.constant 252 : index
    %20 = vector.load %arg0[%c0_20, %c252] : memref<1x784xf32, #tpu.memory_space<vmem>>, vector<1x28xf32>
    %c0_21 = arith.constant 0 : index
    %c301 = arith.constant 301 : index
    %21 = vector.load %arg6[%c0_21, %c301] : memref<1x1086xf32, #tpu.memory_space<vmem>>, vector<1x28xf32>
    tpu.vector_store %arg6[%c0_21, %c301], %20 {strides = array<i32>} : memref<1x1086xf32, #tpu.memory_space<vmem>>, vector<1x28xf32>,
    %c0_22 = arith.constant 0 : index
    %c280 = arith.constant 280 : index
    %22 = vector.load %arg0[%c0_22, %c280] : memref<1x784xf32, #tpu.memory_space<vmem>>, vector<1x28xf32>
    %c0_23 = arith.constant 0 : index
    %c331 = arith.constant 331 : index
    %23 = vector.load %arg6[%c0_23, %c331] : memref<1x1086xf32, #tpu.memory_space<vmem>>, vector<1x28xf32>
    tpu.vector_store %arg6[%c0_23, %c331], %22 {strides = array<i32>} : memref<1x1086xf32, #tpu.memory_space<vmem>>, vector<1x28xf32>,
    %c0_24 = arith.constant 0 : index
    %c308 = arith.constant 308 : index
    %24 = vector.load %arg0[%c0_24, %c308] : memref<1x784xf32, #tpu.memory_space<vmem>>, vector<1x28xf32>
    %c0_25 = arith.constant 0 : index
    %c361 = arith.constant 361 : index
    %25 = vector.load %arg6[%c0_25, %c361] : memref<1x1086xf32, #tpu.memory_space<vmem>>, vector<1x28xf32>
    tpu.vector_store %arg6[%c0_25, %c361], %24 {strides = array<i32>} : memref<1x1086xf32, #tpu.memory_space<vmem>>, vector<1x28xf32>,
    %c0_26 = arith.constant 0 : index
    %c336 = arith.constant 336 : index
    %26 = vector.load %arg0[%c0_26, %c336] : memref<1x784xf32, #tpu.memory_space<vmem>>, vector<1x28xf32>
    %c0_27 = arith.constant 0 : index
    %c391 = arith.constant 391 : index
    %27 = vector.load %arg6[%c0_27, %c391] : memref<1x1086xf32, #tpu.memory_space<vmem>>, vector<1x28xf32>
    tpu.vector_store %arg6[%c0_27, %c391], %26 {strides = array<i32>} : memref<1x1086xf32, #tpu.memory_space<vmem>>, vector<1x28xf32>,
    %c0_28 = arith.constant 0 : index
    %c364 = arith.constant 364 : index
    %28 = vector.load %arg0[%c0_28, %c364] : memref<1x784xf32, #tpu.memory_space<vmem>>, vector<1x28xf32>
    %c0_29 = arith.constant 0 : index
    %c421 = arith.constant 421 : index
    %29 = vector.load %arg6[%c0_29, %c421] : memref<1x1086xf32, #tpu.memory_space<vmem>>, vector<1x28xf32>
    tpu.vector_store %arg6[%c0_29, %c421], %28 {strides = array<i32>} : memref<1x1086xf32, #tpu.memory_space<vmem>>, vector<1x28xf32>,
    %c0_30 = arith.constant 0 : index
    %c392 = arith.constant 392 : index
    %30 = vector.load %arg0[%c0_30, %c392] : memref<1x784xf32, #tpu.memory_space<vmem>>, vector<1x28xf32>
    %c0_31 = arith.constant 0 : index
    %c451 = arith.constant 451 : index
    %31 = vector.load %arg6[%c0_31, %c451] : memref<1x1086xf32, #tpu.memory_space<vmem>>, vector<1x28xf32>
    tpu.vector_store %arg6[%c0_31, %c451], %30 {strides = array<i32>} : memref<1x1086xf32, #tpu.memory_space<vmem>>, vector<1x28xf32>,
    %c0_32 = arith.constant 0 : index
    %c420 = arith.constant 420 : index
    %32 = vector.load %arg0[%c0_32, %c420] : memref<1x784xf32, #tpu.memory_space<vmem>>, vector<1x28xf32>
    %c0_33 = arith.constant 0 : index
    %c481 = arith.constant 481 : index
    %33 = vector.load %arg6[%c0_33, %c481] : memref<1x1086xf32, #tpu.memory_space<vmem>>, vector<1x28xf32>
    tpu.vector_store %arg6[%c0_33, %c481], %32 {strides = array<i32>} : memref<1x1086xf32, #tpu.memory_space<vmem>>, vector<1x28xf32>,
    %c0_34 = arith.constant 0 : index
    %c448 = arith.constant 448 : index
    %34 = vector.load %arg0[%c0_34, %c448] : memref<1x784xf32, #tpu.memory_space<vmem>>, vector<1x28xf32>
    %c0_35 = arith.constant 0 : index
    %c511 = arith.constant 511 : index
    %35 = vector.load %arg6[%c0_35, %c511] : memref<1x1086xf32, #tpu.memory_space<vmem>>, vector<1x28xf32>
    tpu.vector_store %arg6[%c0_35, %c511], %34 {strides = array<i32>} : memref<1x1086xf32, #tpu.memory_space<vmem>>, vector<1x28xf32>,
    %c0_36 = arith.constant 0 : index
    %c476 = arith.constant 476 : index
    %36 = vector.load %arg0[%c0_36, %c476] : memref<1x784xf32, #tpu.memory_space<vmem>>, vector<1x28xf32>
    %c0_37 = arith.constant 0 : index
    %c541 = arith.constant 541 : index
    %37 = vector.load %arg6[%c0_37, %c541] : memref<1x1086xf32, #tpu.memory_space<vmem>>, vector<1x28xf32>
    tpu.vector_store %arg6[%c0_37, %c541], %36 {strides = array<i32>} : memref<1x1086xf32, #tpu.memory_space<vmem>>, vector<1x28xf32>,
    %c0_38 = arith.constant 0 : index
    %c504 = arith.constant 504 : index
    %38 = vector.load %arg0[%c0_38, %c504] : memref<1x784xf32, #tpu.memory_space<vmem>>, vector<1x28xf32>
    %c0_39 = arith.constant 0 : index
    %c571 = arith.constant 571 : index
    %39 = vector.load %arg6[%c0_39, %c571] : memref<1x1086xf32, #tpu.memory_space<vmem>>, vector<1x28xf32>
    tpu.vector_store %arg6[%c0_39, %c571], %38 {strides = array<i32>} : memref<1x1086xf32, #tpu.memory_space<vmem>>, vector<1x28xf32>,
    %c0_40 = arith.constant 0 : index
    %c532 = arith.constant 532 : index
    %40 = vector.load %arg0[%c0_40, %c532] : memref<1x784xf32, #tpu.memory_space<vmem>>, vector<1x28xf32>
    %c0_41 = arith.constant 0 : index
    %c601 = arith.constant 601 : index
    %41 = vector.load %arg6[%c0_41, %c601] : memref<1x1086xf32, #tpu.memory_space<vmem>>, vector<1x28xf32>
    tpu.vector_store %arg6[%c0_41, %c601], %40 {strides = array<i32>} : memref<1x1086xf32, #tpu.memory_space<vmem>>, vector<1x28xf32>,
    %c0_42 = arith.constant 0 : index
    %c560 = arith.constant 560 : index
    %42 = vector.load %arg0[%c0_42, %c560] : memref<1x784xf32, #tpu.memory_space<vmem>>, vector<1x28xf32>
    %c0_43 = arith.constant 0 : index
    %c631 = arith.constant 631 : index
    %43 = vector.load %arg6[%c0_43, %c631] : memref<1x1086xf32, #tpu.memory_space<vmem>>, vector<1x28xf32>
    tpu.vector_store %arg6[%c0_43, %c631], %42 {strides = array<i32>} : memref<1x1086xf32, #tpu.memory_space<vmem>>, vector<1x28xf32>,
    %c0_44 = arith.constant 0 : index
    %c588 = arith.constant 588 : index
    %44 = vector.load %arg0[%c0_44, %c588] : memref<1x784xf32, #tpu.memory_space<vmem>>, vector<1x28xf32>
    %c0_45 = arith.constant 0 : index
    %c661 = arith.constant 661 : index
    %45 = vector.load %arg6[%c0_45, %c661] : memref<1x1086xf32, #tpu.memory_space<vmem>>, vector<1x28xf32>
    tpu.vector_store %arg6[%c0_45, %c661], %44 {strides = array<i32>} : memref<1x1086xf32, #tpu.memory_space<vmem>>, vector<1x28xf32>,
    %c0_46 = arith.constant 0 : index
    %c616 = arith.constant 616 : index
    %46 = vector.load %arg0[%c0_46, %c616] : memref<1x784xf32, #tpu.memory_space<vmem>>, vector<1x28xf32>
    %c0_47 = arith.constant 0 : index
    %c691 = arith.constant 691 : index
    %47 = vector.load %arg6[%c0_47, %c691] : memref<1x1086xf32, #tpu.memory_space<vmem>>, vector<1x28xf32>
    tpu.vector_store %arg6[%c0_47, %c691], %46 {strides = array<i32>} : memref<1x1086xf32, #tpu.memory_space<vmem>>, vector<1x28xf32>,
    %c0_48 = arith.constant 0 : index
    %c644 = arith.constant 644 : index
    %48 = vector.load %arg0[%c0_48, %c644] : memref<1x784xf32, #tpu.memory_space<vmem>>, vector<1x28xf32>
    %c0_49 = arith.constant 0 : index
    %c721 = arith.constant 721 : index
    %49 = vector.load %arg6[%c0_49, %c721] : memref<1x1086xf32, #tpu.memory_space<vmem>>, vector<1x28xf32>
    tpu.vector_store %arg6[%c0_49, %c721], %48 {strides = array<i32>} : memref<1x1086xf32, #tpu.memory_space<vmem>>, vector<1x28xf32>,
    %c0_50 = arith.constant 0 : index
    %c672 = arith.constant 672 : index
    %50 = vector.load %arg0[%c0_50, %c672] : memref<1x784xf32, #tpu.memory_space<vmem>>, vector<1x28xf32>
    %c0_51 = arith.constant 0 : index
    %c751 = arith.constant 751 : index
    %51 = vector.load %arg6[%c0_51, %c751] : memref<1x1086xf32, #tpu.memory_space<vmem>>, vector<1x28xf32>
    tpu.vector_store %arg6[%c0_51, %c751], %50 {strides = array<i32>} : memref<1x1086xf32, #tpu.memory_space<vmem>>, vector<1x28xf32>,
    %c0_52 = arith.constant 0 : index
    %c700 = arith.constant 700 : index
    %52 = vector.load %arg0[%c0_52, %c700] : memref<1x784xf32, #tpu.memory_space<vmem>>, vector<1x28xf32>
    %c0_53 = arith.constant 0 : index
    %c781 = arith.constant 781 : index
    %53 = vector.load %arg6[%c0_53, %c781] : memref<1x1086xf32, #tpu.memory_space<vmem>>, vector<1x28xf32>
    tpu.vector_store %arg6[%c0_53, %c781], %52 {strides = array<i32>} : memref<1x1086xf32, #tpu.memory_space<vmem>>, vector<1x28xf32>,
    %c0_54 = arith.constant 0 : index
    %c728 = arith.constant 728 : index
    %54 = vector.load %arg0[%c0_54, %c728] : memref<1x784xf32, #tpu.memory_space<vmem>>, vector<1x28xf32>
    %c0_55 = arith.constant 0 : index
    %c811 = arith.constant 811 : index
    %55 = vector.load %arg6[%c0_55, %c811] : memref<1x1086xf32, #tpu.memory_space<vmem>>, vector<1x28xf32>
    tpu.vector_store %arg6[%c0_55, %c811], %54 {strides = array<i32>} : memref<1x1086xf32, #tpu.memory_space<vmem>>, vector<1x28xf32>,
    %c0_56 = arith.constant 0 : index
    %c756 = arith.constant 756 : index
    %56 = vector.load %arg0[%c0_56, %c756] : memref<1x784xf32, #tpu.memory_space<vmem>>, vector<1x28xf32>
    %c0_57 = arith.constant 0 : index
    %c841 = arith.constant 841 : index
    %57 = vector.load %arg6[%c0_57, %c841] : memref<1x1086xf32, #tpu.memory_space<vmem>>, vector<1x28xf32>
    tpu.vector_store %arg6[%c0_57, %c841], %56 {strides = array<i32>} : memref<1x1086xf32, #tpu.memory_space<vmem>>, vector<1x28xf32>,
    %cst_58 = arith.constant 0.000000e+00 : f32
    %58 = vector.broadcast %cst_58 : f32 to vector<32x512xf32>
    %c0_59 = arith.constant 0 : index
    %c0_60 = arith.constant 0 : index
    %59 = vector.load %arg6[%c0_59, %c0_60] : memref<1x1086xf32, #tpu.memory_space<vmem>>, vector<1x512xf32>
    %c0_61 = arith.constant 0 : index
    %c0_62 = arith.constant 0 : index
    %60 = vector.load %arg1[%c0_61, %c0_62] : memref<32x9xf32, #tpu.memory_space<vmem>>, vector<32x1xf32>
    %61 = vector.broadcast %60 : vector<32x1xf32> to vector<32x512xf32>
    %62 = vector.broadcast %59 : vector<1x512xf32> to vector<32x512xf32>
    %63 = arith.mulf %61, %62 : vector<32x512xf32>
    %64 = arith.addf %58, %63 : vector<32x512xf32>
    %c0_63 = arith.constant 0 : index
    %c1 = arith.constant 1 : index
    %65 = vector.load %arg6[%c0_63, %c1] : memref<1x1086xf32, #tpu.memory_space<vmem>>, vector<1x512xf32>
    %c0_64 = arith.constant 0 : index
    %c1_65 = arith.constant 1 : index
    %66 = vector.load %arg1[%c0_64, %c1_65] : memref<32x9xf32, #tpu.memory_space<vmem>>, vector<32x1xf32>
    %67 = vector.broadcast %66 : vector<32x1xf32> to vector<32x512xf32>
    %68 = vector.broadcast %65 : vector<1x512xf32> to vector<32x512xf32>
    %69 = arith.mulf %67, %68 : vector<32x512xf32>
    %70 = arith.addf %64, %69 : vector<32x512xf32>
    %c0_66 = arith.constant 0 : index
    %c2 = arith.constant 2 : index
    %71 = vector.load %arg6[%c0_66, %c2] : memref<1x1086xf32, #tpu.memory_space<vmem>>, vector<1x512xf32>
    %c0_67 = arith.constant 0 : index
    %c2_68 = arith.constant 2 : index
    %72 = vector.load %arg1[%c0_67, %c2_68] : memref<32x9xf32, #tpu.memory_space<vmem>>, vector<32x1xf32>
    %73 = vector.broadcast %72 : vector<32x1xf32> to vector<32x512xf32>
    %74 = vector.broadcast %71 : vector<1x512xf32> to vector<32x512xf32>
    %75 = arith.mulf %73, %74 : vector<32x512xf32>
    %76 = arith.addf %70, %75 : vector<32x512xf32>
    %c0_69 = arith.constant 0 : index
    %c30 = arith.constant 30 : index
    %77 = vector.load %arg6[%c0_69, %c30] : memref<1x1086xf32, #tpu.memory_space<vmem>>, vector<1x512xf32>
    %c0_70 = arith.constant 0 : index
    %c3 = arith.constant 3 : index
    %78 = vector.load %arg1[%c0_70, %c3] : memref<32x9xf32, #tpu.memory_space<vmem>>, vector<32x1xf32>
    %79 = vector.broadcast %78 : vector<32x1xf32> to vector<32x512xf32>
    %80 = vector.broadcast %77 : vector<1x512xf32> to vector<32x512xf32>
    %81 = arith.mulf %79, %80 : vector<32x512xf32>
    %82 = arith.addf %76, %81 : vector<32x512xf32>
    %c0_71 = arith.constant 0 : index
    %c31_72 = arith.constant 31 : index
    %83 = vector.load %arg6[%c0_71, %c31_72] : memref<1x1086xf32, #tpu.memory_space<vmem>>, vector<1x512xf32>
    %c0_73 = arith.constant 0 : index
    %c4 = arith.constant 4 : index
    %84 = vector.load %arg1[%c0_73, %c4] : memref<32x9xf32, #tpu.memory_space<vmem>>, vector<32x1xf32>
    %85 = vector.broadcast %84 : vector<32x1xf32> to vector<32x512xf32>
    %86 = vector.broadcast %83 : vector<1x512xf32> to vector<32x512xf32>
    %87 = arith.mulf %85, %86 : vector<32x512xf32>
    %88 = arith.addf %82, %87 : vector<32x512xf32>
    %c0_74 = arith.constant 0 : index
    %c32 = arith.constant 32 : index
    %89 = vector.load %arg6[%c0_74, %c32] : memref<1x1086xf32, #tpu.memory_space<vmem>>, vector<1x512xf32>
    %c0_75 = arith.constant 0 : index
    %c5 = arith.constant 5 : index
    %90 = vector.load %arg1[%c0_75, %c5] : memref<32x9xf32, #tpu.memory_space<vmem>>, vector<32x1xf32>
    %91 = vector.broadcast %90 : vector<32x1xf32> to vector<32x512xf32>
    %92 = vector.broadcast %89 : vector<1x512xf32> to vector<32x512xf32>
    %93 = arith.mulf %91, %92 : vector<32x512xf32>
    %94 = arith.addf %88, %93 : vector<32x512xf32>
    %c0_76 = arith.constant 0 : index
    %c60 = arith.constant 60 : index
    %95 = vector.load %arg6[%c0_76, %c60] : memref<1x1086xf32, #tpu.memory_space<vmem>>, vector<1x512xf32>
    %c0_77 = arith.constant 0 : index
    %c6 = arith.constant 6 : index
    %96 = vector.load %arg1[%c0_77, %c6] : memref<32x9xf32, #tpu.memory_space<vmem>>, vector<32x1xf32>
    %97 = vector.broadcast %96 : vector<32x1xf32> to vector<32x512xf32>
    %98 = vector.broadcast %95 : vector<1x512xf32> to vector<32x512xf32>
    %99 = arith.mulf %97, %98 : vector<32x512xf32>
    %100 = arith.addf %94, %99 : vector<32x512xf32>
    %c0_78 = arith.constant 0 : index
    %c61_79 = arith.constant 61 : index
    %101 = vector.load %arg6[%c0_78, %c61_79] : memref<1x1086xf32, #tpu.memory_space<vmem>>, vector<1x512xf32>
    %c0_80 = arith.constant 0 : index
    %c7 = arith.constant 7 : index
    %102 = vector.load %arg1[%c0_80, %c7] : memref<32x9xf32, #tpu.memory_space<vmem>>, vector<32x1xf32>
    %103 = vector.broadcast %102 : vector<32x1xf32> to vector<32x512xf32>
    %104 = vector.broadcast %101 : vector<1x512xf32> to vector<32x512xf32>
    %105 = arith.mulf %103, %104 : vector<32x512xf32>
    %106 = arith.addf %100, %105 : vector<32x512xf32>
    %c0_81 = arith.constant 0 : index
    %c62 = arith.constant 62 : index
    %107 = vector.load %arg6[%c0_81, %c62] : memref<1x1086xf32, #tpu.memory_space<vmem>>, vector<1x512xf32>
    %c0_82 = arith.constant 0 : index
    %c8 = arith.constant 8 : index
    %108 = vector.load %arg1[%c0_82, %c8] : memref<32x9xf32, #tpu.memory_space<vmem>>, vector<32x1xf32>
    %109 = vector.broadcast %108 : vector<32x1xf32> to vector<32x512xf32>
    %110 = vector.broadcast %107 : vector<1x512xf32> to vector<32x512xf32>
    %111 = arith.mulf %109, %110 : vector<32x512xf32>
    %112 = arith.addf %106, %111 : vector<32x512xf32>
    %c0_83 = arith.constant 0 : index
    %c0_84 = arith.constant 0 : index
    %113 = vector.load %arg2[%c0_83, %c0_84] : memref<32x1xf32, #tpu.memory_space<vmem>>, vector<32x1xf32>
    %114 = vector.broadcast %113 : vector<32x1xf32> to vector<32x512xf32>
    %115 = arith.addf %112, %114 : vector<32x512xf32>
    %cst_85 = arith.constant 0.000000e+00 : f32
    %116 = vector.broadcast %cst_85 : f32 to vector<32x512xf32>
    %117 = arith.maximumf %115, %116 : vector<32x512xf32>
    %c0_86 = arith.constant 0 : index
    %c0_87 = arith.constant 0 : index
    %118 = vector.load %arg7[%c0_86, %c0_87] : memref<32x1024xf32, #tpu.memory_space<vmem>>, vector<32x512xf32>
    tpu.vector_store %arg7[%c0_86, %c0_87], %117 {strides = array<i32>} : memref<32x1024xf32, #tpu.memory_space<vmem>>, vector<32x512xf32>,
    %cst_88 = arith.constant 0.000000e+00 : f32
    %119 = vector.broadcast %cst_88 : f32 to vector<32x512xf32>
    %c0_89 = arith.constant 0 : index
    %c512 = arith.constant 512 : index
    %120 = vector.load %arg6[%c0_89, %c512] : memref<1x1086xf32, #tpu.memory_space<vmem>>, vector<1x512xf32>
    %c0_90 = arith.constant 0 : index
    %c0_91 = arith.constant 0 : index
    %121 = vector.load %arg1[%c0_90, %c0_91] : memref<32x9xf32, #tpu.memory_space<vmem>>, vector<32x1xf32>
    %122 = vector.broadcast %121 : vector<32x1xf32> to vector<32x512xf32>
    %123 = vector.broadcast %120 : vector<1x512xf32> to vector<32x512xf32>
    %124 = arith.mulf %122, %123 : vector<32x512xf32>
    %125 = arith.addf %119, %124 : vector<32x512xf32>
    %c0_92 = arith.constant 0 : index
    %c513 = arith.constant 513 : index
    %126 = vector.load %arg6[%c0_92, %c513] : memref<1x1086xf32, #tpu.memory_space<vmem>>, vector<1x512xf32>
    %c0_93 = arith.constant 0 : index
    %c1_94 = arith.constant 1 : index
    %127 = vector.load %arg1[%c0_93, %c1_94] : memref<32x9xf32, #tpu.memory_space<vmem>>, vector<32x1xf32>
    %128 = vector.broadcast %127 : vector<32x1xf32> to vector<32x512xf32>
    %129 = vector.broadcast %126 : vector<1x512xf32> to vector<32x512xf32>
    %130 = arith.mulf %128, %129 : vector<32x512xf32>
    %131 = arith.addf %125, %130 : vector<32x512xf32>
    %c0_95 = arith.constant 0 : index
    %c514 = arith.constant 514 : index
    %132 = vector.load %arg6[%c0_95, %c514] : memref<1x1086xf32, #tpu.memory_space<vmem>>, vector<1x512xf32>
    %c0_96 = arith.constant 0 : index
    %c2_97 = arith.constant 2 : index
    %133 = vector.load %arg1[%c0_96, %c2_97] : memref<32x9xf32, #tpu.memory_space<vmem>>, vector<32x1xf32>
    %134 = vector.broadcast %133 : vector<32x1xf32> to vector<32x512xf32>
    %135 = vector.broadcast %132 : vector<1x512xf32> to vector<32x512xf32>
    %136 = arith.mulf %134, %135 : vector<32x512xf32>
    %137 = arith.addf %131, %136 : vector<32x512xf32>
    %c0_98 = arith.constant 0 : index
    %c542 = arith.constant 542 : index
    %138 = vector.load %arg6[%c0_98, %c542] : memref<1x1086xf32, #tpu.memory_space<vmem>>, vector<1x512xf32>
    %c0_99 = arith.constant 0 : index
    %c3_100 = arith.constant 3 : index
    %139 = vector.load %arg1[%c0_99, %c3_100] : memref<32x9xf32, #tpu.memory_space<vmem>>, vector<32x1xf32>
    %140 = vector.broadcast %139 : vector<32x1xf32> to vector<32x512xf32>
    %141 = vector.broadcast %138 : vector<1x512xf32> to vector<32x512xf32>
    %142 = arith.mulf %140, %141 : vector<32x512xf32>
    %143 = arith.addf %137, %142 : vector<32x512xf32>
    %c0_101 = arith.constant 0 : index
    %c543 = arith.constant 543 : index
    %144 = vector.load %arg6[%c0_101, %c543] : memref<1x1086xf32, #tpu.memory_space<vmem>>, vector<1x512xf32>
    %c0_102 = arith.constant 0 : index
    %c4_103 = arith.constant 4 : index
    %145 = vector.load %arg1[%c0_102, %c4_103] : memref<32x9xf32, #tpu.memory_space<vmem>>, vector<32x1xf32>
    %146 = vector.broadcast %145 : vector<32x1xf32> to vector<32x512xf32>
    %147 = vector.broadcast %144 : vector<1x512xf32> to vector<32x512xf32>
    %148 = arith.mulf %146, %147 : vector<32x512xf32>
    %149 = arith.addf %143, %148 : vector<32x512xf32>
    %c0_104 = arith.constant 0 : index
    %c544 = arith.constant 544 : index
    %150 = vector.load %arg6[%c0_104, %c544] : memref<1x1086xf32, #tpu.memory_space<vmem>>, vector<1x512xf32>
    %c0_105 = arith.constant 0 : index
    %c5_106 = arith.constant 5 : index
    %151 = vector.load %arg1[%c0_105, %c5_106] : memref<32x9xf32, #tpu.memory_space<vmem>>, vector<32x1xf32>
    %152 = vector.broadcast %151 : vector<32x1xf32> to vector<32x512xf32>
    %153 = vector.broadcast %150 : vector<1x512xf32> to vector<32x512xf32>
    %154 = arith.mulf %152, %153 : vector<32x512xf32>
    %155 = arith.addf %149, %154 : vector<32x512xf32>
    %c0_107 = arith.constant 0 : index
    %c572 = arith.constant 572 : index
    %156 = vector.load %arg6[%c0_107, %c572] : memref<1x1086xf32, #tpu.memory_space<vmem>>, vector<1x512xf32>
    %c0_108 = arith.constant 0 : index
    %c6_109 = arith.constant 6 : index
    %157 = vector.load %arg1[%c0_108, %c6_109] : memref<32x9xf32, #tpu.memory_space<vmem>>, vector<32x1xf32>
    %158 = vector.broadcast %157 : vector<32x1xf32> to vector<32x512xf32>
    %159 = vector.broadcast %156 : vector<1x512xf32> to vector<32x512xf32>
    %160 = arith.mulf %158, %159 : vector<32x512xf32>
    %161 = arith.addf %155, %160 : vector<32x512xf32>
    %c0_110 = arith.constant 0 : index
    %c573 = arith.constant 573 : index
    %162 = vector.load %arg6[%c0_110, %c573] : memref<1x1086xf32, #tpu.memory_space<vmem>>, vector<1x512xf32>
    %c0_111 = arith.constant 0 : index
    %c7_112 = arith.constant 7 : index
    %163 = vector.load %arg1[%c0_111, %c7_112] : memref<32x9xf32, #tpu.memory_space<vmem>>, vector<32x1xf32>
    %164 = vector.broadcast %163 : vector<32x1xf32> to vector<32x512xf32>
    %165 = vector.broadcast %162 : vector<1x512xf32> to vector<32x512xf32>
    %166 = arith.mulf %164, %165 : vector<32x512xf32>
    %167 = arith.addf %161, %166 : vector<32x512xf32>
    %c0_113 = arith.constant 0 : index
    %c574 = arith.constant 574 : index
    %168 = vector.load %arg6[%c0_113, %c574] : memref<1x1086xf32, #tpu.memory_space<vmem>>, vector<1x512xf32>
    %c0_114 = arith.constant 0 : index
    %c8_115 = arith.constant 8 : index
    %169 = vector.load %arg1[%c0_114, %c8_115] : memref<32x9xf32, #tpu.memory_space<vmem>>, vector<32x1xf32>
    %170 = vector.broadcast %169 : vector<32x1xf32> to vector<32x512xf32>
    %171 = vector.broadcast %168 : vector<1x512xf32> to vector<32x512xf32>
    %172 = arith.mulf %170, %171 : vector<32x512xf32>
    %173 = arith.addf %167, %172 : vector<32x512xf32>
    %c0_116 = arith.constant 0 : index
    %c0_117 = arith.constant 0 : index
    %174 = vector.load %arg2[%c0_116, %c0_117] : memref<32x1xf32, #tpu.memory_space<vmem>>, vector<32x1xf32>
    %175 = vector.broadcast %174 : vector<32x1xf32> to vector<32x512xf32>
    %176 = arith.addf %173, %175 : vector<32x512xf32>
    %cst_118 = arith.constant 0.000000e+00 : f32
    %177 = vector.broadcast %cst_118 : f32 to vector<32x512xf32>
    %178 = arith.maximumf %176, %177 : vector<32x512xf32>
    %c0_119 = arith.constant 0 : index
    %c512_120 = arith.constant 512 : index
    %179 = vector.load %arg7[%c0_119, %c512_120] : memref<32x1024xf32, #tpu.memory_space<vmem>>, vector<32x512xf32>
    tpu.vector_store %arg7[%c0_119, %c512_120], %178 {strides = array<i32>} : memref<32x1024xf32, #tpu.memory_space<vmem>>, vector<32x512xf32>,
    %c0_121 = arith.constant 0 : index
    %c0_122 = arith.constant 0 : index
    %180 = vector.load %arg3[%c0_121, %c0_122] : memref<16x32xf32, #tpu.memory_space<vmem>>, vector<16x32xf32>
    %c0_123 = arith.constant 0 : index
    %c0_124 = arith.constant 0 : index
    %181 = vector.load %arg7[%c0_123, %c0_124] : memref<32x1024xf32, #tpu.memory_space<vmem>>, vector<32x1024xf32>
    %cst_125 = arith.constant dense<0.000000e+00> : vector<16x1024xf32>
    %182 = tpu.matmul %180, %181, %cst_125 {dimension_numbers = #tpu.dot_dimension_numbers<[1], [0], [0], [1], [0, 0, 1, 1], [], []>} : vector<16x32xf32>, vector<32x1024xf32>, vector<16x1024xf32> -> vector<16x1024xf32>
    %c0_126 = arith.constant 0 : index
    %c0_127 = arith.constant 0 : index
    %183 = vector.load %arg4[%c0_126, %c0_127] : memref<16x1xf32, #tpu.memory_space<vmem>>, vector<16x1xf32>
    %184 = vector.broadcast %183 : vector<16x1xf32> to vector<16x1024xf32>
    %185 = arith.addf %182, %184 : vector<16x1024xf32>
    %186 = math.tanh %185 : vector<16x1024xf32>
    %c0_128 = arith.constant 0 : index
    %c0_129 = arith.constant 0 : index
    %187 = vector.load %arg5[%c0_128, %c0_129] : memref<16x1024xf32, #tpu.memory_space<vmem>>, vector<16x1024xf32>
    tpu.vector_store %arg5[%c0_128, %c0_129], %186 {strides = array<i32>} : memref<16x1024xf32, #tpu.memory_space<vmem>>, vector<16x1024xf32>,
    return
  }
}

</mosaic_0001>

<bundles_post_ra>
// kernel: tpu_custom_call.1
= control target key start
LH: loop header
LB: loop body
LE: loop exit
PB: predicated region body
PF: predicated region fallthrough
CT: control target
= control target key end

     0   :  { %s3581_s22 = smov 35   ;;  %s3582_s23 = smov 31   ;;  %v6831_v10 = vmov 1   ;;  %v6829_v11 = vmov 0   ;;  %v6820_v12 = vmov 0.0   ;;  %v22_v25 = vlaneseq  ;;  %s6814_s0 = inlined_call_operand.vmem [shape: f32[1,784], index: 0, kind: input, shape index: {}]   ;;  %s6815_s1 = inlined_call_operand.vmem [shape: f32[32,9], index: 1, kind: input, shape index: {}]   ;;  %s6816_s2 = inlined_call_operand.vmem [shape: f32[32,1], index: 2, kind: input, shape index: {}]   ;;  %s6817_s3 = inlined_call_operand.vmem [shape: f32[16,32], index: 3, kind: input, shape index: {}]   ;;  %s6818_s4 = inlined_call_operand.vmem [shape: f32[16,1], index: 4, kind: input, shape index: {}]   ;;  %s6819_s5 = inlined_call_operand.hbm [shape: f32[16,1024], index: 5, kind: output, shape index: {}]  }
   0x1   :  { %v45_v0 = vld [vmem:[%s6814_s0] sm:$0x1]  ;;  %s3583_s28 = smov 37   ;;  %s3584_s29 = smov 33   ;;  %v78_v4 = vld [vmem:[%s6814_s0 + $0x1] sm:$0x1]  ;;  %3479 = vset.pattern.permute.xlu0 %v6831_v10  ;;  %3477 = vset.pattern.permute.xlu1 %v6829_v11 }
   0x2   :  { %v27_v1 = vld [vmem:[%s6814_s0] sm:$0x1]  ;;  %47 = vrot.lane.b32.xlu1 %v45_v0, %s3581_s22  ;;  %s3585_s9 = smov 41   ;;  %s3586_s10 = smov 39   ;;  %v96_v6 = vld [vmem:[%s6814_s0 + $0x1] sm:$0x1]  ;;  %3097 = vmatprep.mubr.f32.mxu0 %v6820_v12 }
   0x3   :  { %29 = vrot.lane.b32.xlu0 %v27_v1, %s3582_s23  ;;  %v54_v2 = vld [vmem:[%s6814_s0] sm:$0x1]  ;;  %v87_v7 = vld [vmem:[%s6814_s0 + $0x1] sm:$0x1]  ;;  %s3587_s15 = smov 45   ;;  %s3588_s16 = smov 43   ;;  %3174 = vmatprep.mubr.f32.mxu1 %v6820_v12 }
   0x4   :  { %v36_v3 = vld [vmem:[%s6814_s0] sm:$0x1]  ;;  %v117_v8 = vld [vmem:[%s6814_s0 + $0x1] sm:$0x3]  ;;  %21 = vst [vmem:[#allocation2] sm:$0xff] %v6820_v12  ;;  %s3592_s21 = smov 49  }
   0x5   :  { %v66_v5 = vld [vmem:[%s6814_s0] sm:$0x3]  ;;  %s3593_s22 = smov 47   ;;  %v138_v13 = vld [vmem:[%s6814_s0 + $0x2] sm:$0x1]  ;;  %s3594_s27 = smov 53  }
   0x6   :  { %56 = vrot.lane.b32.xlu1 %v54_v2, %s3583_s28  ;;  %v108_v9 = vld [vmem:[%s6814_s0 + $0x1] sm:$0x1]  ;;  %v129_v14 = vld [vmem:[%s6814_s0 + $0x2] sm:$0x1]  ;;  %s3595_s28 = smov 51   ;;  %s3596_s8 = smov 57  }
   0x7   :  { %38 = vrot.lane.b32.xlu0 %v36_v3, %s3584_s29  ;;  %v159_v15 = vld [vmem:[%s6814_s0 + $0x2] sm:$0x3]  ;;  %s3598_s14 = smov 61   ;;  %s3600_s20 = smov 65   ;;  %v222_v21 = vld [vmem:[%s6814_s0 + $0x4] sm:$0x1] }
   0x8   :  { %v150_v16 = vld [vmem:[%s6814_s0 + $0x2] sm:$0x1]  ;;  %v180_v17 = vld [vmem:[%s6814_s0 + $0x3] sm:$0x1]  ;;  %s3602_s26 = smov 69   ;;  %s3604_s7 = smov 73  }
   0x9   :  { %v171_v18 = vld [vmem:[%s6814_s0 + $0x3] sm:$0x1]  ;;  %v243_v23 = vld [vmem:[%s6814_s0 + $0x4] sm:$0x1]  ;;  %v264_v26 = vld [vmem:[%s6814_s0 + $0x5] sm:$0x1] }
   0xa   :  { %80 = vrot.lane.b32.xlu1 %v78_v4, %s3585_s9  ;;  %s3597_s9 = smov 55   ;;  %v201_v19 = vld [vmem:[%s6814_s0 + $0x3] sm:$0x1]  ;;  %v231_v24 = vld [vmem:[%s6814_s0 + $0x4] sm:$0x1]  ;;  %vm24_vm0 = vcmp.lt.s32.totalorder %v22_v25, 62 }
   0xb   :  { %68 = vrot.lane.b32.xlu0 %v66_v5, %s3586_s10  ;;  %v189_v20 = vld [vmem:[%s6814_s0 + $0x3] sm:$0x1]  ;;  %v252_v27 = vld [vmem:[%s6814_s0 + $0x4] sm:$0x3]  ;;  %26 = vst.msk [vmem:[#allocation2 + $0x8] sm:$0x1] %vm24_vm0, %v6820_v12 }
   0xc   :  { %v210_v22 = vld [vmem:[%s6814_s0 + $0x3] sm:$0x3] }
   0xe   :  { %98 = vrot.lane.b32.xlu1 %v96_v6, %s3587_s15  ;;  %s3599_s15 = smov 59  }
   0xf   :  { %89 = vrot.lane.b32.xlu0 %v87_v7, %s3588_s16 }
  0x12   :  { %119 = vrot.lane.b32.xlu1 %v117_v8, %s3592_s21  ;;  %s3601_s21 = smov 63  }
  0x13   :  { %110 = vrot.lane.b32.xlu0 %v108_v9, %s3593_s22 }
  0x16   :  { %140 = vrot.lane.b32.xlu1 %v138_v13, %s3594_s27  ;;  %s3603_s27 = smov 67  }
  0x17   :  { %131 = vrot.lane.b32.xlu0 %v129_v14, %s3595_s28 }
  0x1a   :  { %161 = vrot.lane.b32.xlu1 %v159_v15, %s3596_s8  ;;  %s3605_s8 = smov 71  }
  0x1b   :  { %152 = vrot.lane.b32.xlu0 %v150_v16, %s3597_s9 }
  0x1e   :  { %182 = vrot.lane.b32.xlu1 %v180_v17, %s3598_s14 }
  0x1f   :  { %173 = vrot.lane.b32.xlu0 %v171_v18, %s3599_s15 }
  0x22   :  { %203 = vrot.lane.b32.xlu1 %v201_v19, %s3600_s20 }
  0x23   :  { %191 = vrot.lane.b32.xlu0 %v189_v20, %s3601_s21 }
  0x26   :  { %224 = vrot.lane.b32.xlu1 %v222_v21, %s3602_s26 }
  0x27   :  { %212 = vrot.lane.b32.xlu0 %v210_v22, %s3603_s27 }
  0x2a   :  { %245 = vrot.lane.b32.xlu1 %v243_v23, %s3604_s7 }
  0x2b   :  { %233 = vrot.lane.b32.xlu0 %v231_v24, %s3605_s8 }
  0x2c   :  { %10 = vsyncpa [#allocation5], 0  ;;  %s3606_s13 = smov 77   ;;  %s3607_s14 = smov 75   ;;  %v285_v28 = vld [vmem:[%s6814_s0 + $0x5] sm:$0x1] }
  0x2d   :  { %v273_v29 = vld [vmem:[%s6814_s0 + $0x5] sm:$0x1]  ;;  %s3608_s19 = smov 81   ;;  %s3609_s20 = smov 79   ;;  %v3754_v32 = vld [vmem:[%s6815_s1 + $0x8] sm:$0xff]  ;;  %v3761_v33 = vld [vmem:[%s6815_s1 + $0x10] sm:$0xff] }
  0x2e   :  { %266 = vrot.lane.b32.xlu1 %v264_v26, %s3606_s13  ;;  %v303_v30 = vld [vmem:[%s6814_s0 + $0x5] sm:$0x3]  ;;  %s3610_s25 = smov 85   ;;  %s3611_s26 = smov 83   ;;  %v6827_v35 = vmov 2   ;;  %v3774_v36 = vld [vmem:[%s6815_s1 + $0x18] sm:$0xff] }
  0x2f   :  { %254 = vrot.lane.b32.xlu0 %v252_v27, %s3607_s14  ;;  %v294_v31 = vld [vmem:[%s6814_s0 + $0x5] sm:$0x1]  ;;  %vm32_vm1 = vcmp.ge.s32.totalorder %v22_v25, 31  ;;  %vm33_vm2 = vcmp.lt.s32.totalorder %v22_v25, 59  ;;  %vm3787_vm4 = vcmp.ge.s32.totalorder %v22_v25, 61  ;;  %vm42_vm5 = vcmp.lt.s32.totalorder %v22_v25, 89 }
  0x30   :  { %v3766_v34 = vld [vmem:[%s6815_s1] sm:$0xff]  ;;  %vm34_vm3 = vmand %vm32_vm1, %vm33_vm2  ;;  %vm50_vm6 = vcmp.ge.s32.totalorder %v22_v25, 91  ;;  %vm51_vm7 = vcmp.lt.s32.totalorder %v22_v25, 119  ;;  %vm3797_vm9 = vcmp.ge.s32.totalorder %v22_v25, 121  ;;  %vm3802_vm10 = vcmp.lt.s32.totalorder %v22_v25, 149  ;;  %s3614_s10 = smov 127  }
  0x31   :  { %vm43_vm8 = vmand %vm3787_vm4, %vm42_vm5  ;;  %vm59_vm12 = vcmask 302080   ;;  %vm3811_vm14 = vcmp.ge.s32.totalorder %v22_v25, 23  ;;  %vm3816_vm15 = vcmp.lt.s32.totalorder %v22_v25, 51  ;;  %vm3821_vm0 = vcmp.ge.s32.totalorder %v22_v25, 53  ;;  %s3615_s11 = smov 126   ;;  %s3617_s12 = smov 98  }
  0x32   :  { %287 = vrot.lane.b32.xlu1 %v285_v28, %s3608_s19  ;;  %vm52_vm11 = vmand %vm50_vm6, %vm51_vm7  ;;  %vm3826_vm1 = vcmp.lt.s32.totalorder %v22_v25, 81  ;;  %vm71_vm2 = vcmask 318464   ;;  %vm3836_vm4 = vcmp.lt.s32.totalorder %v22_v25, 111  ;;  %vm3849_vm7 = vcmp.ge.s32.totalorder %v22_v25, 113  ;;  %s3619_s13 = smov 97   ;;  %s3621_s14 = smov 96  }
  0x33   :  { %275 = vrot.lane.b32.xlu0 %v273_v29, %s3609_s20  ;;  %vm64_vm13 = vmand %vm3797_vm9, %vm3802_vm10  ;;  %vm3863_vm10 = vcmp.ge.s32.totalorder %v22_v25, 15  ;;  %v6824_v37 = vmov 3   ;;  %v4128_v22 = vshrl.u32 %v22_v25, 7  ;;  %s3623_s23 = smov 68   ;;  %s3625_s24 = smov 66  }
  0x34   :  { %vm76_vm5 = vmand %vm3811_vm14, %vm3816_vm15  ;;  %vm3881_vm15 = vcmp.ge.s32.totalorder %v22_v25, 45 }
  0x35   :  { %vm85_vm6 = vmand %vm3821_vm0, %vm3826_vm1  ;;  %vm3886_vm0 = vcmp.lt.s32.totalorder %v22_v25, 73  ;;  %vm3891_vm1 = vcmp.ge.s32.totalorder %v22_v25, 75 }
  0x36   :  { %305 = vrot.lane.b32.xlu1 %v303_v30, %s3610_s25 }
  0x37   :  { %296 = vrot.lane.b32.xlu0 %v294_v31, %s3611_s26  ;;  %v4145_v31 = vsub.s32 2, %v4128_v22 }
  0x39   :  { %7066 = vst [vmem:[#allocation9_spill] sm:$0xff] %v4145_v31 }
  0x3a   :  { %327 = vperm.xlu1 %3477, %v3754_v32  }
  0x3b   :  { %399 = vperm.xlu0 %3479, %v3754_v32  }
  0x3e   :  { %332 = vperm.xlu1 %3477, %v3761_v33  }
  0x3f   :  { %3480 = vset.pattern.permute.xlu0 %v6827_v35 }
  0x40   :  { %566 = vperm.xlu0 %3480, %v3766_v34  }
  0x42   :  { %3478 = vset.pattern.permute.xlu1 %v6831_v10 }
  0x43   :  { %395 = vperm.xlu1 %3478, %v3766_v34  }
  0x44   :  { %578 = vperm.xlu0 %3480, %v3774_v36  }
  0x47   :  { %403 = vperm.xlu1 %3478, %v3761_v33  }
  0x48   :  { %3483 = vset.pattern.permute.xlu0 %v6824_v37 }
  0x4b   :  { %407 = vperm.xlu1 %3478, %v3774_v36  }
  0x4f   :  { %3481 = vset.pattern.permute.xlu1 %v6827_v35 }
  0x50   :  { %570 = vperm.xlu1 %3481, %v3754_v32  }
  0x54   :  { %574 = vperm.xlu1 %3481, %v3761_v33  }
  0x58   :  { %3482 = vset.pattern.permute.xlu1 %v6824_v37 }
  0x74   :  { %v48_v38 = vpop.permute.xlu1 %47 }
  0x75   :  { %v30_v39 = vpop.permute.xlu0 %29 }
  0x76   :  { %35 = vst.msk [vmem:[#allocation2] sm:$0x1] %vm34_vm3, %v30_v39  ;;  %vm3831_vm3 = vcmp.ge.s32.totalorder %v22_v25, 83 }
  0x77   :  { %vm94_vm9 = vmand %vm3831_vm3, %vm3836_vm4  ;;  %vm122_vm3 = vcmask 400384  }
  0x78   :  { %v57_v42 = vpop.permute.xlu1 %56  ;;  %vm127_vm4 = vmand %vm3881_vm15, %vm3886_vm0  ;;  %vm3947_vm15 = vcmp.ge.s32.totalorder %v22_v25, 67  ;;  %vm3952_vm0 = vcmp.lt.s32.totalorder %v22_v25, 95 }
  0x79   :  { %v39_v43 = vpop.permute.xlu0 %38  ;;  %v58_v44 = vrot.slane %v57_v42, 7 }
  0x7a   :  { %44 = vst.msk [vmem:[#allocation2] sm:$0x1] %vm43_vm8, %v39_v43  ;;  %vm3854_vm8 = vcmp.lt.s32.totalorder %v22_v25, 141 }
  0x7b   :  { %53 = vst.msk [vmem:[#allocation2] sm:$0x1] %vm52_vm11, %v48_v38  ;;  %v60_v47 = vsel %vm59_vm12, %v58_v44, %v57_v42  ;;  %vm3868_vm11 = vcmp.lt.s32.totalorder %v22_v25, 43  ;;  %vm101_vm12 = vcmask 367616  }
  0x7c   :  { %v81_v50 = vpop.permute.xlu1 %80  ;;  %65 = vst.msk [vmem:[#allocation2] sm:$0x3] %vm64_vm13, %v60_v47  ;;  %vm106_vm13 = vmand %vm3849_vm7, %vm3854_vm8  ;;  %vm3914_vm7 = vcmp.lt.s32.totalorder %v22_v25, 133  ;;  %vm3919_vm8 = vcmp.ge.s32.totalorder %v22_v25, 7 }
  0x7d   :  { %v69_v51 = vpop.permute.xlu0 %68  ;;  %vm115_vm14 = vmand %vm3863_vm10, %vm3868_vm11  ;;  %vm143_vm10 = vcmask 433152  }
  0x7e   :  { %v70_v54 = vrot.slane %v69_v51, 1 }
  0x80   :  { %v72_v57 = vsel %vm71_vm2, %v69_v51, %v70_v54  ;;  %v99_v60 = vpop.permute.xlu1 %98  ;;  %vm3896_vm2 = vcmp.lt.s32.totalorder %v22_v25, 103 }
  0x81   :  { %77 = vst.msk [vmem:[#allocation2 + $0x1] sm:$0x1] %vm76_vm5, %v72_v57  ;;  %v90_v61 = vpop.permute.xlu0 %89  ;;  %v100_v62 = vrot.slane %v99_v60, 7  ;;  %vm136_vm5 = vmand %vm3891_vm1, %vm3896_vm2  ;;  %vm164_vm1 = vcmask 465920   ;;  %vm185_vm2 = vcmp.ge.s32.totalorder %v22_v25, 97 }
  0x82   :  { %86 = vst.msk [vmem:[#allocation2 + $0x1] sm:$0x1] %vm85_vm6, %v81_v50  ;;  %vm3909_vm6 = vcmp.ge.s32.totalorder %v22_v25, 105 }
  0x83   :  { %95 = vst.msk [vmem:[#allocation2 + $0x1] sm:$0x1] %vm94_vm9, %v90_v61  ;;  %v102_v1 = vsel %vm101_vm12, %v100_v62, %v99_v60  ;;  %vm3924_vm9 = vcmp.lt.s32.totalorder %v22_v25, 35  ;;  %vm148_vm11 = vmand %vm3909_vm6, %vm3914_vm7  ;;  %vm3967_vm7 = vcmp.ge.s32.totalorder %v22_v25, 127 }
  0x84   :  { %v120_v4 = vpop.permute.xlu1 %119  ;;  %107 = vst.msk [vmem:[#allocation2 + $0x1] sm:$0x3] %vm106_vm13, %v102_v1  ;;  %vm157_vm12 = vmand %vm3919_vm8, %vm3924_vm9  ;;  %vm3937_vm13 = vcmp.ge.s32.totalorder %v22_v25, 37  ;;  %vm3972_vm8 = vcmp.lt.s32.totalorder %v22_v25, 155  ;;  %vm3979_vm9 = vcmp.ge.s32.totalorder %v22_v25, 29 }
  0x85   :  { %v111_v5 = vpop.permute.xlu0 %110  ;;  %v121_v6 = vrot.slane %v120_v4, 1 }
  0x86   :  { %116 = vst.msk [vmem:[#allocation2 + $0x2] sm:$0x1] %vm115_vm14, %v111_v5  ;;  %vm3942_vm14 = vcmp.lt.s32.totalorder %v22_v25, 65 }
  0x87   :  { %v123_v9 = vsel %vm122_vm3, %v120_v4, %v121_v6  ;;  %vm186_vm3 = vcmp.lt.s32.totalorder %v22_v25, 125 }
  0x88   :  { %v141_v15 = vpop.permute.xlu1 %140  ;;  %128 = vst.msk [vmem:[#allocation2 + $0x2] sm:$0x1] %vm127_vm4, %v123_v9  ;;  %vm169_vm4 = vmand %vm3937_vm13, %vm3942_vm14  ;;  %vm3997_vm14 = vcmp.ge.s32.totalorder %v22_v25, 59 }
  0x89   :  { %v132_v16 = vpop.permute.xlu0 %131  ;;  %v142_v17 = vrot.slane %v141_v15, 7  ;;  %vm187_vm6 = vmand %vm185_vm2, %vm186_vm3  ;;  %vm215_vm2 = vcmask 547840  }
  0x8a   :  { %137 = vst.msk [vmem:[#allocation2 + $0x2] sm:$0x1] %vm136_vm5, %v132_v16  ;;  %vm178_vm5 = vmand %vm3947_vm15, %vm3952_vm0  ;;  %vm4002_vm15 = vcmp.lt.s32.totalorder %v22_v25, 87  ;;  %vm4007_vm0 = vcmp.ge.s32.totalorder %v22_v25, 89 }
  0x8b   :  { %v144_v20 = vsel %vm143_vm10, %v142_v17, %v141_v15  ;;  %vm3984_vm10 = vcmp.lt.s32.totalorder %v22_v25, 57  ;;  %vm220_vm3 = vmand %vm3997_vm14, %vm4002_vm15  ;;  %vm4064_vm14 = vcmp.ge.s32.totalorder %v22_v25, 81  ;;  %vm4069_vm15 = vcmp.lt.s32.totalorder %v22_v25, 109 }
  0x8c   :  { %v162_v23 = vpop.permute.xlu1 %161  ;;  %149 = vst.msk [vmem:[#allocation2 + $0x2] sm:$0x3] %vm148_vm11, %v144_v20  ;;  %vm194_vm11 = vcmask 515072   ;;  %vm208_vm13 = vmand %vm3979_vm9, %vm3984_vm10  ;;  %vm236_vm9 = vcmask 580608  }
  0x8d   :  { %v153_v24 = vpop.permute.xlu0 %152  ;;  %v163_v26 = vrot.slane %v162_v23, 1 }
  0x8e   :  { %158 = vst.msk [vmem:[#allocation2 + $0x3] sm:$0x1] %vm157_vm12, %v153_v24  ;;  %vm199_vm12 = vmand %vm3967_vm7, %vm3972_vm8  ;;  %vm4036_vm7 = vcmp.ge.s32.totalorder %v22_v25, 21  ;;  %vm4041_vm8 = vcmp.lt.s32.totalorder %v22_v25, 49 }
  0x8f   :  { %v165_v27 = vsel %vm164_vm1, %v162_v23, %v163_v26  ;;  %vm4012_vm1 = vcmp.lt.s32.totalorder %v22_v25, 117  ;;  %v4133_v26 = vsub.s32 0, %v4128_v22 }
  0x90   :  { %v183_v28 = vpop.permute.xlu1 %182  ;;  %170 = vst.msk [vmem:[#allocation2 + $0x3] sm:$0x1] %vm169_vm4, %v165_v27  ;;  %vm229_vm4 = vmand %vm4007_vm0, %vm4012_vm1  ;;  %vm257_vm0 = vcmask 613376   ;;  %v4136_v27 = vsub.s32 1, %v4128_v22 }
  0x91   :  { %v174_v29 = vpop.permute.xlu0 %173  ;;  %7064 = vst [vmem:[#allocation7_spill] sm:$0xff] %v4133_v26 }
  0x92   :  { %179 = vst.msk [vmem:[#allocation2 + $0x3] sm:$0x1] %vm178_vm5, %v174_v29  ;;  %vm4025_vm5 = vcmp.ge.s32.totalorder %v22_v25, 119  ;;  %7065 = vst [vmem:[#allocation8_spill] sm:$0xff] %v4136_v27 }
  0x93   :  { %188 = vst.msk [vmem:[#allocation2 + $0x3] sm:$0x1] %vm187_vm6, %v183_v28  ;;  %vm4030_vm6 = vcmp.lt.s32.totalorder %v22_v25, 147 }
  0x94   :  { %v204_v40 = vpop.permute.xlu1 %203  ;;  %vm241_vm10 = vmand %vm4025_vm5, %vm4030_vm6  ;;  %vm4087_vm5 = vcmp.lt.s32.totalorder %v22_v25, 139  ;;  %vm4092_vm6 = vcmp.ge.s32.totalorder %v22_v25, 13 }
  0x95   :  { %v192_v41 = vpop.permute.xlu0 %191 }
  0x96   :  { %v193_v42 = vrot.slane %v192_v41, 7 }
  0x98   :  { %v195_v45 = vsel %vm194_vm11, %v193_v42, %v192_v41  ;;  %v225_v48 = vpop.permute.xlu1 %224  ;;  %vm250_vm11 = vmand %vm4036_vm7, %vm4041_vm8  ;;  %vm4097_vm7 = vcmp.lt.s32.totalorder %v22_v25, 41  ;;  %vm278_vm8 = vcmask 646144   ;;  %v6826_v42 = vsub.s32 4, %v4128_v22 }
  0x99   :  { %200 = vst.msk [vmem:[#allocation2 + $0x3] sm:$0x3] %vm199_vm12, %v195_v45  ;;  %v213_v49 = vpop.permute.xlu0 %212  ;;  %vm4054_vm12 = vcmp.ge.s32.totalorder %v22_v25, 51 }
  0x9a   :  { %209 = vst.msk [vmem:[#allocation2 + $0x4] sm:$0x1] %vm208_vm13, %v204_v40  ;;  %v214_v50 = vrot.slane %v213_v49, 1  ;;  %vm4059_vm13 = vcmp.lt.s32.totalorder %v22_v25, 79 }
  0x9b   :  { %vm262_vm1 = vmand %vm4054_vm12, %vm4059_vm13  ;;  %vm311_vm13 = vcmp.ge.s32.totalorder %v22_v25, 73 }
  0x9c   :  { %v216_v53 = vsel %vm215_vm2, %v213_v49, %v214_v50  ;;  %v246_v56 = vpop.permute.xlu1 %245  ;;  %vm292_vm12 = vmand %vm4092_vm6, %vm4097_vm7  ;;  %vm951_vm6 = vcmask 793600   ;;  %vm1096_vm7 = vcmask 785408  }
  0x9d   :  { %221 = vst.msk [vmem:[#allocation2 + $0x4] sm:$0x1] %vm220_vm3, %v216_v53  ;;  %v234_v57 = vpop.permute.xlu0 %233  ;;  %vm271_vm3 = vmand %vm4064_vm14, %vm4069_vm15  ;;  %vm312_vm14 = vcmp.lt.s32.totalorder %v22_v25, 101 }
  0x9e   :  { %230 = vst.msk [vmem:[#allocation2 + $0x4] sm:$0x1] %vm229_vm4, %v225_v48  ;;  %v235_v58 = vrot.slane %v234_v57, 7  ;;  %vm4082_vm4 = vcmp.ge.s32.totalorder %v22_v25, 111 }
  0xa0   :  { %v237_v61 = vsel %vm236_vm9, %v235_v58, %v234_v57  ;;  %v267_v0 = vpop.permute.xlu1 %266  ;;  %vm4102_vm9 = vcmp.ge.s32.totalorder %v22_v25, 43 }
  0xa1   :  { %242 = vst.msk [vmem:[#allocation2 + $0x4] sm:$0x3] %vm241_vm10, %v237_v61  ;;  %v255_v1 = vpop.permute.xlu0 %254  ;;  %vm4107_vm10 = vcmp.lt.s32.totalorder %v22_v25, 71  ;;  %v4148_v25 = vsub.s32 3, %v4128_v22 }
  0xa2   :  { %251 = vst.msk [vmem:[#allocation2 + $0x5] sm:$0x1] %vm250_vm11, %v246_v56  ;;  %v256_v2 = vrot.slane %v255_v1, 1  ;;  %vm283_vm11 = vmand %vm4082_vm4, %vm4087_vm5  ;;  %vm661_vm4 = vcmask 1031168   ;;  %vm806_vm5 = vcmask 801792  }
  0xa3   :  { %vm301_vm15 = vmand %vm4102_vm9, %vm4107_vm10  ;;  %7067 = vst [vmem:[#allocation10_spill] sm:$0xff] %v4148_v25  ;;  %vm1530_vm9 = vcmask 539648   ;;  %vm3026_vm10 = vcmask 261120  }
  0xa4   :  { %v258_v5 = vsel %vm257_vm0, %v255_v1, %v256_v2  ;;  %v288_v8 = vpop.permute.xlu1 %287  ;;  %vm308_vm0 = vcmask 695296  }
  0xa5   :  { %263 = vst.msk [vmem:[#allocation2 + $0x5] sm:$0x1] %vm262_vm1, %v258_v5  ;;  %v276_v9 = vpop.permute.xlu0 %275  ;;  %vm313_vm1 = vmand %vm311_vm13, %vm312_vm14 }
  0xa6   :  { %272 = vst.msk [vmem:[#allocation2 + $0x5] sm:$0x1] %vm271_vm3, %v267_v0  ;;  %v277_v15 = vrot.slane %v276_v9, 7  ;;  %vm516_vm3 = vcmask 1039360  }
  0xa8   :  { %v279_v16 = vsel %vm278_vm8, %v277_v15, %v276_v9  ;;  %v306_v17 = vpop.permute.xlu1 %305  ;;  %v393_v24 = vld [vmem:[#allocation2] sm:$0x1f]  ;;  %vm1241_vm8 = vcmask 556032  }
  0xa9   :  { %v297_v18 = vpop.permute.xlu0 %296  ;;  %284 = vst.msk [vmem:[#allocation2 + $0x5] sm:$0x3] %vm283_vm11, %v279_v16  ;;  %v307_v19 = vrot.slane %v306_v17, 1  ;;  %v4139_v28 = vrot.slane %v393_v24, %v4133_v26  ;;  %v4142_v29 = vrot.slane %v393_v24, %v4136_v27  ;;  %v4153_v40 = vrot.slane %v393_v24, %v4145_v31 }
  0xaa   :  { %293 = vst.msk [vmem:[#allocation2 + $0x6] sm:$0x1] %vm292_vm12, %v288_v8  ;;  %v4156_v41 = vrot.slane %v393_v24, %v4148_v25  ;;  %v4165_v46 = vrot.slane %v393_v24, %v6826_v42 }
  0xab   :  { %302 = vst.msk [vmem:[#allocation2 + $0x6] sm:$0x1] %vm301_vm15, %v297_v18  ;;  %v309_v20 = vsel %vm308_vm0, %v306_v17, %v307_v19 }
  0xac   :  { %314 = vst.msk [vmem:[#allocation2 + $0x6] sm:$0x1] %vm313_vm1, %v309_v20 }
  0xb9   :  { %v4125_v21 = vpop.permute.xlu1 %327 }
  0xba   :  { %v400_v45 = vpop.permute.xlu0 %399 }
  0xbb   :  { %v441_v47 = vmul.f32 %v4139_v28, %v400_v45  ;;  %v443_v49 = vmul.f32 %v4153_v40, %v400_v45  ;;  %v442_v50 = vmul.f32 %v4142_v29, %v400_v45  ;;  %v445_v51 = vmul.f32 %v4165_v46, %v400_v45 }
  0xbc   :  { %v444_v52 = vmul.f32 %v4156_v41, %v400_v45 }
  0xbd   :  { %v4130_v23 = vpop.permute.xlu1 %332 }
  0xbf   :  { %v567_v1 = vpop.permute.xlu0 %566 }
  0xc0   :  { %v581_v2 = vmul.f32 %v567_v1, %v4139_v28  ;;  %v582_v3 = vmul.f32 %v567_v1, %v4142_v29  ;;  %v583_v4 = vmul.f32 %v567_v1, %v4153_v40  ;;  %v584_v5 = vmul.f32 %v567_v1, %v4156_v41 }
  0xc1   :  { %v585_v7 = vmul.f32 %v567_v1, %v4165_v46 }
  0xc2   :  { %v396_v30 = vpop.permute.xlu1 %395 }
  0xc3   :  { %v437_v38 = vmul.f32 %v4142_v29, %v396_v30  ;;  %v436_v39 = vmul.f32 %v4139_v28, %v396_v30  ;;  %v439_v43 = vmul.f32 %v4156_v41, %v396_v30  ;;  %v438_v44 = vmul.f32 %v4153_v40, %v396_v30  ;;  %v579_v24 = vpop.permute.xlu0 %578 }
  0xc4   :  { %v440_v48 = vmul.f32 %v4165_v46, %v396_v30  ;;  %v600_v45 = vmul.f32 %v579_v24, %v4165_v46 }
  0xc5   :  { %478 = vrot.lane.b32.xlu1 %v437_v38, %s3614_s10  ;;  %476 = vrot.lane.b32.xlu0 %v436_v39, %s3614_s10  ;;  %v596_v38 = vmul.f32 %v579_v24, %v4139_v28  ;;  %v597_v39 = vmul.f32 %v579_v24, %v4142_v29 }
  0xc6   :  { %v404_v53 = vpop.permute.xlu1 %403 }
  0xc7   :  { %v447_v54 = vmul.f32 %v4142_v29, %v404_v53  ;;  %v446_v55 = vmul.f32 %v4139_v28, %v404_v53  ;;  %v449_v56 = vmul.f32 %v4156_v41, %v404_v53  ;;  %v448_v57 = vmul.f32 %v4153_v40, %v404_v53 }
  0xc8   :  { %v450_v60 = vmul.f32 %v4165_v46, %v404_v53 }
  0xc9   :  { %482 = vrot.lane.b32.xlu1 %v439_v43, %s3614_s10  ;;  %480 = vrot.lane.b32.xlu0 %v438_v44, %s3614_s10  ;;  %v598_v43 = vmul.f32 %v579_v24, %v4153_v40  ;;  %v599_v44 = vmul.f32 %v579_v24, %v4156_v41 }
  0xca   :  { %v408_v58 = vpop.permute.xlu1 %407 }
  0xcb   :  { %v451_v59 = vmul.f32 %v4139_v28, %v408_v58  ;;  %v453_v61 = vmul.f32 %v4153_v40, %v408_v58  ;;  %v452_v62 = vmul.f32 %v4142_v29, %v408_v58  ;;  %v455_v63 = vmul.f32 %v4165_v46, %v408_v58 }
  0xcc   :  { %v454_v0 = vmul.f32 %v4156_v41, %v408_v58 }
  0xcd   :  { %486 = vrot.lane.b32.xlu1 %v441_v47, %s3614_s10  ;;  %484 = vrot.lane.b32.xlu0 %v440_v48, %s3614_s10 }
  0xcf   :  { %v571_v6 = vpop.permute.xlu1 %570 }
  0xd0   :  { %v586_v8 = vmul.f32 %v571_v6, %v4139_v28  ;;  %v587_v9 = vmul.f32 %v571_v6, %v4142_v29  ;;  %v588_v13 = vmul.f32 %v571_v6, %v4153_v40  ;;  %v589_v14 = vmul.f32 %v571_v6, %v4156_v41 }
  0xd1   :  { %490 = vrot.lane.b32.xlu1 %v443_v49, %s3614_s10  ;;  %488 = vrot.lane.b32.xlu0 %v442_v50, %s3614_s10  ;;  %v590_v15 = vmul.f32 %v571_v6, %v4165_v46 }
  0xd3   :  { %v575_v16 = vpop.permute.xlu1 %574 }
  0xd4   :  { %v591_v17 = vmul.f32 %v575_v16, %v4139_v28  ;;  %v592_v18 = vmul.f32 %v575_v16, %v4142_v29  ;;  %v593_v19 = vmul.f32 %v575_v16, %v4153_v40  ;;  %v594_v20 = vmul.f32 %v575_v16, %v4156_v41 }
  0xd5   :  { %494 = vrot.lane.b32.xlu1 %v445_v51, %s3614_s10  ;;  %492 = vrot.lane.b32.xlu0 %v444_v52, %s3614_s10  ;;  %v595_v30 = vmul.f32 %v575_v16, %v4165_v46  ;;  %v6822_v51 = vmov 4  }
  0xd9   :  { %498 = vrot.lane.b32.xlu1 %v447_v54, %s3614_s10  ;;  %496 = vrot.lane.b32.xlu0 %v446_v55, %s3614_s10 }
  0xdd   :  { %502 = vrot.lane.b32.xlu1 %v449_v56, %s3614_s10  ;;  %500 = vrot.lane.b32.xlu0 %v448_v57, %s3614_s10 }
  0xe1   :  { %506 = vrot.lane.b32.xlu1 %v451_v59, %s3614_s10  ;;  %504 = vrot.lane.b32.xlu0 %v450_v60, %s3614_s10 }
  0xe5   :  { %510 = vrot.lane.b32.xlu1 %v453_v61, %s3614_s10  ;;  %508 = vrot.lane.b32.xlu0 %v452_v62, %s3614_s10 }
  0xe9   :  { %514 = vrot.lane.b32.xlu1 %v455_v63, %s3614_s10  ;;  %512 = vrot.lane.b32.xlu0 %v454_v0, %s3614_s10 }
  0xed   :  { %621 = vrot.lane.b32.xlu1 %v581_v2, %s3615_s11  ;;  %623 = vrot.lane.b32.xlu0 %v582_v3, %s3615_s11 }
  0xf1   :  { %625 = vrot.lane.b32.xlu1 %v583_v4, %s3615_s11  ;;  %627 = vrot.lane.b32.xlu0 %v584_v5, %s3615_s11 }
  0xf5   :  { %629 = vrot.lane.b32.xlu1 %v585_v7, %s3615_s11  ;;  %631 = vrot.lane.b32.xlu0 %v586_v8, %s3615_s11 }
  0xf9   :  { %633 = vrot.lane.b32.xlu1 %v587_v9, %s3615_s11  ;;  %635 = vrot.lane.b32.xlu0 %v588_v13, %s3615_s11 }
  0xfd   :  { %637 = vrot.lane.b32.xlu1 %v589_v14, %s3615_s11  ;;  %639 = vrot.lane.b32.xlu0 %v590_v15, %s3615_s11 }
 0x101   :  { %641 = vrot.lane.b32.xlu1 %v591_v17, %s3615_s11  ;;  %643 = vrot.lane.b32.xlu0 %v592_v18, %s3615_s11 }
 0x105   :  { %645 = vrot.lane.b32.xlu1 %v593_v19, %s3615_s11  ;;  %647 = vrot.lane.b32.xlu0 %v594_v20, %s3615_s11 }
 0x109   :  { %649 = vrot.lane.b32.xlu1 %v595_v30, %s3615_s11  ;;  %651 = vrot.lane.b32.xlu0 %v596_v38, %s3615_s11 }
 0x10d   :  { %653 = vrot.lane.b32.xlu1 %v597_v39, %s3615_s11  ;;  %655 = vrot.lane.b32.xlu0 %v598_v43, %s3615_s11 }
 0x111   :  { %657 = vrot.lane.b32.xlu1 %v599_v44, %s3615_s11  ;;  %659 = vrot.lane.b32.xlu0 %v600_v45, %s3615_s11 }
 0x115   :  { %711 = vperm.xlu1 %3482, %v3766_v34   ;;  %715 = vperm.xlu0 %3483, %v3754_v32  }
 0x119   :  { %719 = vperm.xlu1 %3482, %v3761_v33   ;;  %3484 = vset.pattern.permute.xlu0 %v6822_v51 }
 0x11d   :  { %723 = vperm.xlu1 %3482, %v3774_v36  }
 0x121   :  { %3485 = vset.pattern.permute.xlu1 %v6822_v51 }
 0x137   :  { %v4245_v47 = vpop.permute.xlu1 %478  ;;  %v4247_v48 = vpop.permute.xlu0 %476 }
 0x13b   :  { %v4249_v49 = vpop.permute.xlu1 %482  ;;  %v4251_v50 = vpop.permute.xlu0 %480 }
 0x13f   :  { %v4255_v52 = vpop.permute.xlu1 %486  ;;  %v4257_v53 = vpop.permute.xlu0 %484 }
 0x143   :  { %v4259_v54 = vpop.permute.xlu1 %490  ;;  %v4261_v55 = vpop.permute.xlu0 %488 }
 0x147   :  { %v4263_v56 = vpop.permute.xlu1 %494  ;;  %v4265_v57 = vpop.permute.xlu0 %492 }
 0x14b   :  { %v4267_v58 = vpop.permute.xlu1 %498  ;;  %v4269_v59 = vpop.permute.xlu0 %496 }
 0x14f   :  { %v4271_v60 = vpop.permute.xlu1 %502  ;;  %v4273_v61 = vpop.permute.xlu0 %500 }
 0x153   :  { %v4275_v62 = vpop.permute.xlu1 %506  ;;  %v4277_v63 = vpop.permute.xlu0 %504 }
 0x157   :  { %v4279_v0 = vpop.permute.xlu1 %510  ;;  %v4281_v1 = vpop.permute.xlu0 %508 }
 0x15b   :  { %v4283_v2 = vpop.permute.xlu1 %514  ;;  %v4285_v3 = vpop.permute.xlu0 %512 }
 0x15f   :  { %v4287_v4 = vpop.permute.xlu1 %621  ;;  %v4289_v5 = vpop.permute.xlu0 %623 }
 0x163   :  { %v4291_v6 = vpop.permute.xlu1 %625  ;;  %v4293_v7 = vpop.permute.xlu0 %627 }
 0x167   :  { %v4295_v8 = vpop.permute.xlu1 %629  ;;  %v4297_v9 = vpop.permute.xlu0 %631 }
 0x16b   :  { %v4299_v13 = vpop.permute.xlu1 %633  ;;  %v4301_v14 = vpop.permute.xlu0 %635 }
 0x16f   :  { %v4303_v15 = vpop.permute.xlu1 %637  ;;  %v4305_v16 = vpop.permute.xlu0 %639 }
 0x173   :  { %v4307_v17 = vpop.permute.xlu1 %641  ;;  %v4309_v18 = vpop.permute.xlu0 %643 }
 0x177   :  { %v4311_v19 = vpop.permute.xlu1 %645  ;;  %v4313_v20 = vpop.permute.xlu0 %647 }
 0x17b   :  { %v4315_v24 = vpop.permute.xlu1 %649  ;;  %v4317_v30 = vpop.permute.xlu0 %651 }
 0x17c   :  { %7068 = vst [vmem:[#allocation11_spill] sm:$0xff] %v4315_v24  ;;  %7069 = vst [vmem:[#allocation12_spill] sm:$0xff] %v4317_v30 }
 0x17f   :  { %v4319_v38 = vpop.permute.xlu1 %653  ;;  %v4321_v39 = vpop.permute.xlu0 %655 }
 0x180   :  { %7070 = vst [vmem:[#allocation13_spill] sm:$0xff] %v4319_v38  ;;  %7071 = vst [vmem:[#allocation14_spill] sm:$0xff] %v4321_v39 }
 0x183   :  { %v4323_v43 = vpop.permute.xlu1 %657  ;;  %v4327_v51 = vpop.permute.xlu0 %659 }
 0x184   :  { %7072 = vst [vmem:[#allocation15_spill] sm:$0xff] %v4323_v43  ;;  %7073 = vst [vmem:[#allocation16_spill] sm:$0xff] %v4327_v51 }
 0x194   :  { %v712_v44 = vpop.permute.xlu1 %711  ;;  %v716_v35 = vpop.permute.xlu0 %715 }
 0x195   :  { %v727_v45 = vmul.f32 %v712_v44, %v4142_v29  ;;  %v726_v12 = vmul.f32 %v712_v44, %v4139_v28  ;;  %v729_v37 = vmul.f32 %v712_v44, %v4156_v41  ;;  %v728_v42 = vmul.f32 %v712_v44, %v4153_v40 }
 0x196   :  { %v730_v11 = vmul.f32 %v712_v44, %v4165_v46  ;;  %v731_v10 = vmul.f32 %v716_v35, %v4139_v28 }
 0x197   :  { %768 = vrot.lane.b32.xlu1 %v727_v45, %s3617_s12  ;;  %766 = vrot.lane.b32.xlu0 %v726_v12, %s3617_s12  ;;  %v732_v45 = vmul.f32 %v716_v35, %v4142_v29  ;;  %v733_v12 = vmul.f32 %v716_v35, %v4153_v40 }
 0x198   :  { %v720_v51 = vpop.permute.xlu1 %719 }
 0x199   :  { %v738_v44 = vmul.f32 %v720_v51, %v4153_v40 }
 0x19b   :  { %772 = vrot.lane.b32.xlu1 %v729_v37, %s3617_s12  ;;  %770 = vrot.lane.b32.xlu0 %v728_v42, %s3617_s12  ;;  %v734_v37 = vmul.f32 %v716_v35, %v4156_v41  ;;  %v735_v42 = vmul.f32 %v716_v35, %v4165_v46  ;;  %v740_v35 = vmul.f32 %v720_v51, %v4165_v46 }
 0x19f   :  { %774 = vrot.lane.b32.xlu0 %v730_v11, %s3617_s12  ;;  %776 = vrot.lane.b32.xlu1 %v731_v10, %s3617_s12  ;;  %v736_v11 = vmul.f32 %v720_v51, %v4139_v28  ;;  %v737_v10 = vmul.f32 %v720_v51, %v4142_v29 }
 0x1a3   :  { %778 = vrot.lane.b32.xlu0 %v732_v45, %s3617_s12  ;;  %780 = vrot.lane.b32.xlu1 %v733_v12, %s3617_s12  ;;  %v739_v45 = vmul.f32 %v720_v51, %v4156_v41  ;;  %v724_v12 = vpop.permute.xlu1 %723  ;;  %v6835_v51 = vmov 5  }
 0x1a7   :  { %782 = vrot.lane.b32.xlu0 %v734_v37, %s3617_s12  ;;  %784 = vrot.lane.b32.xlu1 %v735_v42, %s3617_s12  ;;  %v741_v37 = vmul.f32 %v724_v12, %v4139_v28  ;;  %v742_v42 = vmul.f32 %v724_v12, %v4142_v29 }
 0x1ab   :  { %786 = vrot.lane.b32.xlu0 %v736_v11, %s3617_s12  ;;  %788 = vrot.lane.b32.xlu1 %v737_v10, %s3617_s12  ;;  %v743_v11 = vmul.f32 %v724_v12, %v4153_v40  ;;  %v744_v10 = vmul.f32 %v724_v12, %v4156_v41 }
 0x1af   :  { %790 = vrot.lane.b32.xlu0 %v738_v44, %s3617_s12  ;;  %792 = vrot.lane.b32.xlu1 %v739_v45, %s3617_s12  ;;  %v745_v44 = vmul.f32 %v724_v12, %v4165_v46 }
 0x1b3   :  { %794 = vrot.lane.b32.xlu0 %v740_v35, %s3617_s12  ;;  %796 = vrot.lane.b32.xlu1 %v741_v37, %s3617_s12 }
 0x1b7   :  { %798 = vrot.lane.b32.xlu0 %v742_v42, %s3617_s12  ;;  %800 = vrot.lane.b32.xlu1 %v743_v11, %s3617_s12 }
 0x1bb   :  { %802 = vrot.lane.b32.xlu0 %v744_v10, %s3617_s12  ;;  %804 = vrot.lane.b32.xlu1 %v745_v44, %s3617_s12 }
 0x1bf   :  { %856 = vperm.xlu0 %3484, %v3766_v34   ;;  %860 = vperm.xlu1 %3485, %v3754_v32  }
 0x1c3   :  { %868 = vperm.xlu0 %3484, %v3774_v36   ;;  %864 = vperm.xlu1 %3485, %v3761_v33  }
 0x1c7   :  { %3487 = vset.pattern.permute.xlu0 %v6835_v51  ;;  %3486 = vset.pattern.permute.xlu1 %v6835_v51 }
 0x209   :  { %v4373_v45 = vpop.permute.xlu0 %766  ;;  %v4375_v12 = vpop.permute.xlu1 %768 }
 0x20a   :  { %7074 = vst [vmem:[#allocation17_spill] sm:$0xff] %v4373_v45  ;;  %7075 = vst [vmem:[#allocation18_spill] sm:$0xff] %v4375_v12 }
 0x20d   :  { %v4377_v35 = vpop.permute.xlu0 %770  ;;  %v4379_v37 = vpop.permute.xlu1 %772 }
 0x20e   :  { %7076 = vst [vmem:[#allocation19_spill] sm:$0xff] %v4377_v35  ;;  %7077 = vst [vmem:[#allocation20_spill] sm:$0xff] %v4379_v37 }
 0x211   :  { %v4381_v42 = vpop.permute.xlu0 %774  ;;  %v4383_v11 = vpop.permute.xlu1 %776 }
 0x212   :  { %7078 = vst [vmem:[#allocation21_spill] sm:$0xff] %v4381_v42  ;;  %7079 = vst [vmem:[#allocation22_spill] sm:$0xff] %v4383_v11 }
 0x215   :  { %v4385_v10 = vpop.permute.xlu0 %778  ;;  %v4387_v44 = vpop.permute.xlu1 %780 }
 0x216   :  { %7080 = vst [vmem:[#allocation23_spill] sm:$0xff] %v4385_v10  ;;  %7081 = vst [vmem:[#allocation24_spill] sm:$0xff] %v4387_v44 }
 0x219   :  { %v4389_v43 = vpop.permute.xlu0 %782  ;;  %v4391_v39 = vpop.permute.xlu1 %784 }
 0x21a   :  { %7082 = vst [vmem:[#allocation25_spill] sm:$0xff] %v4389_v43  ;;  %7083 = vst [vmem:[#allocation26_spill] sm:$0xff] %v4391_v39 }
 0x21d   :  { %v4393_v51 = vpop.permute.xlu0 %786  ;;  %v4395_v45 = vpop.permute.xlu1 %788 }
 0x21e   :  { %7084 = vst [vmem:[#allocation27_spill] sm:$0xff] %v4393_v51  ;;  %7085 = vst [vmem:[#allocation28_spill] sm:$0xff] %v4395_v45 }
 0x221   :  { %v4397_v12 = vpop.permute.xlu0 %790  ;;  %v4399_v35 = vpop.permute.xlu1 %792 }
 0x222   :  { %7086 = vst [vmem:[#allocation29_spill] sm:$0xff] %v4397_v12  ;;  %7087 = vst [vmem:[#allocation30_spill] sm:$0xff] %v4399_v35 }
 0x225   :  { %v4401_v37 = vpop.permute.xlu0 %794  ;;  %v4403_v42 = vpop.permute.xlu1 %796 }
 0x226   :  { %7088 = vst [vmem:[#allocation31_spill] sm:$0xff] %v4401_v37  ;;  %7089 = vst [vmem:[#allocation32_spill] sm:$0xff] %v4403_v42 }
 0x229   :  { %v4405_v11 = vpop.permute.xlu0 %798  ;;  %v4407_v10 = vpop.permute.xlu1 %800 }
 0x22a   :  { %7090 = vst [vmem:[#allocation33_spill] sm:$0xff] %v4405_v11  ;;  %7091 = vst [vmem:[#allocation34_spill] sm:$0xff] %v4407_v10 }
 0x22d   :  { %v4409_v44 = vpop.permute.xlu0 %802  ;;  %v4413_v45 = vpop.permute.xlu1 %804 }
 0x22e   :  { %7092 = vst [vmem:[#allocation35_spill] sm:$0xff] %v4409_v44  ;;  %7093 = vst [vmem:[#allocation36_spill] sm:$0xff] %v4413_v45 }
 0x23e   :  { %v857_v43 = vpop.permute.xlu0 %856  ;;  %v861_v37 = vpop.permute.xlu1 %860 }
 0x23f   :  { %v872_v39 = vmul.f32 %v857_v43, %v4142_v29  ;;  %v871_v51 = vmul.f32 %v857_v43, %v4139_v28  ;;  %v874_v42 = vmul.f32 %v857_v43, %v4156_v41  ;;  %v873_v11 = vmul.f32 %v857_v43, %v4153_v40 }
 0x240   :  { %v876_v44 = vmul.f32 %v861_v37, %v4139_v28  ;;  %v875_v10 = vmul.f32 %v857_v43, %v4165_v46 }
 0x241   :  { %913 = vrot.lane.b32.xlu0 %v872_v39, %s3619_s13  ;;  %911 = vrot.lane.b32.xlu1 %v871_v51, %s3619_s13  ;;  %v878_v39 = vmul.f32 %v861_v37, %v4153_v40  ;;  %v877_v51 = vmul.f32 %v861_v37, %v4142_v29 }
 0x242   :  { %v865_v45 = vpop.permute.xlu1 %864 }
 0x243   :  { %v882_v43 = vmul.f32 %v865_v45, %v4142_v29 }
 0x245   :  { %917 = vrot.lane.b32.xlu0 %v874_v42, %s3619_s13  ;;  %915 = vrot.lane.b32.xlu1 %v873_v11, %s3619_s13  ;;  %v880_v42 = vmul.f32 %v861_v37, %v4165_v46  ;;  %v879_v11 = vmul.f32 %v861_v37, %v4156_v41  ;;  %v885_v37 = vmul.f32 %v865_v45, %v4165_v46 }
 0x249   :  { %921 = vrot.lane.b32.xlu0 %v876_v44, %s3619_s13  ;;  %919 = vrot.lane.b32.xlu1 %v875_v10, %s3619_s13  ;;  %v881_v10 = vmul.f32 %v865_v45, %v4139_v28  ;;  %v884_v44 = vmul.f32 %v865_v45, %v4156_v41 }
 0x24d   :  { %925 = vrot.lane.b32.xlu0 %v878_v39, %s3619_s13  ;;  %923 = vrot.lane.b32.xlu1 %v877_v51, %s3619_s13  ;;  %v883_v39 = vmul.f32 %v865_v45, %v4153_v40  ;;  %v869_v51 = vpop.permute.xlu0 %868  ;;  %v6847_v45 = vmov 6  }
 0x251   :  { %929 = vrot.lane.b32.xlu0 %v880_v42, %s3619_s13  ;;  %927 = vrot.lane.b32.xlu1 %v879_v11, %s3619_s13  ;;  %v886_v42 = vmul.f32 %v869_v51, %v4139_v28  ;;  %v887_v11 = vmul.f32 %v869_v51, %v4142_v29 }
 0x255   :  { %933 = vrot.lane.b32.xlu0 %v882_v43, %s3619_s13  ;;  %931 = vrot.lane.b32.xlu1 %v881_v10, %s3619_s13  ;;  %v888_v43 = vmul.f32 %v869_v51, %v4153_v40  ;;  %v889_v10 = vmul.f32 %v869_v51, %v4156_v41 }
 0x259   :  { %937 = vrot.lane.b32.xlu0 %v884_v44, %s3619_s13  ;;  %935 = vrot.lane.b32.xlu1 %v883_v39, %s3619_s13  ;;  %v890_v44 = vmul.f32 %v869_v51, %v4165_v46 }
 0x25d   :  { %939 = vrot.lane.b32.xlu1 %v885_v37, %s3619_s13  ;;  %941 = vrot.lane.b32.xlu0 %v886_v42, %s3619_s13 }
 0x261   :  { %943 = vrot.lane.b32.xlu1 %v887_v11, %s3619_s13  ;;  %945 = vrot.lane.b32.xlu0 %v888_v43, %s3619_s13 }
 0x265   :  { %947 = vrot.lane.b32.xlu1 %v889_v10, %s3619_s13  ;;  %949 = vrot.lane.b32.xlu0 %v890_v44, %s3619_s13 }
 0x269   :  { %1001 = vperm.xlu1 %3486, %v3766_v34   ;;  %1005 = vperm.xlu0 %3487, %v3754_v32  }
 0x26d   :  { %1009 = vperm.xlu1 %3486, %v3761_v33   ;;  %3488 = vset.pattern.permute.xlu0 %v6847_v45 }
 0x271   :  { %1013 = vperm.xlu1 %3486, %v3774_v36  }
 0x275   :  { %3489 = vset.pattern.permute.xlu1 %v6847_v45 }
 0x2b3   :  { %v4459_v39 = vpop.permute.xlu1 %911  ;;  %v4461_v51 = vpop.permute.xlu0 %913 }
 0x2b4   :  { %7094 = vst [vmem:[#allocation37_spill] sm:$0xff] %v4459_v39  ;;  %7095 = vst [vmem:[#allocation38_spill] sm:$0xff] %v4461_v51 }
 0x2b7   :  { %v4463_v37 = vpop.permute.xlu1 %915  ;;  %v4465_v42 = vpop.permute.xlu0 %917 }
 0x2b8   :  { %7096 = vst [vmem:[#allocation39_spill] sm:$0xff] %v4463_v37  ;;  %7097 = vst [vmem:[#allocation40_spill] sm:$0xff] %v4465_v42 }
 0x2bb   :  { %v4467_v34 = vpop.permute.xlu1 %919  ;;  %v4469_v32 = vpop.permute.xlu0 %921 }
 0x2bc   :  { %7098 = vst [vmem:[#allocation41_spill] sm:$0xff] %v4467_v34  ;;  %7099 = vst [vmem:[#allocation42_spill] sm:$0xff] %v4469_v32 }
 0x2bf   :  { %v4471_v33 = vpop.permute.xlu1 %923  ;;  %v4473_v36 = vpop.permute.xlu0 %925 }
 0x2c0   :  { %7100 = vst [vmem:[#allocation43_spill] sm:$0xff] %v4471_v33  ;;  %7101 = vst [vmem:[#allocation44_spill] sm:$0xff] %v4473_v36 }
 0x2c3   :  { %v4475_v11 = vpop.permute.xlu1 %927  ;;  %v4477_v43 = vpop.permute.xlu0 %929 }
 0x2c4   :  { %7102 = vst [vmem:[#allocation45_spill] sm:$0xff] %v4475_v11  ;;  %7103 = vst [vmem:[#allocation46_spill] sm:$0xff] %v4477_v43 }
 0x2c7   :  { %v4479_v10 = vpop.permute.xlu1 %931  ;;  %v4481_v44 = vpop.permute.xlu0 %933 }
 0x2c8   :  { %7104 = vst [vmem:[#allocation47_spill] sm:$0xff] %v4479_v10  ;;  %7105 = vst [vmem:[#allocation48_spill] sm:$0xff] %v4481_v44 }
 0x2cb   :  { %v4483_v45 = vpop.permute.xlu1 %935  ;;  %v4485_v37 = vpop.permute.xlu0 %937 }
 0x2cc   :  { %7106 = vst [vmem:[#allocation49_spill] sm:$0xff] %v4483_v45  ;;  %7107 = vst [vmem:[#allocation50_spill] sm:$0xff] %v4485_v37 }
 0x2cf   :  { %v4487_v42 = vpop.permute.xlu1 %939  ;;  %v4489_v34 = vpop.permute.xlu0 %941 }
 0x2d0   :  { %7108 = vst [vmem:[#allocation51_spill] sm:$0xff] %v4487_v42  ;;  %7109 = vst [vmem:[#allocation52_spill] sm:$0xff] %v4489_v34 }
 0x2d3   :  { %v4491_v32 = vpop.permute.xlu1 %943  ;;  %v4493_v33 = vpop.permute.xlu0 %945 }
 0x2d4   :  { %7110 = vst [vmem:[#allocation53_spill] sm:$0xff] %v4491_v32  ;;  %7111 = vst [vmem:[#allocation54_spill] sm:$0xff] %v4493_v33 }
 0x2d7   :  { %v4495_v36 = vpop.permute.xlu1 %947  ;;  %v4499_v44 = vpop.permute.xlu0 %949 }
 0x2d8   :  { %7112 = vst [vmem:[#allocation55_spill] sm:$0xff] %v4495_v36  ;;  %7113 = vst [vmem:[#allocation56_spill] sm:$0xff] %v4499_v44 }
 0x2e8   :  { %v1002_v11 = vpop.permute.xlu1 %1001  ;;  %v1006_v42 = vpop.permute.xlu0 %1005 }
 0x2e9   :  { %v1017_v43 = vmul.f32 %v1002_v11, %v4142_v29  ;;  %v1016_v10 = vmul.f32 %v1002_v11, %v4139_v28  ;;  %v1019_v34 = vmul.f32 %v1002_v11, %v4156_v41  ;;  %v1018_v32 = vmul.f32 %v1002_v11, %v4153_v40 }
 0x2ea   :  { %v1020_v36 = vmul.f32 %v1002_v11, %v4165_v46  ;;  %v1021_v33 = vmul.f32 %v1006_v42, %v4139_v28 }
 0x2eb   :  { %1058 = vrot.lane.b32.xlu1 %v1017_v43, %s3621_s14  ;;  %1056 = vrot.lane.b32.xlu0 %v1016_v10, %s3621_s14  ;;  %v1022_v43 = vmul.f32 %v1006_v42, %v4142_v29  ;;  %v1023_v10 = vmul.f32 %v1006_v42, %v4153_v40 }
 0x2ec   :  { %v1010_v44 = vpop.permute.xlu1 %1009 }
 0x2ed   :  { %v1028_v11 = vmul.f32 %v1010_v44, %v4153_v40 }
 0x2ef   :  { %1062 = vrot.lane.b32.xlu1 %v1019_v34, %s3621_s14  ;;  %1060 = vrot.lane.b32.xlu0 %v1018_v32, %s3621_s14  ;;  %v1024_v34 = vmul.f32 %v1006_v42, %v4156_v41  ;;  %v1025_v32 = vmul.f32 %v1006_v42, %v4165_v46  ;;  %v1030_v42 = vmul.f32 %v1010_v44, %v4165_v46 }
 0x2f3   :  { %1064 = vrot.lane.b32.xlu0 %v1020_v36, %s3621_s14  ;;  %1066 = vrot.lane.b32.xlu1 %v1021_v33, %s3621_s14  ;;  %v1026_v36 = vmul.f32 %v1010_v44, %v4139_v28  ;;  %v1027_v33 = vmul.f32 %v1010_v44, %v4142_v29 }
 0x2f7   :  { %1068 = vrot.lane.b32.xlu0 %v1022_v43, %s3621_s14  ;;  %1070 = vrot.lane.b32.xlu1 %v1023_v10, %s3621_s14  ;;  %v1029_v43 = vmul.f32 %v1010_v44, %v4156_v41  ;;  %v1014_v10 = vpop.permute.xlu1 %1013  ;;  %v4542_v44 = vld [vmem:[%s6815_s1] sm:$0xff] }
 0x2fb   :  { %1072 = vrot.lane.b32.xlu0 %v1024_v34, %s3621_s14  ;;  %1074 = vrot.lane.b32.xlu1 %v1025_v32, %s3621_s14  ;;  %v1031_v34 = vmul.f32 %v1014_v10, %v4139_v28  ;;  %v1032_v32 = vmul.f32 %v1014_v10, %v4142_v29 }
 0x2ff   :  { %1076 = vrot.lane.b32.xlu0 %v1026_v36, %s3621_s14  ;;  %1078 = vrot.lane.b32.xlu1 %v1027_v33, %s3621_s14  ;;  %v1033_v36 = vmul.f32 %v1014_v10, %v4153_v40  ;;  %v1034_v33 = vmul.f32 %v1014_v10, %v4156_v41 }
 0x303   :  { %1080 = vrot.lane.b32.xlu0 %v1028_v11, %s3621_s14  ;;  %1082 = vrot.lane.b32.xlu1 %v1029_v43, %s3621_s14  ;;  %v1035_v11 = vmul.f32 %v1014_v10, %v4165_v46  ;;  %v4548_v43 = vld [vmem:[%s6815_s1 + $0x8] sm:$0xff]  ;;  %v4554_v10 = vld [vmem:[%s6815_s1 + $0x18] sm:$0xff] }
 0x307   :  { %1084 = vrot.lane.b32.xlu0 %v1030_v42, %s3621_s14  ;;  %1086 = vrot.lane.b32.xlu1 %v1031_v34, %s3621_s14  ;;  %v4560_v42 = vld [vmem:[%s6815_s1 + $0x10] sm:$0xff]  ;;  %v6863_v34 = vmov 7  }
 0x30b   :  { %1088 = vrot.lane.b32.xlu0 %v1032_v32, %s3621_s14  ;;  %1090 = vrot.lane.b32.xlu1 %v1033_v36, %s3621_s14 }
 0x30f   :  { %1092 = vrot.lane.b32.xlu0 %v1034_v33, %s3621_s14  ;;  %1094 = vrot.lane.b32.xlu1 %v1035_v11, %s3621_s14 }
 0x313   :  { %1146 = vperm.xlu0 %3488, %v4542_v44   ;;  %1150 = vperm.xlu1 %3489, %v4548_v43  }
 0x317   :  { %1158 = vperm.xlu0 %3488, %v4554_v10   ;;  %1154 = vperm.xlu1 %3489, %v4560_v42  }
 0x31b   :  { %3491 = vset.pattern.permute.xlu0 %v6863_v34  ;;  %3490 = vset.pattern.permute.xlu1 %v6863_v34 }
 0x35d   :  { %v4565_v32 = vpop.permute.xlu0 %1056  ;;  %v4567_v36 = vpop.permute.xlu1 %1058 }
 0x35e   :  { %7114 = vst [vmem:[#allocation57_spill] sm:$0xff] %v4565_v32  ;;  %7115 = vst [vmem:[#allocation58_spill] sm:$0xff] %v4567_v36 }
 0x361   :  { %v4569_v33 = vpop.permute.xlu0 %1060  ;;  %v4571_v11 = vpop.permute.xlu1 %1062 }
 0x362   :  { %7116 = vst [vmem:[#allocation59_spill] sm:$0xff] %v4569_v33  ;;  %7117 = vst [vmem:[#allocation60_spill] sm:$0xff] %v4571_v11 }
 0x365   :  { %v4573_v37 = vpop.permute.xlu0 %1064  ;;  %v4575_v45 = vpop.permute.xlu1 %1066 }
 0x366   :  { %7118 = vst [vmem:[#allocation61_spill] sm:$0xff] %v4573_v37  ;;  %7119 = vst [vmem:[#allocation62_spill] sm:$0xff] %v4575_v45 }
 0x369   :  { %v4577_v39 = vpop.permute.xlu0 %1068  ;;  %v4579_v51 = vpop.permute.xlu1 %1070 }
 0x36a   :  { %7120 = vst [vmem:[#allocation63_spill] sm:$0xff] %v4577_v39  ;;  %7121 = vst [vmem:[#allocation64_spill] sm:$0xff] %v4579_v51 }
 0x36d   :  { %v4581_v35 = vpop.permute.xlu0 %1072  ;;  %v4583_v12 = vpop.permute.xlu1 %1074 }
 0x36e   :  { %7122 = vst [vmem:[#allocation65_spill] sm:$0xff] %v4581_v35  ;;  %7123 = vst [vmem:[#allocation66_spill] sm:$0xff] %v4583_v12 }
 0x371   :  { %v4585_v34 = vpop.permute.xlu0 %1076  ;;  %v4587_v32 = vpop.permute.xlu1 %1078 }
 0x372   :  { %7124 = vst [vmem:[#allocation67_spill] sm:$0xff] %v4585_v34  ;;  %7125 = vst [vmem:[#allocation68_spill] sm:$0xff] %v4587_v32 }
 0x375   :  { %v4589_v36 = vpop.permute.xlu0 %1080  ;;  %v4591_v33 = vpop.permute.xlu1 %1082 }
 0x376   :  { %7126 = vst [vmem:[#allocation69_spill] sm:$0xff] %v4589_v36  ;;  %7127 = vst [vmem:[#allocation70_spill] sm:$0xff] %v4591_v33 }
 0x379   :  { %v4593_v11 = vpop.permute.xlu0 %1084  ;;  %v4595_v37 = vpop.permute.xlu1 %1086 }
 0x37a   :  { %7128 = vst [vmem:[#allocation71_spill] sm:$0xff] %v4593_v11  ;;  %7129 = vst [vmem:[#allocation72_spill] sm:$0xff] %v4595_v37 }
 0x37d   :  { %v4597_v45 = vpop.permute.xlu0 %1088  ;;  %v4599_v39 = vpop.permute.xlu1 %1090 }
 0x37e   :  { %7130 = vst [vmem:[#allocation73_spill] sm:$0xff] %v4597_v45  ;;  %7131 = vst [vmem:[#allocation74_spill] sm:$0xff] %v4599_v39 }
 0x381   :  { %v4601_v51 = vpop.permute.xlu0 %1092  ;;  %v4605_v32 = vpop.permute.xlu1 %1094 }
 0x382   :  { %7132 = vst [vmem:[#allocation75_spill] sm:$0xff] %v4601_v51  ;;  %7133 = vst [vmem:[#allocation76_spill] sm:$0xff] %v4605_v32 }
 0x392   :  { %v1147_v35 = vpop.permute.xlu0 %1146  ;;  %v1151_v11 = vpop.permute.xlu1 %1150 }
 0x393   :  { %v1162_v12 = vmul.f32 %v1147_v35, %v4142_v29  ;;  %v1161_v34 = vmul.f32 %v1147_v35, %v4139_v28  ;;  %v1164_v37 = vmul.f32 %v1147_v35, %v4156_v41  ;;  %v1163_v45 = vmul.f32 %v1147_v35, %v4153_v40 }
 0x394   :  { %v1166_v51 = vmul.f32 %v1151_v11, %v4139_v28  ;;  %v1165_v39 = vmul.f32 %v1147_v35, %v4165_v46 }
 0x395   :  { %1203 = vrot.lane.b32.xlu0 %v1162_v12, %s3623_s23  ;;  %1201 = vrot.lane.b32.xlu1 %v1161_v34, %s3623_s23  ;;  %v1168_v12 = vmul.f32 %v1151_v11, %v4153_v40  ;;  %v1167_v34 = vmul.f32 %v1151_v11, %v4142_v29 }
 0x396   :  { %v1155_v32 = vpop.permute.xlu1 %1154 }
 0x397   :  { %v1172_v35 = vmul.f32 %v1155_v32, %v4142_v29 }
 0x399   :  { %1207 = vrot.lane.b32.xlu0 %v1164_v37, %s3623_s23  ;;  %1205 = vrot.lane.b32.xlu1 %v1163_v45, %s3623_s23  ;;  %v1170_v37 = vmul.f32 %v1151_v11, %v4165_v46  ;;  %v1169_v45 = vmul.f32 %v1151_v11, %v4156_v41  ;;  %v1175_v11 = vmul.f32 %v1155_v32, %v4165_v46 }
 0x39d   :  { %1211 = vrot.lane.b32.xlu0 %v1166_v51, %s3623_s23  ;;  %1209 = vrot.lane.b32.xlu1 %v1165_v39, %s3623_s23  ;;  %v1171_v39 = vmul.f32 %v1155_v32, %v4139_v28  ;;  %v1174_v51 = vmul.f32 %v1155_v32, %v4156_v41 }
 0x3a1   :  { %1215 = vrot.lane.b32.xlu0 %v1168_v12, %s3623_s23  ;;  %1213 = vrot.lane.b32.xlu1 %v1167_v34, %s3623_s23  ;;  %v1173_v12 = vmul.f32 %v1155_v32, %v4153_v40  ;;  %v1159_v34 = vpop.permute.xlu0 %1158  ;;  %v6877_v32 = vmov 8  }
 0x3a5   :  { %1219 = vrot.lane.b32.xlu0 %v1170_v37, %s3623_s23  ;;  %1217 = vrot.lane.b32.xlu1 %v1169_v45, %s3623_s23  ;;  %v1176_v37 = vmul.f32 %v1159_v34, %v4139_v28  ;;  %v1177_v45 = vmul.f32 %v1159_v34, %v4142_v29 }
 0x3a9   :  { %1223 = vrot.lane.b32.xlu0 %v1172_v35, %s3623_s23  ;;  %1221 = vrot.lane.b32.xlu1 %v1171_v39, %s3623_s23  ;;  %v1178_v35 = vmul.f32 %v1159_v34, %v4153_v40  ;;  %v1179_v39 = vmul.f32 %v1159_v34, %v4156_v41 }
 0x3ad   :  { %1227 = vrot.lane.b32.xlu0 %v1174_v51, %s3623_s23  ;;  %1225 = vrot.lane.b32.xlu1 %v1173_v12, %s3623_s23  ;;  %v1180_v51 = vmul.f32 %v1159_v34, %v4165_v46 }
 0x3b1   :  { %1229 = vrot.lane.b32.xlu1 %v1175_v11, %s3623_s23  ;;  %1231 = vrot.lane.b32.xlu0 %v1176_v37, %s3623_s23 }
 0x3b5   :  { %1233 = vrot.lane.b32.xlu1 %v1177_v45, %s3623_s23  ;;  %1235 = vrot.lane.b32.xlu0 %v1178_v35, %s3623_s23 }
 0x3b9   :  { %1237 = vrot.lane.b32.xlu1 %v1179_v39, %s3623_s23  ;;  %1239 = vrot.lane.b32.xlu0 %v1180_v51, %s3623_s23 }
 0x3bd   :  { %1291 = vperm.xlu1 %3490, %v4542_v44   ;;  %1295 = vperm.xlu0 %3491, %v4548_v43  }
 0x3c1   :  { %1299 = vperm.xlu1 %3490, %v4560_v42   ;;  %3492 = vset.pattern.permute.xlu0 %v6877_v32 }
 0x3c5   :  { %1303 = vperm.xlu1 %3490, %v4554_v10  }
 0x3c9   :  { %3493 = vset.pattern.permute.xlu1 %v6877_v32 }
 0x407   :  { %v4651_v12 = vpop.permute.xlu1 %1201  ;;  %v4653_v34 = vpop.permute.xlu0 %1203 }
 0x408   :  { %7134 = vst [vmem:[#allocation77_spill] sm:$0xff] %v4651_v12  ;;  %7135 = vst [vmem:[#allocation78_spill] sm:$0xff] %v4653_v34 }
 0x40b   :  { %v4655_v11 = vpop.permute.xlu1 %1205  ;;  %v4657_v37 = vpop.permute.xlu0 %1207 }
 0x40c   :  { %7136 = vst [vmem:[#allocation79_spill] sm:$0xff] %v4655_v11  ;;  %7137 = vst [vmem:[#allocation80_spill] sm:$0xff] %v4657_v37 }
 0x40f   :  { %v4659_v45 = vpop.permute.xlu1 %1209  ;;  %v4661_v35 = vpop.permute.xlu0 %1211 }
 0x410   :  { %7138 = vst [vmem:[#allocation81_spill] sm:$0xff] %v4659_v45  ;;  %7139 = vst [vmem:[#allocation82_spill] sm:$0xff] %v4661_v35 }
 0x413   :  { %v4663_v39 = vpop.permute.xlu1 %1213  ;;  %v4665_v51 = vpop.permute.xlu0 %1215 }
 0x414   :  { %7140 = vst [vmem:[#allocation83_spill] sm:$0xff] %v4663_v39  ;;  %7141 = vst [vmem:[#allocation84_spill] sm:$0xff] %v4665_v51 }
 0x417   :  { %v4667_v33 = vpop.permute.xlu1 %1217  ;;  %v4669_v36 = vpop.permute.xlu0 %1219 }
 0x418   :  { %7142 = vst [vmem:[#allocation85_spill] sm:$0xff] %v4667_v33  ;;  %7143 = vst [vmem:[#allocation86_spill] sm:$0xff] %v4669_v36 }
 0x41b   :  { %v4671_v32 = vpop.permute.xlu1 %1221  ;;  %v4673_v12 = vpop.permute.xlu0 %1223 }
 0x41c   :  { %7144 = vst [vmem:[#allocation87_spill] sm:$0xff] %v4671_v32  ;;  %7145 = vst [vmem:[#allocation88_spill] sm:$0xff] %v4673_v12 }
 0x41f   :  { %v4675_v34 = vpop.permute.xlu1 %1225  ;;  %v4677_v11 = vpop.permute.xlu0 %1227 }
 0x420   :  { %7146 = vst [vmem:[#allocation89_spill] sm:$0xff] %v4675_v34  ;;  %7147 = vst [vmem:[#allocation90_spill] sm:$0xff] %v4677_v11 }
 0x423   :  { %v4679_v37 = vpop.permute.xlu1 %1229  ;;  %v4681_v45 = vpop.permute.xlu0 %1231 }
 0x424   :  { %7148 = vst [vmem:[#allocation91_spill] sm:$0xff] %v4679_v37  ;;  %7149 = vst [vmem:[#allocation92_spill] sm:$0xff] %v4681_v45 }
 0x427   :  { %v4683_v35 = vpop.permute.xlu1 %1233  ;;  %v4685_v39 = vpop.permute.xlu0 %1235 }
 0x428   :  { %7150 = vst [vmem:[#allocation93_spill] sm:$0xff] %v4683_v35  ;;  %7151 = vst [vmem:[#allocation94_spill] sm:$0xff] %v4685_v39 }
 0x42b   :  { %v4687_v51 = vpop.permute.xlu1 %1237  ;;  %v4691_v12 = vpop.permute.xlu0 %1239 }
 0x42c   :  { %7152 = vst [vmem:[#allocation95_spill] sm:$0xff] %v4687_v51  ;;  %7153 = vst [vmem:[#allocation96_spill] sm:$0xff] %v4691_v12 }
 0x43c   :  { %v1292_v33 = vpop.permute.xlu1 %1291  ;;  %v1296_v35 = vpop.permute.xlu0 %1295 }
 0x43d   :  { %v1307_v36 = vmul.f32 %v1292_v33, %v4142_v29  ;;  %v1306_v32 = vmul.f32 %v1292_v33, %v4139_v28  ;;  %v1309_v37 = vmul.f32 %v1292_v33, %v4156_v41  ;;  %v1308_v45 = vmul.f32 %v1292_v33, %v4153_v40 }
 0x43e   :  { %v1310_v51 = vmul.f32 %v1292_v33, %v4165_v46  ;;  %v1311_v39 = vmul.f32 %v1296_v35, %v4139_v28 }
 0x43f   :  { %1348 = vrot.lane.b32.xlu1 %v1307_v36, %s3603_s27  ;;  %1346 = vrot.lane.b32.xlu0 %v1306_v32, %s3603_s27  ;;  %v1312_v36 = vmul.f32 %v1296_v35, %v4142_v29  ;;  %v1313_v32 = vmul.f32 %v1296_v35, %v4153_v40 }
 0x440   :  { %v1300_v12 = vpop.permute.xlu1 %1299 }
 0x441   :  { %v1316_v33 = vmul.f32 %v1300_v12, %v4139_v28 }
 0x443   :  { %1352 = vrot.lane.b32.xlu1 %v1309_v37, %s3603_s27  ;;  %1350 = vrot.lane.b32.xlu0 %v1308_v45, %s3603_s27  ;;  %v1314_v37 = vmul.f32 %v1296_v35, %v4156_v41  ;;  %v1315_v45 = vmul.f32 %v1296_v35, %v4165_v46  ;;  %v1320_v35 = vmul.f32 %v1300_v12, %v4165_v46 }
 0x447   :  { %1354 = vrot.lane.b32.xlu0 %v1310_v51, %s3603_s27  ;;  %1356 = vrot.lane.b32.xlu1 %v1311_v39, %s3603_s27  ;;  %v1317_v39 = vmul.f32 %v1300_v12, %v4142_v29  ;;  %v1318_v51 = vmul.f32 %v1300_v12, %v4153_v40 }
 0x44b   :  { %1358 = vrot.lane.b32.xlu0 %v1312_v36, %s3603_s27  ;;  %1360 = vrot.lane.b32.xlu1 %v1313_v32, %s3603_s27  ;;  %v1319_v36 = vmul.f32 %v1300_v12, %v4156_v41  ;;  %v1304_v32 = vpop.permute.xlu1 %1303  ;;  %v7154_v12 = vmov 1  }
 0x44f   :  { %1362 = vrot.lane.b32.xlu0 %v1314_v37, %s3603_s27  ;;  %1364 = vrot.lane.b32.xlu1 %v1315_v45, %s3603_s27  ;;  %v1321_v37 = vmul.f32 %v1304_v32, %v4139_v28  ;;  %v1322_v45 = vmul.f32 %v1304_v32, %v4142_v29 }
 0x453   :  { %1366 = vrot.lane.b32.xlu0 %v1316_v33, %s3603_s27  ;;  %1368 = vrot.lane.b32.xlu1 %v1317_v39, %s3603_s27  ;;  %v1323_v33 = vmul.f32 %v1304_v32, %v4153_v40  ;;  %v1324_v39 = vmul.f32 %v1304_v32, %v4156_v41 }
 0x457   :  { %1370 = vrot.lane.b32.xlu0 %v1318_v51, %s3603_s27  ;;  %1372 = vrot.lane.b32.xlu1 %v1319_v36, %s3603_s27  ;;  %v1325_v51 = vmul.f32 %v1304_v32, %v4165_v46  ;;  %v7155_v36 = vmov 0  }
 0x45b   :  { %1374 = vrot.lane.b32.xlu0 %v1320_v35, %s3603_s27  ;;  %1376 = vrot.lane.b32.xlu1 %v1321_v37, %s3603_s27 }
 0x45f   :  { %1378 = vrot.lane.b32.xlu0 %v1322_v45, %s3603_s27  ;;  %1380 = vrot.lane.b32.xlu1 %v1323_v33, %s3603_s27 }
 0x463   :  { %1382 = vrot.lane.b32.xlu0 %v1324_v39, %s3603_s27  ;;  %1384 = vrot.lane.b32.xlu1 %v1325_v51, %s3603_s27 }
 0x467   :  { %1435 = vperm.xlu0 %3492, %v4542_v44   ;;  %1439 = vperm.xlu1 %3493, %v4548_v43  }
 0x46b   :  { %1447 = vperm.xlu0 %3492, %v4554_v10   ;;  %1443 = vperm.xlu1 %3493, %v4560_v42  }
 0x46f   :  { %3495 = vset.pattern.permute.xlu0 %v7154_v12  ;;  %3494 = vset.pattern.permute.xlu1 %v7155_v36 }
 0x4b1   :  { %v4737_v35 = vpop.permute.xlu0 %1346  ;;  %v4739_v37 = vpop.permute.xlu1 %1348 }
 0x4b2   :  { %7156 = vst [vmem:[#allocation97_spill] sm:$0xff] %v4737_v35  ;;  %7157 = vst [vmem:[#allocation98_spill] sm:$0xff] %v4739_v37 }
 0x4b5   :  { %v4741_v32 = vpop.permute.xlu0 %1350  ;;  %v4743_v45 = vpop.permute.xlu1 %1352 }
 0x4b6   :  { %7158 = vst [vmem:[#allocation99_spill] sm:$0xff] %v4741_v32  ;;  %7159 = vst [vmem:[#allocation100_spill] sm:$0xff] %v4743_v45 }
 0x4b9   :  { %v4745_v33 = vpop.permute.xlu0 %1354  ;;  %v4747_v39 = vpop.permute.xlu1 %1356 }
 0x4ba   :  { %7160 = vst [vmem:[#allocation101_spill] sm:$0xff] %v4745_v33  ;;  %7161 = vst [vmem:[#allocation102_spill] sm:$0xff] %v4747_v39 }
 0x4bd   :  { %v4749_v43 = vpop.permute.xlu0 %1358  ;;  %v4751_v51 = vpop.permute.xlu1 %1360 }
 0x4be   :  { %7162 = vst [vmem:[#allocation103_spill] sm:$0xff] %v4749_v43  ;;  %7163 = vst [vmem:[#allocation104_spill] sm:$0xff] %v4751_v51 }
 0x4c1   :  { %v4753_v42 = vpop.permute.xlu0 %1362  ;;  %v4755_v11 = vpop.permute.xlu1 %1364 }
 0x4c2   :  { %7164 = vst [vmem:[#allocation105_spill] sm:$0xff] %v4753_v42  ;;  %7165 = vst [vmem:[#allocation106_spill] sm:$0xff] %v4755_v11 }
 0x4c5   :  { %v4757_v34 = vpop.permute.xlu0 %1366  ;;  %v4759_v35 = vpop.permute.xlu1 %1368 }
 0x4c6   :  { %7166 = vst [vmem:[#allocation107_spill] sm:$0xff] %v4757_v34  ;;  %7167 = vst [vmem:[#allocation108_spill] sm:$0xff] %v4759_v35 }
 0x4c9   :  { %v4761_v37 = vpop.permute.xlu0 %1370  ;;  %v4763_v32 = vpop.permute.xlu1 %1372 }
 0x4ca   :  { %7168 = vst [vmem:[#allocation109_spill] sm:$0xff] %v4761_v37  ;;  %7169 = vst [vmem:[#allocation110_spill] sm:$0xff] %v4763_v32  ;;  %v7200_v32 = vsub.s32 4, %v4128_v22 }
 0x4cd   :  { %v4765_v45 = vpop.permute.xlu0 %1374  ;;  %v4767_v33 = vpop.permute.xlu1 %1376 }
 0x4ce   :  { %7170 = vst [vmem:[#allocation111_spill] sm:$0xff] %v4765_v45  ;;  %7171 = vst [vmem:[#allocation112_spill] sm:$0xff] %v4767_v33 }
 0x4d1   :  { %v4769_v39 = vpop.permute.xlu0 %1378  ;;  %v4771_v43 = vpop.permute.xlu1 %1380 }
 0x4d2   :  { %7172 = vst [vmem:[#allocation113_spill] sm:$0xff] %v4769_v39  ;;  %7173 = vst [vmem:[#allocation114_spill] sm:$0xff] %v4771_v43 }
 0x4d5   :  { %v4773_v51 = vpop.permute.xlu0 %1382  ;;  %v4777_v35 = vpop.permute.xlu1 %1384 }
 0x4d6   :  { %7174 = vst [vmem:[#allocation115_spill] sm:$0xff] %v4773_v51  ;;  %7175 = vst [vmem:[#allocation116_spill] sm:$0xff] %v4777_v35 }
 0x4e6   :  { %v1436_v42 = vpop.permute.xlu0 %1435  ;;  %v1440_v45 = vpop.permute.xlu1 %1439 }
 0x4e7   :  { %v1451_v11 = vmul.f32 %v1436_v42, %v4142_v29  ;;  %v1450_v34 = vmul.f32 %v1436_v42, %v4139_v28  ;;  %v1453_v33 = vmul.f32 %v1436_v42, %v4156_v41  ;;  %v1452_v39 = vmul.f32 %v1436_v42, %v4153_v40 }
 0x4e8   :  { %v1455_v51 = vmul.f32 %v1440_v45, %v4139_v28  ;;  %v1454_v43 = vmul.f32 %v1436_v42, %v4165_v46 }
 0x4e9   :  { %1492 = vrot.lane.b32.xlu0 %v1451_v11, %s3625_s24  ;;  %1490 = vrot.lane.b32.xlu1 %v1450_v34, %s3625_s24  ;;  %v1457_v11 = vmul.f32 %v1440_v45, %v4153_v40  ;;  %v1456_v34 = vmul.f32 %v1440_v45, %v4142_v29 }
 0x4ea   :  { %v1444_v35 = vpop.permute.xlu1 %1443 }
 0x4eb   :  { %v1463_v42 = vmul.f32 %v1444_v35, %v4156_v41 }
 0x4ed   :  { %1496 = vrot.lane.b32.xlu0 %v1453_v33, %s3625_s24  ;;  %1494 = vrot.lane.b32.xlu1 %v1452_v39, %s3625_s24  ;;  %v1459_v33 = vmul.f32 %v1440_v45, %v4165_v46  ;;  %v1458_v39 = vmul.f32 %v1440_v45, %v4156_v41  ;;  %v1464_v45 = vmul.f32 %v1444_v35, %v4165_v46 }
 0x4f1   :  { %1500 = vrot.lane.b32.xlu0 %v1455_v51, %s3625_s24  ;;  %1498 = vrot.lane.b32.xlu1 %v1454_v43, %s3625_s24  ;;  %v1461_v51 = vmul.f32 %v1444_v35, %v4142_v29  ;;  %v1460_v43 = vmul.f32 %v1444_v35, %v4139_v28 }
 0x4f5   :  { %1504 = vrot.lane.b32.xlu0 %v1457_v11, %s3625_s24  ;;  %1502 = vrot.lane.b32.xlu1 %v1456_v34, %s3625_s24  ;;  %v1462_v11 = vmul.f32 %v1444_v35, %v4153_v40  ;;  %v1448_v34 = vpop.permute.xlu0 %1447  ;;  %v7176_v35 = vmov 2  }
 0x4f9   :  { %1508 = vrot.lane.b32.xlu0 %v1459_v33, %s3625_s24  ;;  %1506 = vrot.lane.b32.xlu1 %v1458_v39, %s3625_s24  ;;  %v1465_v33 = vmul.f32 %v1448_v34, %v4139_v28  ;;  %v1466_v39 = vmul.f32 %v1448_v34, %v4142_v29  ;;  %v1579_v28 = vld [vmem:[%s6816_s2] sm:$0xff] }
 0x4fa   :  { %v4823_v29 = vld [vmem:[%s6815_s1] sm:$0xff] }
 0x4fd   :  { %1512 = vrot.lane.b32.xlu0 %v1461_v51, %s3625_s24  ;;  %1510 = vrot.lane.b32.xlu1 %v1460_v43, %s3625_s24  ;;  %v1467_v51 = vmul.f32 %v1448_v34, %v4153_v40  ;;  %v1468_v43 = vmul.f32 %v1448_v34, %v4156_v41  ;;  %v1581_v40 = vld [vmem:[%s6816_s2 + $0x10] sm:$0xff]  ;;  %v4832_v41 = vld [vmem:[%s6815_s1 + $0x18] sm:$0xff] }
 0x501   :  { %1516 = vrot.lane.b32.xlu0 %v1463_v42, %s3625_s24  ;;  %1514 = vrot.lane.b32.xlu1 %v1462_v11, %s3625_s24  ;;  %v1469_v42 = vmul.f32 %v1448_v34, %v4165_v46  ;;  %v1582_v46 = vld [vmem:[%s6816_s2 + $0x18] sm:$0xff]  ;;  %v4842_v11 = vld [vmem:[%s6815_s1 + $0x8] sm:$0xff] }
 0x502   :  { %v4851_v34 = vld [vmem:[%s6815_s1 + $0x10] sm:$0xff] }
 0x505   :  { %1518 = vrot.lane.b32.xlu1 %v1464_v45, %s3625_s24  ;;  %1520 = vrot.lane.b32.xlu0 %v1465_v33, %s3625_s24 }
 0x509   :  { %1522 = vrot.lane.b32.xlu1 %v1466_v39, %s3625_s24  ;;  %1524 = vrot.lane.b32.xlu0 %v1467_v51, %s3625_s24 }
 0x50d   :  { %1526 = vrot.lane.b32.xlu1 %v1468_v43, %s3625_s24  ;;  %1528 = vrot.lane.b32.xlu0 %v1469_v42, %s3625_s24 }
 0x511   :  { %1585 = vperm.xlu1 %3494, %v1579_v28   ;;  %1731 = vperm.xlu0 %3495, %v4823_v29  }
 0x515   :  { %1595 = vperm.xlu1 %3494, %v1581_v40   ;;  %1743 = vperm.xlu0 %3495, %v4832_v41  }
 0x519   :  { %1600 = vperm.xlu1 %3494, %v1582_v46   ;;  %3498 = vset.pattern.permute.xlu0 %v7176_v35 }
 0x51d   :  { %1663 = vperm.xlu1 %3494, %v4842_v11  }
 0x521   :  { %1673 = vperm.xlu1 %3494, %v4832_v41  }
 0x525   :  { %3496 = vset.pattern.permute.xlu1 %v7154_v12 }
 0x526   :  { %1735 = vperm.xlu1 %3496, %v4842_v11  }
 0x52a   :  { %1739 = vperm.xlu1 %3496, %v4851_v34  }
 0x52e   :  { %3497 = vset.pattern.permute.xlu1 %v7176_v35 }
 0x55b   :  { %v4855_v45 = vpop.permute.xlu1 %1490  ;;  %v4857_v33 = vpop.permute.xlu0 %1492 }
 0x55c   :  { %7177 = vst [vmem:[#allocation117_spill] sm:$0xff] %v4855_v45  ;;  %7178 = vst [vmem:[#allocation118_spill] sm:$0xff] %v4857_v33 }
 0x55f   :  { %v4859_v39 = vpop.permute.xlu1 %1494  ;;  %v4861_v51 = vpop.permute.xlu0 %1496 }
 0x560   :  { %7179 = vst [vmem:[#allocation119_spill] sm:$0xff] %v4859_v39  ;;  %7180 = vst [vmem:[#allocation120_spill] sm:$0xff] %v4861_v51 }
 0x563   :  { %v4863_v12 = vpop.permute.xlu1 %1498  ;;  %v4865_v43 = vpop.permute.xlu0 %1500 }
 0x564   :  { %7181 = vst [vmem:[#allocation121_spill] sm:$0xff] %v4863_v12  ;;  %7182 = vst [vmem:[#allocation122_spill] sm:$0xff] %v4865_v43 }
 0x567   :  { %v4867_v42 = vpop.permute.xlu1 %1502  ;;  %v4869_v28 = vpop.permute.xlu0 %1504 }
 0x568   :  { %7183 = vst [vmem:[#allocation123_spill] sm:$0xff] %v4867_v42  ;;  %7184 = vst [vmem:[#allocation124_spill] sm:$0xff] %v4869_v28  ;;  %v1729_v28 = vld [vmem:[#allocation2 + $0x4] sm:$0x1f] }
 0x569   :  { %v4919_v37 = vrot.slane %v1729_v28, %v7200_v32 }
 0x56b   :  { %v4871_v40 = vpop.permute.xlu1 %1506  ;;  %v4873_v46 = vpop.permute.xlu0 %1508 }
 0x56c   :  { %7185 = vst [vmem:[#allocation125_spill] sm:$0xff] %v4871_v40  ;;  %7186 = vst [vmem:[#allocation126_spill] sm:$0xff] %v4873_v46 }
 0x56f   :  { %v4875_v35 = vpop.permute.xlu1 %1510  ;;  %v4877_v45 = vpop.permute.xlu0 %1512 }
 0x570   :  { %7187 = vst [vmem:[#allocation127_spill] sm:$0xff] %v4875_v35  ;;  %7188 = vst [vmem:[#allocation128_spill] sm:$0xff] %v4877_v45  ;;  %v4896_v35 = vrot.slane %v1729_v28, %v4133_v26  ;;  %v4899_v45 = vrot.slane %v1729_v28, %v4136_v27 }
 0x572   :  { %7197 = vst [vmem:[#allocation137_spill] sm:$0xff] %v4896_v35 }
 0x573   :  { %v4879_v33 = vpop.permute.xlu1 %1514  ;;  %v4881_v39 = vpop.permute.xlu0 %1516 }
 0x574   :  { %7189 = vst [vmem:[#allocation129_spill] sm:$0xff] %v4879_v33  ;;  %7190 = vst [vmem:[#allocation130_spill] sm:$0xff] %v4881_v39 }
 0x577   :  { %v4883_v51 = vpop.permute.xlu1 %1518  ;;  %v4885_v12 = vpop.permute.xlu0 %1520 }
 0x578   :  { %7191 = vst [vmem:[#allocation131_spill] sm:$0xff] %v4883_v51  ;;  %7192 = vst [vmem:[#allocation132_spill] sm:$0xff] %v4885_v12 }
 0x57b   :  { %v4887_v43 = vpop.permute.xlu1 %1522  ;;  %v4889_v42 = vpop.permute.xlu0 %1524 }
 0x57c   :  { %7193 = vst [vmem:[#allocation133_spill] sm:$0xff] %v4887_v43  ;;  %7194 = vst [vmem:[#allocation134_spill] sm:$0xff] %v4889_v42  ;;  %v4906_v42 = vrot.slane %v1729_v28, %v4145_v31 }
 0x57f   :  { %v4891_v40 = vpop.permute.xlu1 %1526  ;;  %v4893_v46 = vpop.permute.xlu0 %1528 }
 0x580   :  { %7195 = vst [vmem:[#allocation135_spill] sm:$0xff] %v4891_v40  ;;  %7196 = vst [vmem:[#allocation136_spill] sm:$0xff] %v4893_v46  ;;  %v4909_v40 = vrot.slane %v1729_v28, %v4148_v25 }
 0x590   :  { %v4901_v39 = vpop.permute.xlu1 %1585  ;;  %v1732_v51 = vpop.permute.xlu0 %1731 }
 0x591   :  { %7198 = vst [vmem:[#allocation138_spill] sm:$0xff] %v4901_v39  ;;  %v1773_v12 = vmul.f32 %v4899_v45, %v1732_v51  ;;  %v1772_v43 = vmul.f32 %v4896_v35, %v1732_v51  ;;  %v1775_v33 = vmul.f32 %v4909_v40, %v1732_v51  ;;  %v1774_v39 = vmul.f32 %v4906_v42, %v1732_v51 }
 0x593   :  { %1814 = vrot.lane.b32.xlu0 %v1773_v12, %s3614_s10  ;;  %1812 = vrot.lane.b32.xlu1 %v1772_v43, %s3614_s10  ;;  %v1776_v12 = vmul.f32 %v4919_v37, %v1732_v51 }
 0x594   :  { %v4913_v46 = vpop.permute.xlu1 %1595 }
 0x595   :  { %7199 = vst [vmem:[#allocation139_spill] sm:$0xff] %v4913_v46 }
 0x597   :  { %1818 = vrot.lane.b32.xlu0 %v1775_v33, %s3614_s10  ;;  %1816 = vrot.lane.b32.xlu1 %v1774_v39, %s3614_s10 }
 0x598   :  { %v4923_v30 = vpop.permute.xlu1 %1600 }
 0x599   :  { %7201 = vst [vmem:[#allocation140_spill] sm:$0xff] %v4923_v30 }
 0x59b   :  { %1820 = vrot.lane.b32.xlu1 %v1776_v12, %s3614_s10 }
 0x59c   :  { %v4927_v43 = vpop.permute.xlu1 %1663 }
 0x59d   :  { %7202 = vst [vmem:[#allocation141_spill] sm:$0xff] %v4927_v43 }
 0x5a0   :  { %v4929_v46 = vpop.permute.xlu1 %1673 }
 0x5a1   :  { %7203 = vst [vmem:[#allocation142_spill] sm:$0xff] %v4929_v46 }
 0x5a5   :  { %v1736_v38 = vpop.permute.xlu1 %1735 }
 0x5a6   :  { %v1777_v24 = vmul.f32 %v4896_v35, %v1736_v38  ;;  %v1778_v22 = vmul.f32 %v4899_v45, %v1736_v38  ;;  %v1779_v32 = vmul.f32 %v4906_v42, %v1736_v38  ;;  %v1780_v33 = vmul.f32 %v4909_v40, %v1736_v38 }
 0x5a7   :  { %v1781_v51 = vmul.f32 %v4919_v37, %v1736_v38 }
 0x5a8   :  { %1822 = vrot.lane.b32.xlu0 %v1777_v24, %s3614_s10  ;;  %1824 = vrot.lane.b32.xlu1 %v1778_v22, %s3614_s10 }
 0x5a9   :  { %v1740_v39 = vpop.permute.xlu1 %1739 }
 0x5aa   :  { %v1782_v28 = vmul.f32 %v4896_v35, %v1740_v39  ;;  %v1783_v24 = vmul.f32 %v4899_v45, %v1740_v39  ;;  %v1784_v12 = vmul.f32 %v4906_v42, %v1740_v39  ;;  %v1785_v22 = vmul.f32 %v4909_v40, %v1740_v39 }
 0x5ac   :  { %1826 = vrot.lane.b32.xlu0 %v1779_v32, %s3614_s10  ;;  %1828 = vrot.lane.b32.xlu1 %v1780_v33, %s3614_s10  ;;  %v1786_v32 = vmul.f32 %v4919_v37, %v1740_v39  ;;  %v1744_v33 = vpop.permute.xlu0 %1743 }
 0x5ad   :  { %v1787_v38 = vmul.f32 %v4896_v35, %v1744_v33  ;;  %v1791_v39 = vmul.f32 %v4919_v37, %v1744_v33 }
 0x5b0   :  { %1830 = vrot.lane.b32.xlu0 %v1781_v51, %s3614_s10  ;;  %1832 = vrot.lane.b32.xlu1 %v1782_v28, %s3614_s10  ;;  %v1788_v51 = vmul.f32 %v4899_v45, %v1744_v33  ;;  %v1789_v28 = vmul.f32 %v4906_v42, %v1744_v33 }
 0x5b4   :  { %1834 = vrot.lane.b32.xlu0 %v1783_v24, %s3614_s10  ;;  %1836 = vrot.lane.b32.xlu1 %v1784_v12, %s3614_s10  ;;  %v1790_v24 = vmul.f32 %v4909_v40, %v1744_v33  ;;  %v7204_v12 = vmov 3  }
 0x5b8   :  { %1838 = vrot.lane.b32.xlu0 %v1785_v22, %s3614_s10  ;;  %1840 = vrot.lane.b32.xlu1 %v1786_v32, %s3614_s10 }
 0x5bc   :  { %1842 = vrot.lane.b32.xlu0 %v1787_v38, %s3614_s10  ;;  %1844 = vrot.lane.b32.xlu1 %v1788_v51, %s3614_s10 }
 0x5c0   :  { %1846 = vrot.lane.b32.xlu0 %v1789_v28, %s3614_s10  ;;  %1848 = vrot.lane.b32.xlu1 %v1790_v24, %s3614_s10 }
 0x5c4   :  { %1850 = vrot.lane.b32.xlu0 %v1791_v39, %s3614_s10  ;;  %1901 = vperm.xlu1 %3497, %v4823_v29  }
 0x5c8   :  { %1905 = vperm.xlu0 %3498, %v4842_v11   ;;  %1909 = vperm.xlu1 %3497, %v4851_v34  }
 0x5cc   :  { %1913 = vperm.xlu1 %3497, %v4832_v41   ;;  %3500 = vset.pattern.permute.xlu0 %v7204_v12 }
 0x5d0   :  { %3499 = vset.pattern.permute.xlu1 %v7204_v12 }
 0x605   :  { %v4967_v22 = vpop.permute.xlu1 %1812  ;;  %v4969_v32 = vpop.permute.xlu0 %1814 }
 0x606   :  { %7205 = vst [vmem:[#allocation143_spill] sm:$0xff] %v4967_v22  ;;  %7206 = vst [vmem:[#allocation144_spill] sm:$0xff] %v4969_v32 }
 0x609   :  { %v4971_v38 = vpop.permute.xlu1 %1816  ;;  %v4973_v33 = vpop.permute.xlu0 %1818 }
 0x60a   :  { %7207 = vst [vmem:[#allocation145_spill] sm:$0xff] %v4971_v38  ;;  %7208 = vst [vmem:[#allocation146_spill] sm:$0xff] %v4973_v33 }
 0x60d   :  { %v4975_v51 = vpop.permute.xlu1 %1820 }
 0x60e   :  { %7209 = vst [vmem:[#allocation147_spill] sm:$0xff] %v4975_v51 }
 0x61a   :  { %v4977_v28 = vpop.permute.xlu0 %1822  ;;  %v4979_v24 = vpop.permute.xlu1 %1824 }
 0x61b   :  { %7210 = vst [vmem:[#allocation148_spill] sm:$0xff] %v4977_v28  ;;  %7211 = vst [vmem:[#allocation149_spill] sm:$0xff] %v4979_v24 }
 0x61e   :  { %v4981_v39 = vpop.permute.xlu0 %1826  ;;  %v4983_v46 = vpop.permute.xlu1 %1828 }
 0x61f   :  { %7212 = vst [vmem:[#allocation150_spill] sm:$0xff] %v4981_v39  ;;  %7213 = vst [vmem:[#allocation151_spill] sm:$0xff] %v4983_v46 }
 0x622   :  { %v4985_v43 = vpop.permute.xlu0 %1830  ;;  %v4987_v30 = vpop.permute.xlu1 %1832 }
 0x623   :  { %7214 = vst [vmem:[#allocation152_spill] sm:$0xff] %v4985_v43  ;;  %7215 = vst [vmem:[#allocation153_spill] sm:$0xff] %v4987_v30 }
 0x626   :  { %v4989_v22 = vpop.permute.xlu0 %1834  ;;  %v4991_v32 = vpop.permute.xlu1 %1836 }
 0x627   :  { %7216 = vst [vmem:[#allocation154_spill] sm:$0xff] %v4989_v22  ;;  %7217 = vst [vmem:[#allocation155_spill] sm:$0xff] %v4991_v32 }
 0x62a   :  { %v4993_v38 = vpop.permute.xlu0 %1838  ;;  %v4995_v33 = vpop.permute.xlu1 %1840 }
 0x62b   :  { %7218 = vst [vmem:[#allocation156_spill] sm:$0xff] %v4993_v38  ;;  %7219 = vst [vmem:[#allocation157_spill] sm:$0xff] %v4995_v33 }
 0x62e   :  { %v4997_v51 = vpop.permute.xlu0 %1842  ;;  %v4999_v28 = vpop.permute.xlu1 %1844 }
 0x62f   :  { %7220 = vst [vmem:[#allocation158_spill] sm:$0xff] %v4997_v51  ;;  %7221 = vst [vmem:[#allocation159_spill] sm:$0xff] %v4999_v28 }
 0x632   :  { %v5001_v24 = vpop.permute.xlu0 %1846  ;;  %v5003_v39 = vpop.permute.xlu1 %1848 }
 0x633   :  { %7222 = vst [vmem:[#allocation160_spill] sm:$0xff] %v5001_v24  ;;  %7223 = vst [vmem:[#allocation161_spill] sm:$0xff] %v5003_v39  ;;  %v524_v39 = vsel %vm516_vm3, %v4265_v57, %v4263_v56  ;;  %v5142_v56 = vsel %vm516_vm3, %v4247_v48, %v4245_v47 }
 0x636   :  { %v5007_v22 = vpop.permute.xlu0 %1850 }
 0x637   :  { %7224 = vst [vmem:[#allocation162_spill] sm:$0xff] %v5007_v22 }
 0x643   :  { %v1902_v46 = vpop.permute.xlu1 %1901 }
 0x644   :  { %v1917_v43 = vmul.f32 %v1902_v46, %v4899_v45  ;;  %v1916_v30 = vmul.f32 %v1902_v46, %v4896_v35  ;;  %v1919_v33 = vmul.f32 %v1902_v46, %v4909_v40  ;;  %v1918_v38 = vmul.f32 %v1902_v46, %v4906_v42 }
 0x645   :  { %v1920_v51 = vmul.f32 %v1902_v46, %v4919_v37  ;;  %v7226_v46 = vmov 5  }
 0x646   :  { %1958 = vrot.lane.b32.xlu1 %v1917_v43, %s3615_s11  ;;  %1956 = vrot.lane.b32.xlu0 %v1916_v30, %s3615_s11 }
 0x647   :  { %v1906_v32 = vpop.permute.xlu0 %1905 }
 0x648   :  { %v1921_v24 = vmul.f32 %v1906_v32, %v4896_v35  ;;  %v1923_v43 = vmul.f32 %v1906_v32, %v4906_v42  ;;  %v1922_v30 = vmul.f32 %v1906_v32, %v4899_v45 }
 0x64a   :  { %1962 = vrot.lane.b32.xlu1 %v1919_v33, %s3615_s11  ;;  %1960 = vrot.lane.b32.xlu0 %v1918_v38, %s3615_s11  ;;  %v1924_v33 = vmul.f32 %v1906_v32, %v4909_v40  ;;  %v7225_v38 = vmov 4  }
 0x64e   :  { %1966 = vrot.lane.b32.xlu1 %v1921_v24, %s3615_s11  ;;  %1964 = vrot.lane.b32.xlu0 %v1920_v51, %s3615_s11  ;;  %v7227_v51 = vmov 8   ;;  %v7229_v24 = vmov 7  }
 0x652   :  { %1970 = vrot.lane.b32.xlu1 %v1923_v43, %s3615_s11  ;;  %1968 = vrot.lane.b32.xlu0 %v1922_v30, %s3615_s11  ;;  %v1580_v43 = vld [vmem:[%s6816_s2 + $0x8] sm:$0xff] }
 0x656   :  { %2045 = vperm.xlu1 %3499, %v4823_v29   ;;  %1972 = vrot.lane.b32.xlu0 %v1924_v33, %s3615_s11 }
 0x65a   :  { %3501 = vset.pattern.permute.xlu1 %v7225_v38  ;;  %2049 = vperm.xlu0 %3500, %v4842_v11  }
 0x65b   :  { %2189 = vperm.xlu1 %3501, %v4823_v29  }
 0x65e   :  { %2053 = vperm.xlu0 %3500, %v4851_v34  }
 0x65f   :  { %2193 = vperm.xlu1 %3501, %v4842_v11  }
 0x662   :  { %3505 = vset.pattern.permute.xlu0 %v7225_v38 }
 0x663   :  { %3502 = vset.pattern.permute.xlu1 %v7204_v12  ;;  %2201 = vperm.xlu0 %3505, %v4832_v41   ;;  %v7228_v12 = vmov 6  }
 0x664   :  { %2057 = vperm.xlu1 %3502, %v4832_v41  }
 0x667   :  { %3506 = vset.pattern.permute.xlu0 %v7226_v46 }
 0x668   :  { %3503 = vset.pattern.permute.xlu1 %v7226_v46  ;;  %2333 = vperm.xlu0 %3506, %v4823_v29  }
 0x669   :  { %2337 = vperm.xlu1 %3503, %v4842_v11  }
 0x66c   :  { %2341 = vperm.xlu0 %3506, %v4851_v34  }
 0x66d   :  { %3504 = vset.pattern.permute.xlu1 %v7225_v38 }
 0x66e   :  { %2197 = vperm.xlu1 %3504, %v4851_v34  }
 0x670   :  { %3511 = vset.pattern.permute.xlu0 %v7227_v51 }
 0x671   :  { %2765 = vperm.xlu0 %3511, %v4823_v29  }
 0x672   :  { %3507 = vset.pattern.permute.xlu1 %v7228_v12 }
 0x673   :  { %2477 = vperm.xlu1 %3507, %v4823_v29  }
 0x675   :  { %3512 = vset.pattern.permute.xlu0 %v7229_v24 }
 0x676   :  { %2625 = vperm.xlu0 %3512, %v4842_v11  }
 0x677   :  { %2481 = vperm.xlu1 %3507, %v4842_v11  }
 0x67a   :  { %2633 = vperm.xlu0 %3512, %v4832_v41  }
 0x67b   :  { %3508 = vset.pattern.permute.xlu1 %v7226_v46 }
 0x67c   :  { %2345 = vperm.xlu1 %3508, %v4832_v41  }
 0x67e   :  { %3515 = vset.pattern.permute.xlu0 %v7155_v36 }
 0x67f   :  { %322 = vperm.xlu0 %3515, %v4542_v44   ;;  %v1925_v44 = vmul.f32 %v1906_v32, %v4919_v37  ;;  %v315_v32 = vld [vmem:[#allocation2] sm:$0xf] }
 0x680   :  { %3509 = vset.pattern.permute.xlu1 %v7229_v24  ;;  %v5084_v33 = vrot.slane %v315_v32, %v4133_v26  ;;  %v5087_v38 = vrot.slane %v315_v32, %v4136_v27  ;;  %v7285_v26 = vld [vmem:[#allocation49_spill] sm:$0xff] }
 0x681   :  { %2621 = vperm.xlu1 %3509, %v4823_v29  }
 0x683   :  { %337 = vperm.xlu0 %3515, %v4554_v10   ;;  %v5075_v10 = vpop.permute.xlu1 %1909 }
 0x685   :  { %3510 = vset.pattern.permute.xlu1 %v7228_v12 }
 0x686   :  { %2485 = vperm.xlu1 %3510, %v4851_v34  }
 0x687   :  { %1590 = vperm.xlu0 %3515, %v1580_v43   ;;  %v369_v43 = vmul.f32 %v5084_v33, %v4130_v23 }
 0x68a   :  { %2489 = vperm.xlu1 %3510, %v4832_v41  }
 0x68b   :  { %1658 = vperm.xlu0 %3515, %v4823_v29   ;;  %v5077_v29 = vpop.permute.xlu1 %1913 }
 0x68e   :  { %3513 = vset.pattern.permute.xlu1 %v7227_v51 }
 0x68f   :  { %2769 = vperm.xlu1 %3513, %v4842_v11   ;;  %1668 = vperm.xlu0 %3515, %v4851_v34  }
 0x693   :  { %3514 = vset.pattern.permute.xlu1 %v7229_v24  ;;  %1974 = vrot.lane.b32.xlu0 %v1925_v44, %s3615_s11  ;;  %v370_v44 = vmul.f32 %v5087_v38, %v4130_v23 }
 0x694   :  { %2629 = vperm.xlu1 %3514, %v4851_v34  }
 0x698   :  { %3516 = vset.pattern.permute.xlu1 %v7227_v51  ;;  %v366_v51 = vmul.f32 %v5087_v38, %v4125_v21 }
 0x699   :  { %2773 = vperm.xlu1 %3516, %v4851_v34   ;;  %v5090_v34 = vrot.slane %v315_v32, %v4145_v31 }
 0x69b   :  { %v367_v12 = vmul.f32 %v5090_v34, %v4125_v21 }
 0x69d   :  { %2777 = vperm.xlu1 %3516, %v4832_v41   ;;  %v365_v41 = vmul.f32 %v5084_v33, %v4125_v21 }
 0x6a1   :  { %3517 = vset.pattern.permute.xlu1 %v7155_v36  ;;  %v5093_v36 = vrot.slane %v315_v32, %v4148_v25  ;;  %v371_v32 = vmul.f32 %v5090_v34, %v4130_v23 }
 0x6a3   :  { %v368_v24 = vmul.f32 %v5093_v36, %v4125_v21  ;;  %v522_v21 = vsel %vm516_vm3, %v4261_v55, %v4259_v54 }
 0x6a5   :  { %v556_v48 = vadd.f32 %v524_v39, %v368_v24  ;;  %v5179_v39 = vsel %vm516_vm3, %v4285_v3, %v4283_v2  ;;  %v5198_v2 = vsel %vm661_vm4, %v4287_v4, %v4289_v5  ;;  %v5217_v4 = vsel %vm661_vm4, %v4291_v6, %v4293_v7 }
 0x6b8   :  { %v5079_v11 = vpop.permute.xlu0 %1956  ;;  %v5081_v30 = vpop.permute.xlu1 %1958 }
 0x6b9   :  { %7230 = vst [vmem:[#allocation163_spill] sm:$0xff] %v5079_v11  ;;  %7231 = vst [vmem:[#allocation164_spill] sm:$0xff] %v5081_v30  ;;  %v372_v11 = vmul.f32 %v5093_v36, %v4130_v23  ;;  %v521_v30 = vsel %vm516_vm3, %v4255_v52, %v4261_v55  ;;  %v525_v23 = vsel %vm516_vm3, %v4269_v59, %v4267_v58 }
 0x6ba   :  { %v526_v52 = vsel %vm516_vm3, %v4267_v58, %v4273_v61  ;;  %v527_v55 = vsel %vm516_vm3, %v4273_v61, %v4271_v60  ;;  %v5152_v58 = vsel %vm516_vm3, %v4251_v50, %v4249_v49  ;;  %v5157_v59 = vsel %vm516_vm3, %v4249_v49, %v4257_v53 }
 0x6bb   :  { %v554_v61 = vadd.f32 %v522_v21, %v366_v51  ;;  %v557_v22 = vadd.f32 %v525_v23, %v369_v43  ;;  %v558_v25 = vadd.f32 %v526_v52, %v370_v44  ;;  %v5169_v49 = vsel %vm516_vm3, %v4281_v1, %v4279_v0  ;;  %v7238_v43 = vld [vmem:[#allocation13_spill] sm:$0xff]  ;;  %v7239_v44 = vld [vmem:[#allocation12_spill] sm:$0xff]  ;;  %v7245_v23 = vld [vmem:[#allocation23_spill] sm:$0xff] }
 0x6bc   :  { %v5097_v46 = vpop.permute.xlu0 %1960  ;;  %v5113_v28 = vpop.permute.xlu1 %1962  ;;  %v5174_v53 = vsel %vm516_vm3, %v4279_v0, %v4285_v3  ;;  %v668_v0 = vsel %vm661_vm4, %v4301_v14, %v4303_v15  ;;  %v670_v3 = vsel %vm661_vm4, %v4307_v17, %v4309_v18  ;;  %v7246_v52 = vld [vmem:[#allocation22_spill] sm:$0xff] }
 0x6bd   :  { %7232 = vst [vmem:[#allocation165_spill] sm:$0xff] %v5097_v46  ;;  %7233 = vst [vmem:[#allocation166_spill] sm:$0xff] %v5113_v28  ;;  %v523_v46 = vsel %vm516_vm3, %v4259_v54, %v4265_v57  ;;  %v528_v54 = vsel %vm516_vm3, %v4271_v60, %v4277_v63  ;;  %v5147_v57 = vsel %vm516_vm3, %v4245_v47, %v4251_v50 }
 0x6be   :  { %v553_v60 = vadd.f32 %v521_v30, %v365_v41  ;;  %v555_v63 = vadd.f32 %v523_v46, %v367_v12  ;;  %v559_v47 = vadd.f32 %v527_v55, %v371_v32  ;;  %v560_v31 = vadd.f32 %v528_v54, %v372_v11  ;;  %v7241_v32 = vld [vmem:[#allocation15_spill] sm:$0xff]  ;;  %v7247_v54 = vld [vmem:[#allocation24_spill] sm:$0xff] }
 0x6bf   :  { %v5164_v50 = vsel %vm516_vm3, %v4275_v62, %v4281_v1  ;;  %v666_v62 = vsel %vm661_vm4, %v4297_v9, %v4299_v13  ;;  %v667_v1 = vsel %vm661_vm4, %v4299_v13, %v4301_v14  ;;  %v669_v30 = vsel %vm661_vm4, %v4303_v15, %v4305_v16  ;;  %v7236_v16 = vld [vmem:[#allocation11_spill] sm:$0xff] }
 0x6c0   :  { %v5159_v28 = vpop.permute.xlu0 %1964  ;;  %v5181_v11 = vpop.permute.xlu1 %1966  ;;  %v671_v9 = vsel %vm661_vm4, %v4309_v18, %v4311_v19  ;;  %v672_v13 = vsel %vm661_vm4, %v4311_v19, %v4313_v20  ;;  %v5212_v14 = vsel %vm661_vm4, %v4289_v5, %v4291_v6  ;;  %v5222_v15 = vsel %vm661_vm4, %v4293_v7, %v4295_v8  ;;  %v7240_v8 = vld [vmem:[#allocation14_spill] sm:$0xff] }
 0x6c1   :  { %7234 = vst [vmem:[#allocation167_spill] sm:$0xff] %v5159_v28  ;;  %7235 = vst [vmem:[#allocation168_spill] sm:$0xff] %v5181_v11  ;;  %v673_v17 = vsel %vm661_vm4, %v4313_v20, %v7236_v16  ;;  %v698_v18 = vadd.f32 %v666_v62, %v553_v60  ;;  %v699_v19 = vadd.f32 %v667_v1, %v554_v61  ;;  %v7248_v61 = vld [vmem:[#allocation25_spill] sm:$0xff]  ;;  %v7251_v1 = vld [vmem:[#allocation19_spill] sm:$0xff] }
 0x6c2   :  { %v700_v41 = vadd.f32 %v668_v0, %v555_v63  ;;  %v701_v46 = vadd.f32 %v669_v30, %v556_v48  ;;  %v702_v51 = vadd.f32 %v670_v3, %v557_v22  ;;  %v703_v12 = vadd.f32 %v671_v9, %v558_v25  ;;  %v7244_v25 = vld [vmem:[#allocation16_spill] sm:$0xff]  ;;  %v7249_v48 = vld [vmem:[#allocation18_spill] sm:$0xff] }
 0x6c3   :  { %v704_v24 = vadd.f32 %v672_v13, %v559_v47  ;;  %v705_v6 = vadd.f32 %v673_v17, %v560_v31  ;;  %v5232_v7 = vsel %vm661_vm4, %v7239_v44, %v7238_v43  ;;  %v5237_v20 = vsel %vm661_vm4, %v7238_v43, %v7240_v8  ;;  %v7250_v47 = vld [vmem:[#allocation17_spill] sm:$0xff]  ;;  %v7252_v30 = vld [vmem:[#allocation20_spill] sm:$0xff]  ;;  %v7254_v9 = vld [vmem:[#allocation26_spill] sm:$0xff] }
 0x6c4   :  { %v5227_v5 = vpop.permute.xlu0 %1968  ;;  %v5242_v21 = vsel %vm661_vm4, %v7240_v8, %v7241_v32  ;;  %v5244_v22 = vpop.permute.xlu1 %1970  ;;  %v5249_v31 = vsel %vm661_vm4, %v7241_v32, %v7244_v25  ;;  %v811_v55 = vsel %vm806_vm5, %v7246_v52, %v7245_v23  ;;  %v812_v60 = vsel %vm806_vm5, %v7245_v23, %v7247_v54  ;;  %v7255_v16 = vld [vmem:[#allocation28_spill] sm:$0xff]  ;;  %v7256_v17 = vld [vmem:[#allocation27_spill] sm:$0xff]  ;;  %v7257_v44 = vld [vmem:[#allocation29_spill] sm:$0xff] }
 0x6c5   :  { %7237 = vst [vmem:[#allocation11_spill] sm:$0xff] %v5227_v5  ;;  %7242 = vst [vmem:[#allocation13_spill] sm:$0xff] %v5242_v21  ;;  %v813_v63 = vsel %vm806_vm5, %v7247_v54, %v7248_v61  ;;  %v5263_v62 = vsel %vm806_vm5, %v7250_v47, %v7249_v48  ;;  %v5268_v0 = vsel %vm806_vm5, %v7249_v48, %v7251_v1  ;;  %v7258_v32 = vld [vmem:[#allocation30_spill] sm:$0xff]  ;;  %v7259_v23 = vld [vmem:[#allocation31_spill] sm:$0xff] }
 0x6c6   :  { %7243 = vst [vmem:[#allocation12_spill] sm:$0xff] %v5244_v22  ;;  %v5273_v3 = vsel %vm806_vm5, %v7251_v1, %v7252_v30  ;;  %v814_v13 = vsel %vm806_vm5, %v7248_v61, %v7254_v9  ;;  %v815_v43 = vsel %vm806_vm5, %v7256_v17, %v7255_v16  ;;  %v816_v8 = vsel %vm806_vm5, %v7255_v16, %v7257_v44  ;;  %v7260_v54 = vld [vmem:[#allocation21_spill] sm:$0xff]  ;;  %v7284_v22 = vld [vmem:[#allocation47_spill] sm:$0xff] }
 0x6c7   :  { %7253 = vst [vmem:[#allocation14_spill] sm:$0xff] %v5273_v3  ;;  %v817_v25 = vsel %vm806_vm5, %v7257_v44, %v7258_v32  ;;  %v818_v52 = vsel %vm806_vm5, %v7258_v32, %v7259_v23  ;;  %v5293_v61 = vsel %vm806_vm5, %v7252_v30, %v7260_v54  ;;  %v843_v48 = vadd.f32 %v811_v55, %v698_v18  ;;  %v7262_v54 = vld [vmem:[#allocation33_spill] sm:$0xff]  ;;  %v7263_v18 = vld [vmem:[#allocation32_spill] sm:$0xff]  ;;  %v7267_v55 = vld [vmem:[#allocation35_spill] sm:$0xff] }
 0x6c8   :  { %v844_v47 = vadd.f32 %v812_v60, %v699_v19  ;;  %v845_v1 = vadd.f32 %v813_v63, %v700_v41  ;;  %v5295_v9 = vpop.permute.xlu0 %1972  ;;  %v846_v16 = vadd.f32 %v814_v13, %v701_v46  ;;  %v847_v23 = vadd.f32 %v815_v43, %v702_v51  ;;  %v7265_v41 = vld [vmem:[#allocation34_spill] sm:$0xff]  ;;  %v7269_v51 = vld [vmem:[#allocation36_spill] sm:$0xff]  ;;  %v7274_v13 = vld [vmem:[#allocation43_spill] sm:$0xff] }
 0x6c9   :  { %7261 = vst [vmem:[#allocation15_spill] sm:$0xff] %v5295_v9  ;;  %v848_v11 = vadd.f32 %v816_v8, %v703_v12  ;;  %v849_v5 = vadd.f32 %v817_v25, %v704_v24  ;;  %v850_v30 = vadd.f32 %v818_v52, %v705_v6  ;;  %v5306_v19 = vsel %vm806_vm5, %v7263_v18, %v7262_v54  ;;  %v7271_v24 = vld [vmem:[#allocation38_spill] sm:$0xff]  ;;  %v7272_v6 = vld [vmem:[#allocation37_spill] sm:$0xff]  ;;  %v7276_v25 = vld [vmem:[#allocation44_spill] sm:$0xff] }
 0x6ca   :  { %7264 = vst [vmem:[#allocation16_spill] sm:$0xff] %v5306_v19  ;;  %v5311_v46 = vsel %vm806_vm5, %v7262_v54, %v7265_v41  ;;  %v5316_v60 = vsel %vm806_vm5, %v7265_v41, %v7267_v55  ;;  %v5323_v12 = vsel %vm806_vm5, %v7267_v55, %v7269_v51  ;;  %v5328_v63 = vsel %vm951_vm6, %v7272_v6, %v7271_v24  ;;  %v7275_v43 = vld [vmem:[#allocation42_spill] sm:$0xff]  ;;  %v7279_v6 = vld [vmem:[#allocation39_spill] sm:$0xff] }
 0x6cb   :  { %7266 = vst [vmem:[#allocation23_spill] sm:$0xff] %v5311_v46  ;;  %7268 = vst [vmem:[#allocation22_spill] sm:$0xff] %v5316_v60  ;;  %v956_v8 = vsel %vm951_vm6, %v7275_v43, %v7274_v13  ;;  %v957_v52 = vsel %vm951_vm6, %v7274_v13, %v7276_v25  ;;  %v7278_v18 = vld [vmem:[#allocation46_spill] sm:$0xff]  ;;  %v5349_v43 = vsel %vm951_vm6, %v7271_v24, %v7279_v6  ;;  %v7280_v13 = vld [vmem:[#allocation40_spill] sm:$0xff] }
 0x6cc   :  { %7270 = vst [vmem:[#allocation24_spill] sm:$0xff] %v5323_v12  ;;  %7273 = vst [vmem:[#allocation25_spill] sm:$0xff] %v5328_v63  ;;  %v5354_v9 = vsel %vm951_vm6, %v7279_v6, %v7280_v13  ;;  %v7286_v24 = vld [vmem:[#allocation50_spill] sm:$0xff]  ;;  %v7287_v63 = vld [vmem:[#allocation51_spill] sm:$0xff] }
 0x6cd   :  { %7281 = vst [vmem:[#allocation18_spill] sm:$0xff] %v5354_v9  ;;  %v962_v60 = vsel %vm951_vm6, %v7285_v26, %v7286_v24  ;;  %v963_v6 = vsel %vm951_vm6, %v7286_v24, %v7287_v63  ;;  %v7288_v63 = vld [vmem:[#allocation53_spill] sm:$0xff]  ;;  %v7289_v24 = vld [vmem:[#allocation52_spill] sm:$0xff] }
 0x6ce   :  { %v994_v21 = vadd.f32 %v962_v60, %v849_v5  ;;  %v995_v3 = vadd.f32 %v963_v6, %v850_v30  ;;  %v7298_v5 = vld [vmem:[#allocation57_spill] sm:$0xff]  ;;  %v7300_v30 = vld [vmem:[#allocation59_spill] sm:$0xff] }
 0x6cf   :  { %v7305_v6 = vld [vmem:[#allocation65_spill] sm:$0xff] }
 0x6d5   :  { %v5297_v17 = vpop.permute.xlu1 %2045 }
 0x6d6   :  { %v2062_v44 = vmul.f32 %v5297_v17, %v4906_v42  ;;  %v2061_v32 = vmul.f32 %v5297_v17, %v4899_v45  ;;  %v2064_v55 = vmul.f32 %v5297_v17, %v4919_v37  ;;  %v2063_v51 = vmul.f32 %v5297_v17, %v4909_v40 }
 0x6d8   :  { %2104 = vrot.lane.b32.xlu0 %v2062_v44, %s3617_s12  ;;  %2102 = vrot.lane.b32.xlu1 %v2061_v32, %s3617_s12  ;;  %v7277_v32 = vld [vmem:[#allocation45_spill] sm:$0xff] }
 0x6d9   :  { %v2050_v44 = vpop.permute.xlu0 %2049  ;;  %v958_v54 = vsel %vm951_vm6, %v7276_v25, %v7277_v32  ;;  %v959_v41 = vsel %vm951_vm6, %v7277_v32, %v7278_v18  ;;  %v7282_v25 = vld [vmem:[#allocation41_spill] sm:$0xff]  ;;  %v7283_v18 = vld [vmem:[#allocation48_spill] sm:$0xff] }
 0x6da   :  { %v5359_v32 = vsel %vm951_vm6, %v7280_v13, %v7282_v25  ;;  %v960_v28 = vsel %vm951_vm6, %v7284_v22, %v7283_v18  ;;  %v961_v27 = vsel %vm951_vm6, %v7283_v18, %v7285_v26  ;;  %v988_v13 = vadd.f32 %v956_v8, %v843_v48  ;;  %v7291_v48 = vld [vmem:[#allocation54_spill] sm:$0xff]  ;;  %v7302_v8 = vld [vmem:[#allocation63_spill] sm:$0xff] }
 0x6db   :  { %v989_v25 = vadd.f32 %v957_v52, %v844_v47  ;;  %v990_v9 = vadd.f32 %v958_v54, %v845_v1  ;;  %v991_v22 = vadd.f32 %v959_v41, %v846_v16  ;;  %v992_v12 = vadd.f32 %v960_v28, %v847_v23  ;;  %v7293_v1 = vld [vmem:[#allocation55_spill] sm:$0xff]  ;;  %v7295_v16 = vld [vmem:[#allocation56_spill] sm:$0xff]  ;;  %v7303_v52 = vld [vmem:[#allocation62_spill] sm:$0xff] }
 0x6dc   :  { %2108 = vrot.lane.b32.xlu0 %v2064_v55, %s3617_s12  ;;  %2106 = vrot.lane.b32.xlu1 %v2063_v51, %s3617_s12  ;;  %v2067_v18 = vmul.f32 %v2050_v44, %v4906_v42  ;;  %v2066_v26 = vmul.f32 %v2050_v44, %v4899_v45  ;;  %v993_v46 = vadd.f32 %v961_v27, %v848_v11  ;;  %v7297_v11 = vld [vmem:[#allocation58_spill] sm:$0xff]  ;;  %v7304_v41 = vld [vmem:[#allocation64_spill] sm:$0xff] }
 0x6dd   :  { %v5375_v19 = vpop.permute.xlu0 %2053  ;;  %v5382_v55 = vsel %vm951_vm6, %v7289_v24, %v7288_v63  ;;  %v5387_v47 = vsel %vm951_vm6, %v7288_v63, %v7291_v48  ;;  %v5392_v28 = vsel %vm951_vm6, %v7291_v48, %v7293_v1  ;;  %v5397_v27 = vsel %vm951_vm6, %v7293_v1, %v7295_v16  ;;  %v7308_v16 = vld [vmem:[#allocation60_spill] sm:$0xff] }
 0x6de   :  { %7290 = vst [vmem:[#allocation17_spill] sm:$0xff] %v5382_v55  ;;  %7292 = vst [vmem:[#allocation19_spill] sm:$0xff] %v5387_v47  ;;  %v5404_v23 = vsel %vm1096_vm7, %v7298_v5, %v7297_v11  ;;  %v5409_v60 = vsel %vm1096_vm7, %v7297_v11, %v7300_v30  ;;  %v1101_v54 = vsel %vm1096_vm7, %v7303_v52, %v7302_v8  ;;  %v7310_v5 = vld [vmem:[#allocation61_spill] sm:$0xff]  ;;  %v7312_v52 = vld [vmem:[#allocation68_spill] sm:$0xff] }
 0x6df   :  { %7294 = vst [vmem:[#allocation20_spill] sm:$0xff] %v5392_v28  ;;  %7296 = vst [vmem:[#allocation26_spill] sm:$0xff] %v5397_v27  ;;  %v1102_v51 = vsel %vm1096_vm7, %v7302_v8, %v7304_v41  ;;  %v2069_v48 = vmul.f32 %v2050_v44, %v4919_v37  ;;  %v2068_v1 = vmul.f32 %v2050_v44, %v4909_v40  ;;  %v7315_v55 = vld [vmem:[#allocation70_spill] sm:$0xff] }
 0x6e0   :  { %2114 = vrot.lane.b32.xlu0 %v2067_v18, %s3617_s12  ;;  %2112 = vrot.lane.b32.xlu1 %v2066_v26, %s3617_s12  ;;  %7299 = vst [vmem:[#allocation28_spill] sm:$0xff] %v5404_v23  ;;  %7301 = vst [vmem:[#allocation27_spill] sm:$0xff] %v5409_v60  ;;  %v1103_v18 = vsel %vm1096_vm7, %v7304_v41, %v7305_v6  ;;  %v7306_v26 = vld [vmem:[#allocation66_spill] sm:$0xff]  ;;  %v5430_v11 = vsel %vm1096_vm7, %v7300_v30, %v7308_v16  ;;  %v7313_v41 = vld [vmem:[#allocation67_spill] sm:$0xff] }
 0x6e1   :  { %v1104_v63 = vsel %vm1096_vm7, %v7305_v6, %v7306_v26  ;;  %7309 = vst [vmem:[#allocation30_spill] sm:$0xff] %v5430_v11  ;;  %v5435_v8 = vsel %vm1096_vm7, %v7308_v16, %v7310_v5  ;;  %v1105_v6 = vsel %vm1096_vm7, %v7313_v41, %v7312_v52  ;;  %v7314_v26 = vld [vmem:[#allocation69_spill] sm:$0xff]  ;;  %v1133_v28 = vadd.f32 %v1101_v54, %v988_v13  ;;  %v7316_v30 = vld [vmem:[#allocation71_spill] sm:$0xff]  ;;  %v7318_v60 = vld [vmem:[#allocation72_spill] sm:$0xff] }
 0x6e2   :  { %v5423_v24 = vpop.permute.xlu0 %2201  ;;  %7311 = vst [vmem:[#allocation31_spill] sm:$0xff] %v5435_v8  ;;  %v1107_v23 = vsel %vm1096_vm7, %v7314_v26, %v7315_v55  ;;  %v1108_v11 = vsel %vm1096_vm7, %v7315_v55, %v7316_v30  ;;  %v1134_v16 = vadd.f32 %v1102_v51, %v989_v25  ;;  %v1135_v5 = vadd.f32 %v1103_v18, %v990_v9  ;;  %v7317_v8 = vld [vmem:[#allocation73_spill] sm:$0xff]  ;;  %v7332_v18 = vld [vmem:[#allocation84_spill] sm:$0xff]  ;;  %v7336_v30 = vld [vmem:[#allocation87_spill] sm:$0xff] }
 0x6e3   :  { %7307 = vst [vmem:[#allocation29_spill] sm:$0xff] %v5423_v24  ;;  %v1106_v24 = vsel %vm1096_vm7, %v7312_v52, %v7314_v26  ;;  %v1136_v41 = vadd.f32 %v1104_v63, %v991_v22  ;;  %v1137_v27 = vadd.f32 %v1105_v6, %v992_v12  ;;  %v2065_v13 = vmul.f32 %v2050_v44, %v4896_v35  ;;  %v7328_v44 = vld [vmem:[#allocation77_spill] sm:$0xff]  ;;  %v7335_v6 = vld [vmem:[#allocation88_spill] sm:$0xff] }
 0x6e4   :  { %2118 = vrot.lane.b32.xlu0 %v2069_v48, %s3617_s12  ;;  %2116 = vrot.lane.b32.xlu1 %v2068_v1, %s3617_s12  ;;  %v1138_v47 = vadd.f32 %v1106_v24, %v993_v46  ;;  %v2060_v54 = vmul.f32 %v5297_v17, %v4896_v35  ;;  %v1139_v52 = vadd.f32 %v1107_v23, %v994_v21  ;;  %v7320_v48 = vld [vmem:[#allocation74_spill] sm:$0xff]  ;;  %v7323_v46 = vld [vmem:[#allocation75_spill] sm:$0xff]  ;;  %v7325_v17 = vld [vmem:[#allocation76_spill] sm:$0xff] }
 0x6e5   :  { %v1140_v26 = vadd.f32 %v1108_v11, %v995_v3  ;;  %v5457_v55 = vsel %vm1096_vm7, %v7318_v60, %v7317_v8  ;;  %v5462_v9 = vsel %vm1096_vm7, %v7317_v8, %v7320_v48  ;;  %v5469_v12 = vsel %vm1096_vm7, %v7320_v48, %v7323_v46  ;;  %v7327_v3 = vld [vmem:[#allocation78_spill] sm:$0xff]  ;;  %v7330_v23 = vld [vmem:[#allocation83_spill] sm:$0xff]  ;;  %v7333_v24 = vld [vmem:[#allocation85_spill] sm:$0xff] }
 0x6e6   :  { %7319 = vst [vmem:[#allocation21_spill] sm:$0xff] %v5457_v55  ;;  %7321 = vst [vmem:[#allocation33_spill] sm:$0xff] %v5462_v9  ;;  %v5474_v21 = vsel %vm1096_vm7, %v7323_v46, %v7325_v17  ;;  %v5479_v22 = vsel %vm1241_vm8, %v7328_v44, %v7327_v3  ;;  %v7331_v60 = vld [vmem:[#allocation82_spill] sm:$0xff]  ;;  %v1247_v63 = vsel %vm1241_vm8, %v7330_v23, %v7332_v18  ;;  %v7338_v44 = vld [vmem:[#allocation79_spill] sm:$0xff] }
 0x6e7   :  { %v5464_v25 = vpop.permute.xlu0 %2333  ;;  %7324 = vst [vmem:[#allocation34_spill] sm:$0xff] %v5469_v12  ;;  %7326 = vst [vmem:[#allocation35_spill] sm:$0xff] %v5474_v21  ;;  %v1246_v51 = vsel %vm1241_vm8, %v7331_v60, %v7330_v23  ;;  %v1248_v1 = vsel %vm1241_vm8, %v7332_v18, %v7333_v24  ;;  %v7334_v11 = vld [vmem:[#allocation86_spill] sm:$0xff]  ;;  %v1928_v46 = vmul.f32 %v5075_v10, %v4906_v42  ;;  %v7340_v60 = vld [vmem:[#allocation80_spill] sm:$0xff] }
 0x6e8   :  { %7322 = vst [vmem:[#allocation32_spill] sm:$0xff] %v5464_v25  ;;  %7329 = vst [vmem:[#allocation36_spill] sm:$0xff] %v5479_v22  ;;  %2110 = vrot.lane.b32.xlu0 %v2065_v13, %s3617_s12  ;;  %2100 = vrot.lane.b32.xlu1 %v2060_v54, %s3617_s12  ;;  %v1249_v8 = vsel %vm1241_vm8, %v7333_v24, %v7334_v11  ;;  %v1250_v13 = vsel %vm1241_vm8, %v7336_v30, %v7335_v6  ;;  %v7337_v54 = vld [vmem:[#allocation89_spill] sm:$0xff]  ;;  %v7342_v24 = vld [vmem:[#allocation90_spill] sm:$0xff] }
 0x6e9   :  { %v1251_v48 = vsel %vm1241_vm8, %v7335_v6, %v7337_v54  ;;  %v1927_v17 = vmul.f32 %v5075_v10, %v4899_v45  ;;  %v5508_v23 = vsel %vm1241_vm8, %v7327_v3, %v7338_v44  ;;  %v5513_v18 = vsel %vm1241_vm8, %v7338_v44, %v7340_v60  ;;  %v7343_v6 = vld [vmem:[#allocation91_spill] sm:$0xff]  ;;  %v7345_v12 = vld [vmem:[#allocation81_spill] sm:$0xff] }
 0x6ea   :  { %7339 = vst [vmem:[#allocation38_spill] sm:$0xff] %v5508_v23  ;;  %7341 = vst [vmem:[#allocation37_spill] sm:$0xff] %v5513_v18  ;;  %v1252_v11 = vsel %vm1241_vm8, %v7337_v54, %v7342_v24  ;;  %v1253_v30 = vsel %vm1241_vm8, %v7342_v24, %v7343_v6  ;;  %v5526_v3 = vsel %vm1241_vm8, %v7340_v60, %v7345_v12  ;;  %v7347_v12 = vld [vmem:[#allocation93_spill] sm:$0xff]  ;;  %v7348_v60 = vld [vmem:[#allocation92_spill] sm:$0xff] }
 0x6eb   :  { %v5521_v25 = vpop.permute.xlu0 %2341  ;;  %7346 = vst [vmem:[#allocation42_spill] sm:$0xff] %v5526_v3  ;;  %v1278_v55 = vadd.f32 %v1246_v51, %v1133_v28  ;;  %v1279_v22 = vadd.f32 %v1247_v63, %v1134_v16  ;;  %v1280_v44 = vadd.f32 %v1248_v1, %v1135_v5  ;;  %v1281_v18 = vadd.f32 %v1249_v8, %v1136_v41  ;;  %v7350_v16 = vld [vmem:[#allocation94_spill] sm:$0xff]  ;;  %v7354_v41 = vld [vmem:[#allocation96_spill] sm:$0xff]  ;;  %v7357_v51 = vld [vmem:[#allocation97_spill] sm:$0xff] }
 0x6ec   :  { %7344 = vst [vmem:[#allocation43_spill] sm:$0xff] %v5521_v25  ;;  %1980 = vrot.lane.b32.xlu0 %v1928_v46, %s3615_s11  ;;  %1978 = vrot.lane.b32.xlu1 %v1927_v17, %s3615_s11  ;;  %v1282_v54 = vadd.f32 %v1250_v13, %v1137_v27  ;;  %v1283_v21 = vadd.f32 %v1251_v48, %v1138_v47  ;;  %v7352_v27 = vld [vmem:[#allocation95_spill] sm:$0xff]  ;;  %v7362_v48 = vld [vmem:[#allocation102_spill] sm:$0xff]  ;;  %v7373_v25 = vld [vmem:[#allocation101_spill] sm:$0xff] }
 0x6ed   :  { %v1284_v9 = vadd.f32 %v1252_v11, %v1139_v52  ;;  %v1285_v23 = vadd.f32 %v1253_v30, %v1140_v26  ;;  %v1930_v24 = vmul.f32 %v5075_v10, %v4919_v37  ;;  %v1929_v6 = vmul.f32 %v5075_v10, %v4909_v40  ;;  %v7356_v26 = vld [vmem:[#allocation98_spill] sm:$0xff]  ;;  %v7359_v1 = vld [vmem:[#allocation99_spill] sm:$0xff]  ;;  %v7364_v11 = vld [vmem:[#allocation104_spill] sm:$0xff] }
 0x6ee   :  { %v5537_v28 = vsel %vm1241_vm8, %v7348_v60, %v7347_v12  ;;  %v5542_v5 = vsel %vm1241_vm8, %v7347_v12, %v7350_v16  ;;  %v5547_v47 = vsel %vm1241_vm8, %v7350_v16, %v7352_v27  ;;  %v5552_v52 = vsel %vm1241_vm8, %v7352_v27, %v7354_v41  ;;  %v7361_v13 = vld [vmem:[#allocation103_spill] sm:$0xff]  ;;  %v7365_v12 = vld [vmem:[#allocation105_spill] sm:$0xff]  ;;  %v7366_v16 = vld [vmem:[#allocation106_spill] sm:$0xff] }
 0x6ef   :  { %7349 = vst [vmem:[#allocation44_spill] sm:$0xff] %v5537_v28  ;;  %7351 = vst [vmem:[#allocation45_spill] sm:$0xff] %v5542_v5  ;;  %v5557_v63 = vsel %vm215_vm2, %v7357_v51, %v7356_v26  ;;  %v5562_v8 = vsel %vm215_vm2, %v7356_v26, %v7359_v1  ;;  %v1390_v46 = vsel %vm215_vm2, %v7362_v48, %v7361_v13  ;;  %v7367_v41 = vld [vmem:[#allocation108_spill] sm:$0xff]  ;;  %v7368_v26 = vld [vmem:[#allocation107_spill] sm:$0xff] }
 0x6f0   :  { %7353 = vst [vmem:[#allocation46_spill] sm:$0xff] %v5547_v47  ;;  %7355 = vst [vmem:[#allocation39_spill] sm:$0xff] %v5552_v52  ;;  %v5567_v17 = vpop.permute.xlu0 %2765  ;;  %1984 = vrot.lane.b32.xlu0 %v1930_v24, %s3615_s11  ;;  %1982 = vrot.lane.b32.xlu1 %v1929_v6, %s3615_s11  ;;  %v1391_v30 = vsel %vm215_vm2, %v7361_v13, %v7364_v11  ;;  %v1392_v60 = vsel %vm215_vm2, %v7364_v11, %v7365_v12  ;;  %v7369_v48 = vld [vmem:[#allocation109_spill] sm:$0xff]  ;;  %v7370_v6 = vld [vmem:[#allocation110_spill] sm:$0xff] }
 0x6f1   :  { %7358 = vst [vmem:[#allocation40_spill] sm:$0xff] %v5557_v63  ;;  %7360 = vst [vmem:[#allocation41_spill] sm:$0xff] %v5562_v8  ;;  %v1393_v27 = vsel %vm215_vm2, %v7365_v12, %v7366_v16  ;;  %v1394_v51 = vsel %vm215_vm2, %v7368_v26, %v7367_v41  ;;  %v1395_v24 = vsel %vm215_vm2, %v7367_v41, %v7369_v48  ;;  %v7371_v16 = vld [vmem:[#allocation100_spill] sm:$0xff] }
 0x6f2   :  { %7363 = vst [vmem:[#allocation48_spill] sm:$0xff] %v5567_v17  ;;  %v1396_v13 = vsel %vm215_vm2, %v7369_v48, %v7370_v6  ;;  %v5589_v17 = vpop.permute.xlu1 %2189  ;;  %v1933_v11 = vmul.f32 %v5077_v29, %v4906_v42  ;;  %v1932_v12 = vmul.f32 %v5077_v29, %v4899_v45  ;;  %v5598_v26 = vsel %vm215_vm2, %v7359_v1, %v7371_v16  ;;  %v7374_v48 = vld [vmem:[#allocation111_spill] sm:$0xff] }
 0x6f3   :  { %7372 = vst [vmem:[#allocation47_spill] sm:$0xff] %v5598_v26  ;;  %v5603_v41 = vsel %vm215_vm2, %v7371_v16, %v7373_v25  ;;  %v1422_v47 = vadd.f32 %v1390_v46, %v1278_v55  ;;  %v1397_v28 = vsel %vm215_vm2, %v7370_v6, %v7374_v48  ;;  %v1423_v63 = vadd.f32 %v1391_v30, %v1279_v22  ;;  %v7377_v55 = vld [vmem:[#allocation113_spill] sm:$0xff]  ;;  %v7378_v46 = vld [vmem:[#allocation112_spill] sm:$0xff]  ;;  %v7392_v48 = vld [vmem:[#allocation123_spill] sm:$0xff] }
 0x6f4   :  { %v1424_v52 = vadd.f32 %v1392_v60, %v1280_v44  ;;  %v1425_v5 = vadd.f32 %v1393_v27, %v1281_v18  ;;  %1990 = vrot.lane.b32.xlu0 %v1933_v11, %s3615_s11  ;;  %1988 = vrot.lane.b32.xlu1 %v1932_v12, %s3615_s11  ;;  %v1426_v8 = vadd.f32 %v1394_v51, %v1282_v54  ;;  %v7380_v44 = vld [vmem:[#allocation114_spill] sm:$0xff]  ;;  %v7383_v54 = vld [vmem:[#allocation129_spill] sm:$0xff]  ;;  %v7385_v60 = vld [vmem:[#allocation131_spill] sm:$0xff] }
 0x6f5   :  { %v1427_v1 = vadd.f32 %v1395_v24, %v1283_v21  ;;  %v5610_v26 = vadd.f32 %v1396_v13, %v1284_v9  ;;  %v5612_v3 = vpop.permute.xlu0 %2625  ;;  %v1429_v25 = vadd.f32 %v1397_v28, %v1285_v23  ;;  %v5617_v16 = vsel %vm215_vm2, %v7378_v46, %v7377_v55  ;;  %v7381_v21 = vld [vmem:[#allocation115_spill] sm:$0xff]  ;;  %v7384_v28 = vld [vmem:[#allocation128_spill] sm:$0xff]  ;;  %v7386_v27 = vld [vmem:[#allocation130_spill] sm:$0xff] }
 0x6f6   :  { %7376 = vst [vmem:[#allocation50_spill] sm:$0xff] %v5612_v3  ;;  %7379 = vst [vmem:[#allocation51_spill] sm:$0xff] %v5617_v16  ;;  %v1935_v22 = vmul.f32 %v5077_v29, %v4919_v37  ;;  %v1934_v18 = vmul.f32 %v5077_v29, %v4909_v40  ;;  %v5626_v9 = vsel %vm215_vm2, %v7377_v55, %v7380_v44  ;;  %v7387_v24 = vld [vmem:[#allocation116_spill] sm:$0xff]  ;;  %v7389_v13 = vld [vmem:[#allocation118_spill] sm:$0xff] }
 0x6f7   :  { %7375 = vst [vmem:[#allocation49_spill] sm:$0xff] %v5610_v26  ;;  %v5631_v23 = vsel %vm215_vm2, %v7380_v44, %v7381_v21  ;;  %v1540_v30 = vsel %vm1530_vm9, %v7384_v28, %v7383_v54  ;;  %v1542_v51 = vsel %vm1530_vm9, %v7386_v27, %v7385_v60  ;;  %v5642_v6 = vsel %vm215_vm2, %v7381_v21, %v7387_v24  ;;  %v7390_v11 = vld [vmem:[#allocation117_spill] sm:$0xff]  ;;  %v7393_v55 = vld [vmem:[#allocation122_spill] sm:$0xff]  ;;  %v5652_v44 = vpop.permute.xlu1 %2193  ;;  %v7394_v60 = vld [vmem:[#allocation124_spill] sm:$0xff] }
 0x6f8   :  { %7382 = vst [vmem:[#allocation53_spill] sm:$0xff] %v5631_v23  ;;  %7388 = vst [vmem:[#allocation52_spill] sm:$0xff] %v5642_v6  ;;  %v5647_v12 = vsel %vm1530_vm9, %v7390_v11, %v7389_v13  ;;  %v1535_v46 = vsel %vm1530_vm9, %v7393_v55, %v7392_v48  ;;  %1994 = vrot.lane.b32.xlu0 %v1935_v22, %s3615_s11  ;;  %1992 = vrot.lane.b32.xlu1 %v1934_v18, %s3615_s11  ;;  %v7395_v24 = vld [vmem:[#allocation125_spill] sm:$0xff]  ;;  %v7396_v11 = vld [vmem:[#allocation126_spill] sm:$0xff] }
 0x6f9   :  { %7391 = vst [vmem:[#allocation54_spill] sm:$0xff] %v5647_v12  ;;  %v1536_v21 = vsel %vm1530_vm9, %v7392_v48, %v7394_v60  ;;  %v1537_v3 = vsel %vm1530_vm9, %v7394_v60, %v7395_v24  ;;  %v1538_v23 = vsel %vm1530_vm9, %v7395_v24, %v7396_v11  ;;  %v7397_v55 = vld [vmem:[#allocation127_spill] sm:$0xff]  ;;  %v5668_v16 = vpop.permute.xlu0 %2633  ;;  %v1572_v22 = vadd.f32 %v1540_v30, %v1427_v1  ;;  %v7400_v24 = vld [vmem:[#allocation120_spill] sm:$0xff] }
 0x6fa   :  { %v1539_v26 = vsel %vm1530_vm9, %v7397_v55, %v7384_v28  ;;  %7398 = vst [vmem:[#allocation55_spill] sm:$0xff] %v5668_v16  ;;  %v1574_v18 = vadd.f32 %v1542_v51, %v1429_v25  ;;  %v2206_v12 = vmul.f32 %v5589_v17, %v4906_v42  ;;  %v2205_v48 = vmul.f32 %v5589_v17, %v4899_v45  ;;  %v7399_v6 = vld [vmem:[#allocation119_spill] sm:$0xff]  ;;  %v7401_v28 = vld [vmem:[#allocation121_spill] sm:$0xff] }
 0x6fb   :  { %v5677_v60 = vsel %vm1530_vm9, %v7389_v13, %v7399_v6  ;;  %v5682_v11 = vsel %vm1530_vm9, %v7399_v6, %v7400_v24  ;;  %v5687_v1 = vsel %vm1530_vm9, %v7400_v24, %v7401_v28  ;;  %v5689_v25 = vadd.f32 %v1535_v46, %v1422_v47  ;;  %v7402_v51 = vld [vmem:[#allocation139_spill] sm:$0xff]  ;;  %v7405_v46 = vld [vmem:[#allocation132_spill] sm:$0xff] }
 0x6fc   :  { %2248 = vrot.lane.b32.xlu0 %v2206_v12, %s3619_s13  ;;  %2246 = vrot.lane.b32.xlu1 %v2205_v48, %s3619_s13  ;;  %v5693_v30 = vadd.f32 %v1536_v21, %v1423_v63  ;;  %v5696_v13 = vadd.f32 %v7402_v51, %v1572_v22  ;;  %v5699_v55 = vadd.f32 %v7402_v51, %v1574_v18  ;;  %v7404_v12 = vld [vmem:[#allocation133_spill] sm:$0xff]  ;;  %v7406_v21 = vld [vmem:[#allocation134_spill] sm:$0xff]  ;;  %v7408_v18 = vld [vmem:[#allocation136_spill] sm:$0xff] }
 0x6fd   :  { %v5701_v6 = vadd.f32 %v1537_v3, %v1424_v52  ;;  %v5703_v16 = vadd.f32 %v1538_v23, %v1425_v5  ;;  %v1571_v24 = vadd.f32 %v1539_v26, %v1426_v8  ;;  %v5708_v47 = vsel %vm1530_vm9, %v7383_v54, %v7386_v27  ;;  %v5720_v3 = vpop.permute.xlu1 %2057  ;;  %v7409_v48 = vld [vmem:[#allocation135_spill] sm:$0xff] }
 0x6fe   :  { %7403 = vst [vmem:[#allocation56_spill] sm:$0xff] %v5708_v47  ;;  %v5713_v63 = vsel %vm1530_vm9, %v7405_v46, %v7404_v12  ;;  %v5718_v22 = vsel %vm1530_vm9, %v7404_v12, %v7406_v21  ;;  %7407 = vst [vmem:[#allocation58_spill] sm:$0xff] %v5720_v3  ;;  %v323_v5 = vpop.permute.xlu0 %322  ;;  %v2208_v52 = vmul.f32 %v5589_v17, %v4919_v37  ;;  %v1628_v12 = vmax.f32 %v5696_v13, 0.0 }
 0x6ff   :  { %v2207_v8 = vmul.f32 %v5589_v17, %v4909_v40  ;;  %v361_v26 = vmul.f32 %v5084_v33, %v323_v5  ;;  %v362_v23 = vmul.f32 %v5087_v38, %v323_v5  ;;  %v363_v54 = vmul.f32 %v5090_v34, %v323_v5 }
 0x700   :  { %v364_v27 = vmul.f32 %v5093_v36, %v323_v5  ;;  %v5733_v28 = vsel %vm1530_vm9, %v7409_v48, %v7408_v18  ;;  %2252 = vrot.lane.b32.xlu0 %v2208_v52, %s3619_s13  ;;  %v5740_v3 = vadd.f32 %v7402_v51, %v1571_v24  ;;  %v2211_v52 = vmul.f32 %v5652_v44, %v4906_v42 }
 0x701   :  { %2250 = vrot.lane.b32.xlu1 %v2207_v8, %s3619_s13  ;;  %v549_v21 = vadd.f32 %v5142_v56, %v361_v26  ;;  %v550_v5 = vadd.f32 %v5147_v57, %v362_v23  ;;  %v551_v47 = vadd.f32 %v5152_v58, %v363_v54  ;;  %v1931_v8 = vmul.f32 %v5077_v29, %v4896_v35  ;;  %v5761_v26 = vpop.permute.xlu1 %2337 }
 0x702   :  { %v552_v18 = vadd.f32 %v5157_v59, %v364_v27  ;;  %v338_v48 = vpop.permute.xlu0 %337  ;;  %v1926_v46 = vmul.f32 %v5075_v10, %v4896_v35  ;;  %v5754_v24 = vmul.f32 %v5589_v17, %v4896_v35  ;;  %v2210_v59 = vmul.f32 %v5652_v44, %v4899_v45  ;;  %v7410_v27 = vld [vmem:[#allocation14_spill] sm:$0xff] }
 0x703   :  { %v694_v56 = vadd.f32 %v5198_v2, %v549_v21  ;;  %v695_v57 = vadd.f32 %v5212_v14, %v550_v5  ;;  %v373_v29 = vmul.f32 %v5084_v33, %v338_v48  ;;  %v374_v23 = vmul.f32 %v5087_v38, %v338_v48  ;;  %v7411_v5 = vld [vmem:[#allocation13_spill] sm:$0xff] }
 0x704   :  { %v697_v58 = vadd.f32 %v5222_v15, %v552_v18  ;;  %v375_v10 = vmul.f32 %v5090_v34, %v338_v48  ;;  %v376_v17 = vmul.f32 %v5093_v36, %v338_v48  ;;  %2258 = vrot.lane.b32.xlu0 %v2211_v52, %s3619_s13  ;;  %v696_v2 = vadd.f32 %v5217_v4, %v551_v47  ;;  %v7412_v52 = vld [vmem:[#allocation27_spill] sm:$0xff] }
 0x705   :  { %2256 = vrot.lane.b32.xlu1 %v2210_v59, %s3619_s13  ;;  %v2213_v14 = vmul.f32 %v5652_v44, %v4919_v37  ;;  %v840_v15 = vadd.f32 %v5268_v0, %v695_v57  ;;  %v561_v33 = vadd.f32 %v5164_v50, %v373_v29  ;;  %v562_v38 = vadd.f32 %v5169_v49, %v374_v23  ;;  %v7413_v57 = vld [vmem:[#allocation31_spill] sm:$0xff] }
 0x706   :  { %v842_v21 = vadd.f32 %v5293_v61, %v697_v58  ;;  %v563_v34 = vadd.f32 %v5174_v53, %v375_v10  ;;  %v564_v36 = vadd.f32 %v5179_v39, %v376_v17  ;;  %v5778_v54 = vpop.permute.xlu0 %1590  ;;  %v2212_v4 = vmul.f32 %v5652_v44, %v4909_v40  ;;  %v5798_v58 = vpop.permute.xlu1 %2197 }
 0x707   :  { %v5784_v47 = vmul.f32 %v5375_v19, %v4899_v45  ;;  %v985_v0 = vadd.f32 %v5349_v43, %v840_v15  ;;  %v839_v50 = vadd.f32 %v5263_v62, %v694_v56  ;;  %v706_v49 = vadd.f32 %v5232_v7, %v561_v33  ;;  %v7414_v62 = vld [vmem:[#allocation23_spill] sm:$0xff]  ;;  %v7415_v56 = vld [vmem:[#allocation24_spill] sm:$0xff]  ;;  %v7417_v15 = vld [vmem:[#allocation38_spill] sm:$0xff] }
 0x708   :  { %v987_v61 = vadd.f32 %v5359_v32, %v842_v21  ;;  %v707_v53 = vadd.f32 %v5237_v20, %v562_v38  ;;  %v709_v39 = vadd.f32 %v5249_v31, %v564_v36  ;;  %2262 = vrot.lane.b32.xlu0 %v2213_v14, %s3619_s13  ;;  %v841_v48 = vadd.f32 %v7410_v27, %v696_v2  ;;  %v7416_v2 = vld [vmem:[#allocation16_spill] sm:$0xff]  ;;  %v7418_v21 = vld [vmem:[#allocation42_spill] sm:$0xff]  ;;  %v7424_v27 = vld [vmem:[#allocation41_spill] sm:$0xff] }
 0x709   :  { %v708_v18 = vadd.f32 %v7411_v5, %v563_v34  ;;  %2260 = vrot.lane.b32.xlu1 %v2212_v4, %s3619_s13  ;;  %v1130_v43 = vadd.f32 %v7412_v52, %v985_v0  ;;  %v2072_v31 = vmul.f32 %v5375_v19, %v4906_v42  ;;  %v1608_v59 = vadd.f32 %v5778_v54, %v5693_v30  ;;  %v7420_v34 = vld [vmem:[#allocation22_spill] sm:$0xff]  ;;  %v7422_v0 = vld [vmem:[#allocation19_spill] sm:$0xff]  ;;  %v7425_v52 = vld [vmem:[#allocation28_spill] sm:$0xff] }
 0x70a   :  { %v1132_v32 = vadd.f32 %v7413_v57, %v987_v61  ;;  %v852_v7 = vadd.f32 %v7414_v62, %v707_v53  ;;  %v854_v20 = vadd.f32 %v7415_v56, %v709_v39  ;;  %v2209_v29 = vmul.f32 %v5652_v44, %v4896_v35  ;;  %v7419_v44 = vld [vmem:[#allocation25_spill] sm:$0xff]  ;;  %v7421_v36 = vld [vmem:[#allocation18_spill] sm:$0xff]  ;;  %v7428_v56 = vld [vmem:[#allocation35_spill] sm:$0xff] }
 0x70b   :  { %v1610_v23 = vadd.f32 %v5778_v54, %v5703_v16  ;;  %v5812_v10 = vmul.f32 %v5375_v19, %v4909_v40  ;;  %v5816_v17 = vmul.f32 %v5375_v19, %v4919_v37  ;;  %v851_v14 = vadd.f32 %v7416_v2, %v706_v49  ;;  %v7423_v53 = vld [vmem:[#allocation26_spill] sm:$0xff]  ;;  %v7427_v62 = vld [vmem:[#allocation33_spill] sm:$0xff]  ;;  %v5834_v2 = vpop.permute.xlu1 %2477 }
 0x70c   :  { %1986 = vrot.lane.b32.xlu0 %v1931_v8, %s3615_s11  ;;  %v1275_v30 = vadd.f32 %v7417_v15, %v1130_v43  ;;  %v1277_v33 = vadd.f32 %v7418_v21, %v1132_v32  ;;  %v984_v38 = vadd.f32 %v7419_v44, %v839_v50  ;;  %v853_v16 = vadd.f32 %v7420_v34, %v708_v18  ;;  %v7426_v32 = vld [vmem:[#allocation30_spill] sm:$0xff]  ;;  %v7432_v21 = vld [vmem:[#allocation45_spill] sm:$0xff]  ;;  %v7433_v44 = vld [vmem:[#allocation39_spill] sm:$0xff] }
 0x70d   :  { %1976 = vrot.lane.b32.xlu1 %v1926_v46, %s3615_s11  ;;  %v986_v4 = vadd.f32 %v7421_v36, %v841_v48  ;;  %v997_v61 = vadd.f32 %v7422_v0, %v852_v7  ;;  %v999_v39 = vadd.f32 %v7423_v53, %v854_v20  ;;  %v1624_v5 = vmax.f32 %v1608_v59, 0.0  ;;  %v7429_v20 = vld [vmem:[#allocation36_spill] sm:$0xff] }
 0x70e   :  { %v1419_v49 = vadd.f32 %v7424_v27, %v1275_v30  ;;  %v1421_v8 = vadd.f32 %v5603_v41, %v1277_v33  ;;  %v1129_v43 = vadd.f32 %v7425_v52, %v984_v38  ;;  %v1626_v57 = vmax.f32 %v1610_v23, 0.0  ;;  %v7430_v41 = vld [vmem:[#allocation17_spill] sm:$0xff]  ;;  %v7434_v34 = vld [vmem:[#allocation20_spill] sm:$0xff] }
 0x70f   :  { %v1131_v50 = vadd.f32 %v7426_v32, %v986_v4  ;;  %v1142_v18 = vadd.f32 %v7427_v62, %v997_v61  ;;  %v1144_v46 = vadd.f32 %v7428_v56, %v999_v39  ;;  %v996_v15 = vadd.f32 %v7430_v41, %v851_v14  ;;  %v7431_v23 = vld [vmem:[#allocation37_spill] sm:$0xff]  ;;  %v7444_v41 = vld [vmem:[#allocation51_spill] sm:$0xff] }
 0x710   :  { %2254 = vrot.lane.b32.xlu0 %v2209_v29, %s3619_s13  ;;  %v1564_v48 = vadd.f32 %v5677_v60, %v1419_v49  ;;  %v1566_v7 = vadd.f32 %v5687_v1, %v1421_v8  ;;  %v1274_v59 = vadd.f32 %v7429_v20, %v1129_v43  ;;  %v998_v36 = vadd.f32 %v7434_v34, %v853_v16  ;;  %v7435_v29 = vld [vmem:[#allocation138_spill] sm:$0xff]  ;;  %v7436_v1 = vld [vmem:[#allocation40_spill] sm:$0xff]  ;;  %v7437_v61 = vld [vmem:[#allocation21_spill] sm:$0xff] }
 0x711   :  { %2244 = vrot.lane.b32.xlu1 %v5754_v24, %s3619_s13  ;;  %v1276_v30 = vadd.f32 %v7431_v23, %v1131_v50  ;;  %v1287_v33 = vadd.f32 %v7432_v21, %v1142_v18  ;;  %v1289_v38 = vadd.f32 %v7433_v44, %v1144_v46  ;;  %v1141_v53 = vadd.f32 %v7437_v61, %v996_v15  ;;  %v7438_v24 = vld [vmem:[#allocation47_spill] sm:$0xff]  ;;  %v7439_v49 = vld [vmem:[#allocation52_spill] sm:$0xff]  ;;  %v7440_v43 = vld [vmem:[#allocation54_spill] sm:$0xff]  ;;  %v5866_v46 = vpop.permute.xlu1 %2481 }
 0x712   :  { %v1604_v4 = vadd.f32 %v7435_v29, %v1564_v48  ;;  %v1606_v60 = vadd.f32 %v7435_v29, %v1566_v7  ;;  %v1418_v0 = vadd.f32 %v7436_v1, %v1274_v59  ;;  %v1607_v14 = vadd.f32 %v5778_v54, %v5689_v25  ;;  %v7441_v18 = vld [vmem:[#allocation44_spill] sm:$0xff]  ;;  %v7442_v20 = vld [vmem:[#allocation34_spill] sm:$0xff] }
 0x713   :  { %v1420_v39 = vadd.f32 %v7438_v24, %v1276_v30  ;;  %v1431_v27 = vadd.f32 %v5626_v9, %v1287_v33  ;;  %v1433_v8 = vadd.f32 %v7439_v49, %v1289_v38  ;;  %v1609_v50 = vadd.f32 %v5778_v54, %v5701_v6  ;;  %v7443_v54 = vld [vmem:[#allocation140_spill] sm:$0xff]  ;;  %v7445_v30 = vld [vmem:[#allocation46_spill] sm:$0xff]  ;;  %v7446_v38 = vld [vmem:[#allocation49_spill] sm:$0xff] }
 0x714   :  { %2124 = vrot.lane.b32.xlu0 %v2072_v31, %s3617_s12  ;;  %v1620_v16 = vmax.f32 %v1604_v4, 0.0  ;;  %v1622_v52 = vmax.f32 %v1606_v60, 0.0  ;;  %v1563_v32 = vadd.f32 %v7440_v43, %v1418_v0  ;;  %v1286_v56 = vadd.f32 %v7441_v18, %v1141_v53  ;;  %v7447_v34 = vld [vmem:[#allocation56_spill] sm:$0xff]  ;;  %v7449_v4 = vld [vmem:[#allocation134_spill] sm:$0xff]  ;;  %v7450_v0 = vld [vmem:[#allocation53_spill] sm:$0xff] }
 0x715   :  { %2122 = vrot.lane.b32.xlu1 %v5784_v47, %s3617_s12  ;;  %v1565_v25 = vadd.f32 %v5682_v11, %v1420_v39  ;;  %v1576_v62 = vadd.f32 %v5718_v22, %v1431_v27  ;;  %v1578_v9 = vadd.f32 %v5733_v28, %v1433_v8  ;;  %v1143_v59 = vadd.f32 %v7442_v20, %v998_v36  ;;  %v7452_v49 = vld [vmem:[#allocation58_spill] sm:$0xff] }
 0x716   :  { %v3397_v31 = vpack.c.bf16 %v1624_v5, %v1620_v16  ;;  %v3405_v48 = vpack.c.bf16 %v1626_v57, %v1622_v52  ;;  %v1603_v7 = vadd.f32 %v7435_v29, %v1563_v32  ;;  %v1430_v22 = vadd.f32 %v7444_v41, %v1286_v56 }
 0x717   :  { %v1605_v6 = vadd.f32 %v7435_v29, %v1565_v25  ;;  %v1616_v47 = vadd.f32 %v7443_v54, %v1576_v62  ;;  %v1618_v11 = vadd.f32 %v7443_v54, %v1578_v9  ;;  %v1623_v15 = vmax.f32 %v1607_v14, 0.0  ;;  %v7448_v29 = vld [vmem:[#allocation135_spill] sm:$0xff]  ;;  %v7453_v9 = vld [vmem:[#allocation32_spill] sm:$0xff] }
 0x718   :  { %3398 = vmatprep.subr.bf16.mxu0 %v3397_v31  ;;  %3406 = vmatprep.subr.bf16.mxu1 %v3405_v48  ;;  %v1619_v28 = vmax.f32 %v1603_v7, 0.0  ;;  %v1625_v23 = vmax.f32 %v1609_v50, 0.0  ;;  %v1288_v5 = vadd.f32 %v7445_v30, %v1143_v59  ;;  %v1575_v44 = vadd.f32 %v5713_v63, %v1430_v22  ;;  %v5891_v63 = vpop.permute.xlu1 %2345  ;;  %v2980_v50 = vld [vmem:[%s6817_s3] sm:$0xff]  ;;  %v2981_v48 = vld [vmem:[%s6817_s3 + $0x8] sm:$0xff] }
 0x719   :  { %v1621_v57 = vmax.f32 %v1605_v6, 0.0  ;;  %2126 = vrot.lane.b32.xlu1 %v5812_v10, %s3617_s12  ;;  %2128 = vrot.lane.b32.xlu0 %v5816_v17, %s3617_s12  ;;  %v1632_v21 = vmax.f32 %v1616_v47, 0.0  ;;  %v1634_v33 = vmax.f32 %v1618_v11, 0.0  ;;  %v1573_v36 = vadd.f32 %v7447_v34, %v7446_v38  ;;  %v7457_v34 = vld [vmem:[#allocation29_spill] sm:$0xff] }
 0x71a   :  { %v1545_v60 = vsel %vm1530_vm9, %v7449_v4, %v7448_v29  ;;  %v3399_v1 = vpack.c.bf16 %v1623_v15, %v1619_v28  ;;  %v1432_v61 = vadd.f32 %v7450_v0, %v1288_v5  ;;  %v7451_v17 = vmax.f32 %v5699_v55, 0.0  ;;  %v5964_v5 = vpop.permute.xlu0 %1658 }
 0x71b   :  { %v3407_v53 = vpack.c.bf16 %v1625_v23, %v1621_v57  ;;  %v3401_v10 = vpack.c.bf16 %v1632_v21, %v1628_v12  ;;  %v1615_v24 = vadd.f32 %v7443_v54, %v1575_v44  ;;  %v1613_v27 = vadd.f32 %v7402_v51, %v1573_v36 }
 0x71c   :  { %v3409_v14 = vpack.c.bf16 %v1634_v33, %v7451_v17  ;;  %3400 = vmatpush1.bf16.msra.mxu0 %v3399_v1  ;;  %v1577_v39 = vadd.f32 %v1545_v60, %v1432_v61  ;;  %v2077_v8 = vmul.f32 %v7452_v49, %v4906_v42  ;;  %v1627_v16 = vmax.f32 %v5740_v3, 0.0  ;;  %v5909_v25 = vpop.permute.xlu1 %2621 }
 0x71d   :  { %3408 = vmatpush1.bf16.msra.mxu1 %v3407_v53  ;;  %3402 = vmatprep.subr.bf16.mxu0 %v3401_v10  ;;  %v1631_v13 = vmax.f32 %v1615_v24, 0.0  ;;  %v2076_v55 = vmul.f32 %v7452_v49, %v4899_v45  ;;  %v1629_v51 = vmax.f32 %v1613_v27, 0.0  ;;  %v2079_v32 = vmul.f32 %v7452_v49, %v4919_v37 }
 0x71e   :  { %3410 = vmatprep.subr.bf16.mxu1 %v3409_v14  ;;  %v1617_v12 = vadd.f32 %v7443_v54, %v1577_v39  ;;  %2134 = vrot.lane.b32.xlu0 %v2077_v8, %s3617_s12  ;;  %v2078_v3 = vmul.f32 %v7452_v49, %v4909_v40  ;;  %v2350_v18 = vmul.f32 %v7453_v9, %v4906_v42  ;;  %v7454_v31 = vmov 0.0  }
 0x71f   :  { %v3403_v52 = vpack.c.bf16 %v1631_v13, %v1627_v16  ;;  %2132 = vrot.lane.b32.xlu1 %v2076_v55, %s3617_s12  ;;  %v2349_v56 = vmul.f32 %v7453_v9, %v4899_v45  ;;  %v2352_v20 = vmul.f32 %v7453_v9, %v4919_v37  ;;  %v2351_v59 = vmul.f32 %v7453_v9, %v4909_v40 }
 0x720   :  { %v1633_v43 = vmax.f32 %v1617_v12, 0.0  ;;  %v5925_v7 = vpop.permute.xlu1 %2485  ;;  %v2355_v6 = vmul.f32 %v5761_v26, %v4906_v42  ;;  %v2354_v54 = vmul.f32 %v5761_v26, %v4899_v45  ;;  %v2357_v11 = vmul.f32 %v5761_v26, %v4919_v37 }
 0x721   :  { %3404 = vmatpush1.bf16.msra.mxu0 %v3403_v52  ;;  %v2356_v41 = vmul.f32 %v5761_v26, %v4909_v40  ;;  %v2075_v28 = vmul.f32 %v7452_v49, %v4896_v35  ;;  %v2070_v15 = vmul.f32 %v5375_v19, %v4896_v35  ;;  %v2353_v23 = vmul.f32 %v5761_v26, %v4896_v35  ;;  %v5976_v26 = vpop.permute.xlu0 %1668 }
 0x722   :  { %v3411_v62 = vpack.c.bf16 %v1633_v43, %v1629_v51  ;;  %2138 = vrot.lane.b32.xlu0 %v2079_v32, %s3617_s12  ;;  %v2348_v30 = vmul.f32 %v7453_v9, %v4896_v35  ;;  %v2216_v19 = vmul.f32 %v5798_v58, %v4906_v42  ;;  %v2215_v21 = vmul.f32 %v5798_v58, %v4899_v45 }
 0x723   :  { %2136 = vrot.lane.b32.xlu1 %v2078_v3, %s3617_s12  ;;  %v2218_v44 = vmul.f32 %v5798_v58, %v4919_v37  ;;  %v2217_v38 = vmul.f32 %v5798_v58, %v4909_v40  ;;  %v2221_v36 = vmul.f32 %v7457_v34, %v4906_v42  ;;  %v2220_v29 = vmul.f32 %v7457_v34, %v4899_v45  ;;  %v2908_v3 = vld [vmem:[%s6816_s2] sm:$0xff] }
 0x724   :  { %3412 = vmatpush1.bf16.msra.mxu1 %v3411_v62  ;;  %3389 = vmatmul.mubr.msk.f32.vlgmr.msra.gmra.mrb[0].mxu0 %vm3026_vm10, %v2980_v50  ;;  %v5942_v47 = vpop.permute.xlu1 %2489  ;;  %v2223_v1 = vmul.f32 %v7457_v34, %v4919_v37  ;;  %v2222_v0 = vmul.f32 %v7457_v34, %v4909_v40  ;;  %v2494_v10 = vmul.f32 %v5834_v2, %v4906_v42 }
 0x725   :  { %3103 = vmatprep.mubr.f32.mxu0 %v7454_v31  ;;  %v5990_v4 = vpop.permute.xlu0 %1974  ;;  %v2493_v17 = vmul.f32 %v5834_v2, %v4899_v45  ;;  %v2496_v39 = vmul.f32 %v5834_v2, %v4919_v37  ;;  %v2495_v27 = vmul.f32 %v5834_v2, %v4909_v40  ;;  %v2499_v16 = vmul.f32 %v5866_v46, %v4906_v42 }
 0x726   :  { %2392 = vrot.lane.b32.xlu0 %v2350_v18, %s3621_s14  ;;  %v2498_v13 = vmul.f32 %v5866_v46, %v4899_v45  ;;  %v2501_v52 = vmul.f32 %v5866_v46, %v4919_v37  ;;  %v2500_v51 = vmul.f32 %v5866_v46, %v4909_v40  ;;  %v2492_v18 = vmul.f32 %v5834_v2, %v4896_v35 }
 0x727   :  { %2390 = vrot.lane.b32.xlu1 %v2349_v56, %s3621_s14  ;;  %3391 = vmatmul.mubr.msk.f32.vlgmr.msra.gmra.mrb[0].mxu1 %vm3026_vm10, %v2980_v50  ;;  %v3554_v50 = vld [vmem:[%s6816_s2 + $0x8] sm:$0xff]  ;;  %v2214_v56 = vmul.f32 %v5798_v58, %v4896_v35 }
 0x728   :  { %3180 = vmatprep.mubr.f32.mxu1 %v7454_v31  ;;  %3390 = vmatmul.mubr.msk.f32.gmra.mrb[2].mxu0 %vm3026_vm10, %v2981_v48  ;;  %v5952_v22 = vpop.permute.xlu1 %2769 }
 0x729   :  { %3251 = vmatprep.mubr.f32.mxu0 %v7454_v31 }
 0x72a   :  { %2396 = vrot.lane.b32.xlu0 %v2352_v20, %s3621_s14 }
 0x72b   :  { %2394 = vrot.lane.b32.xlu1 %v2351_v59, %s3621_s14  ;;  %3392 = vmatmul.mubr.msk.f32.gmra.mrb[2].mxu1 %vm3026_vm10, %v2981_v48  ;;  %v7462_v59 = vld [vmem:[#allocation43_spill] sm:$0xff] }
 0x72c   :  { %3328 = vmatprep.mubr.f32.mxu1 %v7454_v31  ;;  %v5966_v57 = vpop.permute.xlu1 %2629  ;;  %v2361_v58 = vmul.f32 %v7462_v59, %v4909_v40  ;;  %v7480_v31 = vld [vmem:[#allocation145_spill] sm:$0xff] }
 0x72d   :  { %7455 = vst [vmem:[#allocation57_spill] sm:$0xff] %v5966_v57 }
 0x72e   :  { %2402 = vrot.lane.b32.xlu0 %v2355_v6, %s3621_s14  ;;  %v2359_v6 = vmul.f32 %v7462_v59, %v4899_v45 }
 0x72f   :  { %2400 = vrot.lane.b32.xlu1 %v2354_v54, %s3621_s14  ;;  %v2219_v54 = vmul.f32 %v7457_v34, %v4896_v35 }
 0x730   :  { %v5978_v33 = vpop.permute.xlu1 %2773 }
 0x731   :  { %7456 = vst [vmem:[#allocation59_spill] sm:$0xff] %v5978_v33  ;;  %v7483_v33 = vld [vmem:[#allocation148_spill] sm:$0xff] }
 0x732   :  { %2406 = vrot.lane.b32.xlu0 %v2357_v11, %s3621_s14 }
 0x733   :  { %2404 = vrot.lane.b32.xlu1 %v2356_v41, %s3621_s14  ;;  %v2497_v41 = vmul.f32 %v5866_v46, %v4896_v35  ;;  %v2366_v46 = vmul.f32 %v5891_v63, %v4909_v40 }
 0x734   :  { %v5992_v60 = vpop.permute.xlu1 %2777 }
 0x735   :  { %7458 = vst [vmem:[#allocation63_spill] sm:$0xff] %v5992_v60  ;;  %v7482_v60 = vld [vmem:[#allocation149_spill] sm:$0xff] }
 0x736   :  { %2130 = vrot.lane.b32.xlu0 %v2075_v28, %s3617_s12  ;;  %v1856_v57 = vsel %vm516_vm3, %v7483_v33, %v7482_v60 }
 0x737   :  { %2120 = vrot.lane.b32.xlu1 %v2070_v15, %s3617_s12 }
 0x73a   :  { %2398 = vrot.lane.b32.xlu0 %v2353_v23, %s3621_s14  ;;  %v2364_v23 = vmul.f32 %v5891_v63, %v4899_v45 }
 0x73b   :  { %2388 = vrot.lane.b32.xlu1 %v2348_v30, %s3621_s14  ;;  %v2360_v30 = vmul.f32 %v7462_v59, %v4906_v42 }
 0x73e   :  { %2268 = vrot.lane.b32.xlu0 %v2216_v19, %s3619_s13 }
 0x73f   :  { %2266 = vrot.lane.b32.xlu1 %v2215_v21, %s3619_s13 }
 0x742   :  { %2272 = vrot.lane.b32.xlu0 %v2218_v44, %s3619_s13  ;;  %v2362_v44 = vmul.f32 %v7462_v59, %v4919_v37 }
 0x743   :  { %2270 = vrot.lane.b32.xlu1 %v2217_v38, %s3619_s13 }
 0x746   :  { %2278 = vrot.lane.b32.xlu0 %v2221_v36, %s3619_s13  ;;  %v2637_v36 = vmul.f32 %v5909_v25, %v4899_v45 }
 0x747   :  { %2276 = vrot.lane.b32.xlu1 %v2220_v29, %s3619_s13  ;;  %v2365_v29 = vmul.f32 %v5891_v63, %v4906_v42 }
 0x74a   :  { %2282 = vrot.lane.b32.xlu0 %v2223_v1, %s3619_s13  ;;  %v6001_v61 = vpop.permute.xlu0 %2104  ;;  %v6003_v53 = vpop.permute.xlu1 %2102 }
 0x74b   :  { %2280 = vrot.lane.b32.xlu1 %v2222_v0, %s3619_s13 }
 0x74e   :  { %2536 = vrot.lane.b32.xlu0 %v2494_v10, %s3623_s23  ;;  %v6011_v14 = vpop.permute.xlu0 %2108  ;;  %v6013_v24 = vpop.permute.xlu1 %2106  ;;  %v2639_v10 = vmul.f32 %v5909_v25, %v4909_v40 }
 0x74f   :  { %2534 = vrot.lane.b32.xlu1 %v2493_v17, %s3623_s23  ;;  %v2367_v17 = vmul.f32 %v5891_v63, %v4919_v37 }
 0x752   :  { %2540 = vrot.lane.b32.xlu0 %v2496_v39, %s3623_s23  ;;  %v6021_v49 = vpop.permute.xlu0 %2114  ;;  %v6023_v8 = vpop.permute.xlu1 %2112 }
 0x753   :  { %2538 = vrot.lane.b32.xlu1 %v2495_v27, %s3623_s23 }
 0x756   :  { %2546 = vrot.lane.b32.xlu0 %v2499_v16, %s3623_s23  ;;  %v6031_v55 = vpop.permute.xlu0 %2118  ;;  %v6033_v12 = vpop.permute.xlu1 %2116  ;;  %v7465_v16 = vld [vmem:[#allocation50_spill] sm:$0xff] }
 0x757   :  { %2544 = vrot.lane.b32.xlu1 %v2498_v13, %s3623_s23  ;;  %v2642_v13 = vmul.f32 %v7465_v16, %v4899_v45 }
 0x75a   :  { %2550 = vrot.lane.b32.xlu0 %v2501_v52, %s3623_s23  ;;  %v6041_v43 = vpop.permute.xlu0 %2110  ;;  %v6043_v32 = vpop.permute.xlu1 %2100  ;;  %v2638_v52 = vmul.f32 %v5909_v25, %v4906_v42 }
 0x75b   :  { %2548 = vrot.lane.b32.xlu1 %v2500_v51, %s3623_s23 }
 0x75e   :  { %2919 = vperm.xlu0 %3515, %v3554_v50   ;;  %v6052_v62 = vpop.permute.xlu0 %1980  ;;  %v6054_v9 = vpop.permute.xlu1 %1978  ;;  %v2644_v50 = vmul.f32 %v7465_v16, %v4909_v40 }
 0x75f   :  { %7459 = vst [vmem:[#allocation62_spill] sm:$0xff] %v6052_v62  ;;  %2914 = vperm.xlu1 %3517, %v2908_v3  }
 0x762   :  { %2532 = vrot.lane.b32.xlu0 %v2492_v18, %s3623_s23  ;;  %v6061_v48 = vpop.permute.xlu0 %1984  ;;  %v6063_v20 = vpop.permute.xlu1 %1982  ;;  %v2640_v18 = vmul.f32 %v5909_v25, %v4919_v37 }
 0x763   :  { %7460 = vst [vmem:[#allocation64_spill] sm:$0xff] %v6061_v48  ;;  %7461 = vst [vmem:[#allocation65_spill] sm:$0xff] %v6063_v20  ;;  %2264 = vrot.lane.b32.xlu1 %v2214_v56, %s3619_s13  ;;  %v7486_v48 = vld [vmem:[#allocation162_spill] sm:$0xff]  ;;  %v7487_v20 = vld [vmem:[#allocation161_spill] sm:$0xff] }
 0x766   :  { %2410 = vrot.lane.b32.xlu0 %v2359_v6, %s3621_s14  ;;  %v6071_v2 = vpop.permute.xlu0 %1990  ;;  %v6073_v11 = vpop.permute.xlu1 %1988 }
 0x767   :  { %7463 = vst [vmem:[#allocation66_spill] sm:$0xff] %v6071_v2  ;;  %2274 = vrot.lane.b32.xlu1 %v2219_v54, %s3619_s13  ;;  %v2358_v54 = vmul.f32 %v7462_v59, %v4896_v35  ;;  %v7470_v59 = vld [vmem:[#allocation8_spill] sm:$0xff]  ;;  %v7484_v2 = vld [vmem:[#allocation142_spill] sm:$0xff] }
 0x76a   :  { %2414 = vrot.lane.b32.xlu0 %v2361_v58, %s3621_s14  ;;  %v6081_v28 = vpop.permute.xlu0 %1994  ;;  %v6083_v15 = vpop.permute.xlu1 %1992  ;;  %v2643_v58 = vmul.f32 %v7465_v16, %v4906_v42 }
 0x76b   :  { %7464 = vst [vmem:[#allocation60_spill] sm:$0xff] %v6083_v15  ;;  %2542 = vrot.lane.b32.xlu1 %v2497_v41, %s3623_s23 }
 0x76e   :  { %2420 = vrot.lane.b32.xlu0 %v2364_v23, %s3621_s14  ;;  %v6091_v19 = vpop.permute.xlu0 %2248  ;;  %v6093_v21 = vpop.permute.xlu1 %2246 }
 0x76f   :  { %2412 = vrot.lane.b32.xlu1 %v2360_v30, %s3621_s14  ;;  %v1651_v30 = vld [vmem:[#allocation2 + $0x4] sm:$0xf] }
 0x772   :  { %2424 = vrot.lane.b32.xlu0 %v2366_v46, %s3621_s14  ;;  %v6101_v38 = vpop.permute.xlu0 %2252  ;;  %v2636_v46 = vmul.f32 %v5909_v25, %v4896_v35  ;;  %v2503_v25 = vmul.f32 %v5925_v7, %v4899_v45 }
 0x773   :  { %v6103_v34 = vpop.permute.xlu1 %2250  ;;  %2416 = vrot.lane.b32.xlu1 %v2362_v44, %s3621_s14  ;;  %v2645_v44 = vmul.f32 %v7465_v16, %v4919_v37 }
 0x776   :  { %2678 = vrot.lane.b32.xlu0 %v2637_v36, %s3603_s27  ;;  %v6111_v1 = vpop.permute.xlu0 %2258  ;;  %v6162_v36 = vrot.slane %v1651_v30, %v7470_v59 }
 0x777   :  { %2422 = vrot.lane.b32.xlu1 %v2365_v29, %s3621_s14  ;;  %v6114_v0 = vpop.permute.xlu1 %2256 }
 0x778   :  { %7471 = vst [vmem:[#allocation70_spill] sm:$0xff] %v6162_v36 }
 0x77a   :  { %2682 = vrot.lane.b32.xlu0 %v2639_v10, %s3603_s27  ;;  %v6121_v39 = vpop.permute.xlu0 %2262 }
 0x77b   :  { %2426 = vrot.lane.b32.xlu1 %v2367_v17, %s3621_s14  ;;  %v6124_v27 = vpop.permute.xlu1 %2260  ;;  %v7474_v17 = vld [vmem:[#allocation7_spill] sm:$0xff] }
 0x77e   :  { %2688 = vrot.lane.b32.xlu0 %v2642_v13, %s3603_s27  ;;  %v6131_v51 = vpop.permute.xlu0 %1986  ;;  %v6170_v13 = vrot.slane %v1651_v30, %v7474_v17 }
 0x77f   :  { %2680 = vrot.lane.b32.xlu1 %v2638_v52, %s3603_s27  ;;  %v6134_v3 = vpop.permute.xlu1 %1976  ;;  %v7475_v52 = vld [vmem:[#allocation9_spill] sm:$0xff] }
 0x782   :  { %2692 = vrot.lane.b32.xlu0 %v2644_v50, %s3603_s27  ;;  %v6141_v56 = vpop.permute.xlu0 %2254  ;;  %v6173_v50 = vrot.slane %v1651_v30, %v7475_v52 }
 0x783   :  { %7466 = vst [vmem:[#allocation61_spill] sm:$0xff] %v6141_v56  ;;  %2684 = vrot.lane.b32.xlu1 %v2640_v18, %s3603_s27  ;;  %v6144_v6 = vpop.permute.xlu1 %2244  ;;  %v7477_v18 = vld [vmem:[#allocation10_spill] sm:$0xff] }
 0x784   :  { %7467 = vst [vmem:[#allocation68_spill] sm:$0xff] %v6144_v6  ;;  %7476 = vst [vmem:[#allocation72_spill] sm:$0xff] %v6173_v50  ;;  %v1699_v33 = vmul.f32 %v6173_v50, %v5964_v5 }
 0x786   :  { %2408 = vrot.lane.b32.xlu0 %v2358_v54, %s3621_s14  ;;  %v6151_v41 = vpop.permute.xlu0 %2124  ;;  %v6178_v54 = vrot.slane %v1651_v30, %v7477_v18  ;;  %v7481_v30 = vld [vmem:[#allocation144_spill] sm:$0xff] }
 0x787   :  { %7468 = vst [vmem:[#allocation67_spill] sm:$0xff] %v6151_v41  ;;  %2690 = vrot.lane.b32.xlu1 %v2643_v58, %s3603_s27  ;;  %v6154_v23 = vpop.permute.xlu1 %2122  ;;  %v1698_v58 = vmul.f32 %v6162_v36, %v5964_v5  ;;  %v1853_v18 = vsel %vm516_vm3, %v7481_v30, %v7480_v31  ;;  %v1867_v41 = vsel %vm516_vm3, %v7487_v20, %v7486_v48  ;;  %v7489_v20 = vld [vmem:[#allocation143_spill] sm:$0xff] }
 0x788   :  { %7469 = vst [vmem:[#allocation69_spill] sm:$0xff] %v6154_v23  ;;  %7478 = vst [vmem:[#allocation74_spill] sm:$0xff] %v6178_v54  ;;  %v1712_v23 = vmul.f32 %v6178_v54, %v7484_v2  ;;  %v2641_v48 = vmul.f32 %v7465_v16, %v4896_v35 }
 0x789   :  { %v1885_v6 = vadd.f32 %v1853_v18, %v1698_v58  ;;  %v2011_v58 = vsel %vm661_vm4, %v6083_v15, %v6081_v28  ;;  %v2141_v28 = vsel %vm806_vm5, %v6003_v53, %v6001_v61 }
 0x78a   :  { %2676 = vrot.lane.b32.xlu0 %v2636_v46, %s3603_s27  ;;  %v2363_v46 = vmul.f32 %v5891_v63, %v4896_v35  ;;  %v7492_v35 = vld [vmem:[#allocation151_spill] sm:$0xff] }
 0x78b   :  { %2694 = vrot.lane.b32.xlu1 %v2645_v44, %s3603_s27  ;;  %v6165_v29 = vpop.permute.xlu0 %2128  ;;  %v6167_v10 = vpop.permute.xlu1 %2126  ;;  %v7479_v44 = vld [vmem:[#allocation141_spill] sm:$0xff] }
 0x78c   :  { %7472 = vst [vmem:[#allocation71_spill] sm:$0xff] %v6165_v29  ;;  %7473 = vst [vmem:[#allocation73_spill] sm:$0xff] %v6167_v10  ;;  %v1701_v59 = vmul.f32 %v6170_v13, %v7479_v44  ;;  %v1702_v17 = vmul.f32 %v6162_v36, %v7479_v44  ;;  %v1703_v52 = vmul.f32 %v6173_v50, %v7479_v44  ;;  %v7485_v10 = vld [vmem:[#allocation150_spill] sm:$0xff]  ;;  %v7491_v36 = vld [vmem:[#allocation147_spill] sm:$0xff] }
 0x78d   :  { %v1704_v63 = vmul.f32 %v6178_v54, %v7479_v44  ;;  %v6201_v29 = vmul.f32 %v6170_v13, %v7484_v2  ;;  %v2505_v44 = vmul.f32 %v5925_v7, %v4909_v40  ;;  %v6227_v50 = vsel %vm516_vm3, %v7489_v20, %v7481_v30 }
 0x78e   :  { %2554 = vrot.lane.b32.xlu0 %v2503_v25, %s3623_s23  ;;  %v1857_v25 = vsel %vm516_vm3, %v7482_v60, %v7485_v10  ;;  %v6239_v16 = vadd.f32 %v1856_v57, %v1701_v59  ;;  %v1858_v20 = vsel %vm516_vm3, %v7485_v10, %v7492_v35  ;;  %v1899_v30 = vadd.f32 %v1867_v41, %v1712_v23 }
 0x78f   :  { %2418 = vrot.lane.b32.xlu1 %v2363_v46, %s3621_s14  ;;  %v1700_v46 = vmul.f32 %v6178_v54, %v5964_v5  ;;  %v1889_v18 = vadd.f32 %v1857_v25, %v1702_v17  ;;  %v7494_v54 = vld [vmem:[#allocation164_spill] sm:$0xff]  ;;  %v2508_v57 = vmul.f32 %v5942_v47, %v4899_v45  ;;  %v2504_v41 = vmul.f32 %v5925_v7, %v4906_v42 }
 0x790   :  { %v6212_v62 = vpop.permute.xlu0 %2134  ;;  %v2043_v25 = vadd.f32 %v2011_v58, %v1899_v30  ;;  %v1890_v23 = vadd.f32 %v1858_v20, %v1703_v52  ;;  %v7500_v30 = vld [vmem:[#allocation11_spill] sm:$0xff] }
 0x791   :  { %7488 = vst [vmem:[#allocation75_spill] sm:$0xff] %v6212_v62  ;;  %v6220_v60 = vpop.permute.xlu1 %2132  ;;  %v7490_v62 = vld [vmem:[#allocation146_spill] sm:$0xff] }
 0x792   :  { %v1854_v56 = vsel %vm516_vm3, %v7480_v31, %v7490_v62  ;;  %v1855_v2 = vsel %vm516_vm3, %v7490_v62, %v7491_v36  ;;  %2558 = vrot.lane.b32.xlu0 %v2505_v44, %s3623_s23  ;;  %v7493_v31 = vld [vmem:[#allocation165_spill] sm:$0xff] }
 0x793   :  { %2686 = vrot.lane.b32.xlu1 %v2641_v48, %s3603_s27  ;;  %v1997_v62 = vsel %vm661_vm4, %v7494_v54, %v7493_v31  ;;  %v1886_v36 = vadd.f32 %v1854_v56, %v1699_v33  ;;  %v1887_v17 = vadd.f32 %v1855_v2, %v1700_v46  ;;  %v7495_v48 = vld [vmem:[#allocation152_spill] sm:$0xff]  ;;  %v2285_v56 = vsel %vm951_vm6, %v6093_v21, %v6091_v19  ;;  %v7496_v2 = vld [vmem:[#allocation166_spill] sm:$0xff]  ;;  %v7497_v46 = vld [vmem:[#allocation167_spill] sm:$0xff] }
 0x794   :  { %v2139_v44 = vpop.permute.xlu0 %2138  ;;  %v2029_v59 = vadd.f32 %v1997_v62, %v1885_v6  ;;  %v1859_v15 = vsel %vm516_vm3, %v7492_v35, %v7495_v48  ;;  %v1998_v6 = vsel %vm661_vm4, %v7493_v31, %v7496_v2  ;;  %v1999_v52 = vsel %vm661_vm4, %v7496_v2, %v7497_v46  ;;  %v7499_v35 = vld [vmem:[#allocation12_spill] sm:$0xff] }
 0x795   :  { %v6253_v10 = vpop.permute.xlu1 %2136  ;;  %v2001_v62 = vsel %vm661_vm4, %v7500_v30, %v7499_v35  ;;  %v2143_v31 = vsel %vm806_vm5, %v6013_v24, %v6011_v14  ;;  %v1891_v2 = vadd.f32 %v1859_v15, %v1704_v63  ;;  %v2287_v14 = vsel %vm951_vm6, %v6103_v34, %v6101_v38  ;;  %v7504_v63 = vld [vmem:[#allocation158_spill] sm:$0xff] }
 0x796   :  { %v2155_v33 = vsel %vm806_vm5, %v6253_v10, %v2139_v44  ;;  %2564 = vrot.lane.b32.xlu0 %v2508_v57, %s3623_s23  ;;  %v2173_v58 = vadd.f32 %v2141_v28, %v2029_v59  ;;  %v2142_v44 = vsel %vm806_vm5, %v6001_v61, %v6013_v24  ;;  %v2510_v28 = vmul.f32 %v5942_v47, %v4909_v40 }
 0x797   :  { %v6272_v20 = vadd.f32 %v2155_v33, %v2043_v25  ;;  %2556 = vrot.lane.b32.xlu1 %v2504_v41, %s3623_s23  ;;  %v2030_v59 = vadd.f32 %v1998_v6, %v1886_v36  ;;  %v2031_v25 = vadd.f32 %v1999_v52, %v1887_v17  ;;  %v2506_v33 = vmul.f32 %v5925_v7, %v4919_v37  ;;  %v7501_v36 = vld [vmem:[#allocation154_spill] sm:$0xff]  ;;  %v7502_v17 = vld [vmem:[#allocation153_spill] sm:$0xff] }
 0x798   :  { %v2393_v57 = vpop.permute.xlu0 %2392  ;;  %v2317_v48 = vadd.f32 %v2285_v56, %v2173_v58  ;;  %v2286_v61 = vsel %vm951_vm6, %v6091_v19, %v6103_v34  ;;  %v1860_v56 = vsel %vm516_vm3, %v7502_v17, %v7501_v36  ;;  %v7503_v19 = vld [vmem:[#allocation159_spill] sm:$0xff]  ;;  %v2033_v38 = vadd.f32 %v2001_v62, %v1889_v18 }
 0x799   :  { %7498 = vst [vmem:[#allocation76_spill] sm:$0xff] %v6272_v20  ;;  %v6286_v41 = vpop.permute.xlu1 %2390  ;;  %v2174_v6 = vadd.f32 %v2142_v44, %v2030_v59  ;;  %v2175_v46 = vadd.f32 %v2143_v31, %v2031_v25  ;;  %v1864_v52 = vsel %vm516_vm3, %v7504_v63, %v7503_v19  ;;  %v2145_v34 = vsel %vm806_vm5, %v6023_v8, %v6021_v49  ;;  %v7506_v17 = vld [vmem:[#allocation15_spill] sm:$0xff] }
 0x79a   :  { %v2429_v24 = vsel %vm1096_vm7, %v6286_v41, %v2393_v57  ;;  %2568 = vrot.lane.b32.xlu0 %v2510_v28, %s3623_s23  ;;  %v7505_v28 = vld [vmem:[#allocation48_spill] sm:$0xff]  ;;  %v2002_v44 = vsel %vm661_vm4, %v7499_v35, %v7506_v17  ;;  %v2003_v18 = vsel %vm661_vm4, %v7506_v17, %v5990_v4  ;;  %v2289_v62 = vsel %vm951_vm6, %v6114_v0, %v6111_v1 }
 0x79b   :  { %v6302_v15 = vadd.f32 %v2429_v24, %v2317_v48  ;;  %2560 = vrot.lane.b32.xlu1 %v2506_v33, %s3623_s23  ;;  %v2781_v20 = vmul.f32 %v7505_v28, %v4899_v45  ;;  %v2318_v31 = vadd.f32 %v2286_v61, %v2174_v6  ;;  %v2319_v59 = vadd.f32 %v2287_v14, %v2175_v46  ;;  %v7507_v35 = vld [vmem:[#allocation168_spill] sm:$0xff] }
 0x79c   :  { %v2397_v58 = vpop.permute.xlu0 %2396  ;;  %v2509_v48 = vmul.f32 %v5942_v47, %v4906_v42  ;;  %v2000_v61 = vsel %vm661_vm4, %v7507_v35, %v7500_v30  ;;  %v2177_v14 = vadd.f32 %v2145_v34, %v2033_v38  ;;  %v2034_v4 = vadd.f32 %v2002_v44, %v1890_v23 }
 0x79d   :  { %v2395_v25 = vpop.permute.xlu1 %2394  ;;  %v2783_v30 = vmul.f32 %v7505_v28, %v4909_v40  ;;  %v1697_v38 = vmul.f32 %v6170_v13, %v5964_v5  ;;  %v2035_v34 = vadd.f32 %v2003_v18, %v1891_v2  ;;  %v2511_v23 = vmul.f32 %v5942_v47, %v4919_v37 }
 0x79e   :  { %v2430_v33 = vsel %vm1096_vm7, %v2393_v57, %v2395_v25  ;;  %v2431_v24 = vsel %vm1096_vm7, %v2395_v25, %v2397_v58  ;;  %2822 = vrot.lane.b32.xlu0 %v2781_v20, %s3625_s24  ;;  %v2146_v57 = vsel %vm806_vm5, %v6021_v49, %v6033_v12  ;;  %v2147_v20 = vsel %vm806_vm5, %v6033_v12, %v6031_v55 }
 0x79f   :  { %v6330_v6 = vadd.f32 %v2430_v33, %v2318_v31  ;;  %v6332_v46 = vadd.f32 %v2431_v24, %v2319_v59  ;;  %2566 = vrot.lane.b32.xlu1 %v2509_v48, %s3623_s23  ;;  %v2321_v58 = vadd.f32 %v2289_v62, %v2177_v14  ;;  %v1896_v44 = vadd.f32 %v1864_v52, %v6201_v29  ;;  %v7508_v29 = vld [vmem:[#allocation163_spill] sm:$0xff] }
 0x7a0   :  { %v2403_v63 = vpop.permute.xlu0 %2402  ;;  %v2290_v49 = vsel %vm951_vm6, %v6111_v1, %v6124_v27  ;;  %v2291_v55 = vsel %vm951_vm6, %v6124_v27, %v6121_v39  ;;  %v2178_v5 = vadd.f32 %v2146_v57, %v2034_v4  ;;  %v2179_v2 = vadd.f32 %v2147_v20, %v2035_v34  ;;  %v7509_v4 = vld [vmem:[#allocation70_spill] sm:$0xff] }
 0x7a1   :  { %v2401_v17 = vpop.permute.xlu1 %2400  ;;  %v1705_v31 = vmul.f32 %v6170_v13, %v5976_v26  ;;  %v1996_v1 = vsel %vm661_vm4, %v7508_v29, %v7494_v54  ;;  %v2032_v52 = vadd.f32 %v2000_v61, %v6239_v16  ;;  %v2786_v27 = vmul.f32 %v5952_v22, %v4899_v45 }
 0x7a2   :  { %v2433_v12 = vsel %vm1096_vm7, %v2401_v17, %v2403_v63  ;;  %2826 = vrot.lane.b32.xlu0 %v2783_v30, %s3625_s24  ;;  %v2782_v25 = vmul.f32 %v7505_v28, %v4906_v42  ;;  %v1884_v48 = vadd.f32 %v6227_v50, %v1697_v38  ;;  %v2322_v13 = vadd.f32 %v2290_v49, %v2178_v5  ;;  %v7512_v49 = vld [vmem:[#allocation69_spill] sm:$0xff] }
 0x7a3   :  { %v6358_v59 = vadd.f32 %v2433_v12, %v2321_v58  ;;  %2570 = vrot.lane.b32.xlu1 %v2511_v23, %s3623_s23  ;;  %v2323_v18 = vadd.f32 %v2291_v55, %v2179_v2  ;;  %v2008_v62 = vsel %vm661_vm4, %v6131_v51, %v6073_v11  ;;  %v2004_v54 = vsel %vm661_vm4, %v6134_v3, %v6054_v9  ;;  %v7513_v12 = vld [vmem:[#allocation155_spill] sm:$0xff] }
 0x7a4   :  { %v2407_v39 = vpop.permute.xlu0 %2406  ;;  %v2784_v50 = vmul.f32 %v7505_v28, %v4919_v37  ;;  %v2144_v35 = vsel %vm806_vm5, %v6041_v43, %v6023_v8  ;;  %v1892_v61 = vadd.f32 %v1860_v56, %v1705_v31  ;;  %v2140_v3 = vsel %vm806_vm5, %v6043_v32, %v6003_v53  ;;  %v7510_v56 = vld [vmem:[#allocation61_spill] sm:$0xff]  ;;  %v7511_v53 = vld [vmem:[#allocation68_spill] sm:$0xff]  ;;  %v7514_v31 = vld [vmem:[#allocation62_spill] sm:$0xff] }
 0x7a5   :  { %v2405_v33 = vpop.permute.xlu1 %2404  ;;  %v1706_v57 = vmul.f32 %v7509_v4, %v5976_v26  ;;  %v2040_v20 = vadd.f32 %v2008_v62, %v1896_v44  ;;  %v2788_v30 = vmul.f32 %v5952_v22, %v4909_v40  ;;  %v2028_v8 = vadd.f32 %v1996_v1, %v1884_v48  ;;  %v7515_v1 = vld [vmem:[#allocation72_spill] sm:$0xff] }
 0x7a6   :  { %v2434_v16 = vsel %vm1096_vm7, %v2403_v63, %v2405_v33  ;;  %v2435_v24 = vsel %vm1096_vm7, %v2405_v33, %v2407_v39  ;;  %2832 = vrot.lane.b32.xlu0 %v2786_v27, %s3625_s24  ;;  %v2036_v43 = vadd.f32 %v2004_v54, %v1892_v61  ;;  %v2288_v38 = vsel %vm951_vm6, %v7510_v56, %v6114_v0  ;;  %v7516_v39 = vld [vmem:[#allocation74_spill] sm:$0xff]  ;;  %v7517_v54 = vld [vmem:[#allocation67_spill] sm:$0xff]  ;;  %v7519_v61 = vld [vmem:[#allocation157_spill] sm:$0xff] }
 0x7a7   :  { %v6384_v51 = vadd.f32 %v2434_v16, %v2322_v13  ;;  %v6386_v14 = vadd.f32 %v2435_v24, %v2323_v18  ;;  %2824 = vrot.lane.b32.xlu1 %v2782_v25, %s3625_s24  ;;  %v2176_v23 = vadd.f32 %v2144_v35, %v2032_v52  ;;  %v2284_v32 = vsel %vm951_vm6, %v7511_v53, %v6093_v21  ;;  %v2910_v21 = vld [vmem:[%s6816_s2 + $0x10] sm:$0xff] }
 0x7a8   :  { %v2131_v63 = vpop.permute.xlu0 %2130  ;;  %v1861_v0 = vsel %vm516_vm3, %v7501_v36, %v7513_v12  ;;  %v2172_v5 = vadd.f32 %v2140_v3, %v2028_v8  ;;  %v2005_v29 = vsel %vm661_vm4, %v6054_v9, %v7514_v31  ;;  %v1707_v52 = vmul.f32 %v7515_v1, %v5976_v26  ;;  %v7522_v8 = vld [vmem:[#allocation137_spill] sm:$0xff]  ;;  %v7523_v53 = vld [vmem:[#allocation160_spill] sm:$0xff] }
 0x7a9   :  { %v2152_v34 = vsel %vm806_vm5, %v2131_v63, %v6220_v60  ;;  %v2121_v58 = vpop.permute.xlu1 %2120  ;;  %v1708_v27 = vmul.f32 %v7516_v39, %v5976_v26  ;;  %v2320_v36 = vadd.f32 %v2288_v38, %v2176_v23  ;;  %v1893_v48 = vadd.f32 %v1861_v0, %v1706_v57  ;;  %v7518_v26 = vld [vmem:[#allocation156_spill] sm:$0xff]  ;;  %v7520_v57 = vld [vmem:[#allocation65_spill] sm:$0xff] }
 0x7aa   :  { %v6404_v44 = vadd.f32 %v2152_v34, %v2040_v20  ;;  %v2148_v55 = vsel %vm806_vm5, %v2121_v58, %v7512_v49  ;;  %2836 = vrot.lane.b32.xlu0 %v2788_v30, %s3625_s24  ;;  %v2316_v13 = vadd.f32 %v2284_v32, %v2172_v5  ;;  %v2787_v33 = vmul.f32 %v5952_v22, %v4906_v42  ;;  %v7521_v63 = vld [vmem:[#allocation64_spill] sm:$0xff]  ;;  %v7526_v5 = vld [vmem:[#allocation142_spill] sm:$0xff] }
 0x7ab   :  { %v6412_v2 = vadd.f32 %v2148_v55, %v2036_v43  ;;  %2828 = vrot.lane.b32.xlu1 %v2784_v50, %s3625_s24  ;;  %v2149_v9 = vsel %vm806_vm5, %v7512_v49, %v7517_v54  ;;  %v1862_v50 = vsel %vm516_vm3, %v7513_v12, %v7518_v26  ;;  %v2037_v35 = vadd.f32 %v2005_v29, %v1893_v48  ;;  %v7524_v49 = vld [vmem:[#allocation73_spill] sm:$0xff]  ;;  %v7525_v12 = vld [vmem:[#allocation71_spill] sm:$0xff] }
 0x7ac   :  { %v2399_v25 = vpop.permute.xlu0 %2398  ;;  %v1863_v3 = vsel %vm516_vm3, %v7518_v26, %v7519_v61  ;;  %v2006_v20 = vsel %vm661_vm4, %v7514_v31, %v7520_v57  ;;  %v2502_v43 = vmul.f32 %v5925_v7, %v7522_v8  ;;  %v1894_v56 = vadd.f32 %v1862_v50, %v1707_v52  ;;  %v7530_v61 = vld [vmem:[#allocation60_spill] sm:$0xff] }
 0x7ad   :  { %v2432_v18 = vsel %vm1096_vm7, %v2399_v25, %v2401_v17  ;;  %v2389_v62 = vpop.permute.xlu1 %2388  ;;  %v1895_v38 = vadd.f32 %v1863_v3, %v1708_v27  ;;  %v2181_v34 = vadd.f32 %v2149_v9, %v2037_v35  ;;  %v2789_v23 = vmul.f32 %v5952_v22, %v4919_v37  ;;  %v2911_v25 = vld [vmem:[%s6816_s2 + $0x18] sm:$0xff] }
 0x7ae   :  { %v6431_v16 = vadd.f32 %v2432_v18, %v2320_v36  ;;  %v2428_v24 = vsel %vm1096_vm7, %v2389_v62, %v6286_v41  ;;  %2924 = vperm.xlu0 %3515, %v2910_v21   ;;  %v2007_v41 = vsel %vm661_vm4, %v7520_v57, %v7521_v63  ;;  %v1865_v32 = vsel %vm516_vm3, %v7503_v19, %v7523_v53  ;;  %v7527_v19 = vld [vmem:[#allocation66_spill] sm:$0xff]  ;;  %v7528_v62 = vld [vmem:[#allocation161_spill] sm:$0xff] }
 0x7af   :  { %v6438_v17 = vadd.f32 %v2428_v24, %v2316_v13  ;;  %2834 = vrot.lane.b32.xlu1 %v2787_v33, %s3625_s24  ;;  %v2150_v55 = vsel %vm806_vm5, %v7517_v54, %v7524_v49  ;;  %v2151_v7 = vsel %vm806_vm5, %v7524_v49, %v7525_v12  ;;  %v1710_v21 = vmul.f32 %v7509_v4, %v7526_v5  ;;  %v7529_v54 = vld [vmem:[#allocation75_spill] sm:$0xff]  ;;  %v7531_v57 = vld [vmem:[#allocation57_spill] sm:$0xff] }
 0x7b0   :  { %v2269_v30 = vpop.permute.xlu0 %2268  ;;  %v2038_v31 = vadd.f32 %v2006_v20, %v1894_v56  ;;  %v2039_v29 = vadd.f32 %v2007_v41, %v1895_v38  ;;  %v2009_v39 = vsel %vm661_vm4, %v6073_v11, %v7527_v19  ;;  %v2780_v36 = vmul.f32 %v7505_v28, %v7522_v8 }
 0x7b1   :  { %v6452_v58 = vpop.permute.xlu1 %2266  ;;  %v1897_v48 = vadd.f32 %v1865_v32, %v1710_v21  ;;  %v1866_v33 = vsel %vm516_vm3, %v7523_v53, %v7528_v62  ;;  %v2153_v11 = vsel %vm806_vm5, %v6220_v60, %v7529_v54  ;;  %v1711_v24 = vmul.f32 %v7515_v1, %v7526_v5  ;;  %v7533_v21 = vld [vmem:[#allocation55_spill] sm:$0xff] }
 0x7b2   :  { %v2293_v0 = vsel %vm951_vm6, %v6452_v58, %v2269_v30  ;;  %2552 = vrot.lane.b32.xlu0 %v2502_v43, %s3623_s23  ;;  %v2182_v4 = vadd.f32 %v2150_v55, %v2038_v31  ;;  %v2183_v13 = vadd.f32 %v2151_v7, %v2039_v29  ;;  %v2010_v3 = vsel %vm661_vm4, %v7527_v19, %v7530_v61  ;;  %v7532_v7 = vld [vmem:[#allocation76_spill] sm:$0xff] }
 0x7b3   :  { %v6470_v52 = vadd.f32 %v2293_v0, %v2181_v34  ;;  %2838 = vrot.lane.b32.xlu1 %v2789_v23, %s3625_s24  ;;  %v2041_v26 = vadd.f32 %v2009_v39, %v1897_v48  ;;  %v2647_v20 = vmul.f32 %v7531_v57, %v4899_v45  ;;  %v1898_v63 = vadd.f32 %v1866_v33, %v1711_v24 }
 0x7b4   :  { %v2273_v27 = vpop.permute.xlu0 %2272  ;;  %v2507_v1 = vmul.f32 %v5942_v47, %v7522_v8  ;;  %v2154_v43 = vsel %vm806_vm5, %v7529_v54, %v6253_v10  ;;  %v2649_v53 = vmul.f32 %v7531_v57, %v4909_v40  ;;  %v2785_v49 = vmul.f32 %v5952_v22, %v7522_v8 }
 0x7b5   :  { %v2271_v18 = vpop.permute.xlu1 %2270  ;;  %v2185_v41 = vadd.f32 %v2153_v11, %v2041_v26  ;;  %v2042_v38 = vadd.f32 %v2010_v3, %v1898_v63  ;;  %v2652_v31 = vmul.f32 %v7533_v21, %v4899_v45  ;;  %v2648_v22 = vmul.f32 %v7531_v57, %v4906_v42 }
 0x7b6   :  { %v2294_v9 = vsel %vm951_vm6, %v2269_v30, %v2271_v18  ;;  %v2295_v28 = vsel %vm951_vm6, %v2271_v18, %v2273_v27  ;;  %2820 = vrot.lane.b32.xlu0 %v2780_v36, %s3625_s24  ;;  %v2654_v36 = vmul.f32 %v7533_v21, %v4909_v40  ;;  %v2650_v48 = vmul.f32 %v7531_v57, %v4919_v37 }
 0x7b7   :  { %v6492_v50 = vadd.f32 %v2294_v9, %v2182_v4  ;;  %v6494_v35 = vadd.f32 %v2295_v28, %v2183_v13  ;;  %2929 = vperm.xlu1 %3517, %v2911_v25   ;;  %v2186_v32 = vadd.f32 %v2154_v43, %v2042_v38  ;;  %v2646_v33 = vmul.f32 %v7531_v57, %v7522_v8  ;;  %v7534_v28 = vld [vmem:[#allocation59_spill] sm:$0xff] }
 0x7b8   :  { %v2279_v60 = vpop.permute.xlu0 %2278  ;;  %v2653_v11 = vmul.f32 %v7533_v21, %v4906_v42  ;;  %v2791_v24 = vmul.f32 %v7534_v28, %v4899_v45  ;;  %v2655_v61 = vmul.f32 %v7533_v21, %v4919_v37  ;;  %v2651_v63 = vmul.f32 %v7533_v21, %v7522_v8 }
 0x7b9   :  { %v6501_v30 = vpop.permute.xlu1 %2276  ;;  %v2794_v43 = vmul.f32 %v7534_v28, %v4919_v37 }
 0x7ba   :  { %v2297_v56 = vsel %vm951_vm6, %v6501_v30, %v2279_v60  ;;  %2698 = vrot.lane.b32.xlu0 %v2647_v20, %s3603_s27  ;;  %v2793_v20 = vmul.f32 %v7534_v28, %v4909_v40 }
 0x7bb   :  { %v6511_v34 = vadd.f32 %v2297_v56, %v2185_v41  ;;  %2562 = vrot.lane.b32.xlu1 %v2507_v1, %s3623_s23  ;;  %v7535_v41 = vld [vmem:[#allocation63_spill] sm:$0xff] }
 0x7bc   :  { %v2283_v23 = vpop.permute.xlu0 %2282  ;;  %v2796_v1 = vmul.f32 %v7535_v41, %v4899_v45  ;;  %v2790_v45 = vmul.f32 %v7534_v28, %v7522_v8  ;;  %v2797_v38 = vmul.f32 %v7535_v41, %v4906_v42 }
 0x7bd   :  { %v2281_v47 = vpop.permute.xlu1 %2280 }
 0x7be   :  { %v2298_v10 = vsel %vm951_vm6, %v2279_v60, %v2281_v47  ;;  %v2299_v55 = vsel %vm951_vm6, %v2281_v47, %v2283_v23  ;;  %2702 = vrot.lane.b32.xlu0 %v2649_v53, %s3603_s27 }
 0x7bf   :  { %v6521_v12 = vadd.f32 %v2298_v10, %v2186_v32  ;;  %v6524_v0 = vadd.f32 %v2299_v55, %v7532_v7  ;;  %2830 = vrot.lane.b32.xlu1 %v2785_v49, %s3625_s24  ;;  %v2799_v32 = vmul.f32 %v7535_v41, %v4919_v37 }
 0x7c0   :  { %v2537_v5 = vpop.permute.xlu0 %2536 }
 0x7c1   :  { %v2535_v29 = vpop.permute.xlu1 %2534 }
 0x7c2   :  { %v2573_v19 = vsel %vm1241_vm8, %v2535_v29, %v2537_v5  ;;  %2708 = vrot.lane.b32.xlu0 %v2652_v31, %s3603_s27 }
 0x7c3   :  { %v6534_v39 = vadd.f32 %v2573_v19, %v6302_v15  ;;  %2700 = vrot.lane.b32.xlu1 %v2648_v22, %s3603_s27 }
 0x7c4   :  { %v2541_v27 = vpop.permute.xlu0 %2540 }
 0x7c5   :  { %v2539_v25 = vpop.permute.xlu1 %2538 }
 0x7c6   :  { %v2574_v4 = vsel %vm1241_vm8, %v2537_v5, %v2539_v25  ;;  %v2575_v13 = vsel %vm1241_vm8, %v2539_v25, %v2541_v27  ;;  %2712 = vrot.lane.b32.xlu0 %v2654_v36, %s3603_s27  ;;  %v2795_v5 = vmul.f32 %v7535_v41, %v7522_v8 }
 0x7c7   :  { %v6545_v18 = vadd.f32 %v2574_v4, %v6330_v6  ;;  %v6548_v15 = vadd.f32 %v2575_v13, %v6332_v46  ;;  %2704 = vrot.lane.b32.xlu1 %v2650_v48, %s3603_s27 }
 0x7c8   :  { %v2547_v62 = vpop.permute.xlu0 %2546 }
 0x7c9   :  { %v2545_v54 = vpop.permute.xlu1 %2544 }
 0x7ca   :  { %v2577_v9 = vsel %vm1241_vm8, %v2545_v54, %v2547_v62  ;;  %2696 = vrot.lane.b32.xlu0 %v2646_v33, %s3603_s27 }
 0x7cb   :  { %v6558_v6 = vadd.f32 %v2577_v9, %v6358_v59  ;;  %2710 = vrot.lane.b32.xlu1 %v2653_v11, %s3603_s27 }
 0x7cc   :  { %v2551_v46 = vpop.permute.xlu0 %2550 }
 0x7cd   :  { %v2549_v26 = vpop.permute.xlu1 %2548 }
 0x7ce   :  { %v2578_v3 = vsel %vm1241_vm8, %v2547_v62, %v2549_v26  ;;  %v2579_v60 = vsel %vm1241_vm8, %v2549_v26, %v2551_v46  ;;  %2842 = vrot.lane.b32.xlu0 %v2791_v24, %s3625_s24 }
 0x7cf   :  { %v6569_v57 = vadd.f32 %v2578_v3, %v6384_v51  ;;  %v6572_v59 = vadd.f32 %v2579_v60, %v6386_v14  ;;  %2714 = vrot.lane.b32.xlu1 %v2655_v61, %s3603_s27  ;;  %v2792_v51 = vmul.f32 %v7534_v28, %v4906_v42  ;;  %v2798_v14 = vmul.f32 %v7535_v41, %v4909_v40  ;;  %v3014_v40 = vld [vmem:[%s6818_s4] sm:$0xff] }
 0x7d2   :  { %2846 = vrot.lane.b32.xlu0 %v2793_v20, %s3625_s24 }
 0x7d3   :  { %2706 = vrot.lane.b32.xlu1 %v2651_v63, %s3603_s27 }
 0x7d6   :  { %2852 = vrot.lane.b32.xlu0 %v2796_v1, %s3625_s24 }
 0x7d7   :  { %2844 = vrot.lane.b32.xlu1 %v2792_v51, %s3625_s24 }
 0x7da   :  { %2856 = vrot.lane.b32.xlu0 %v2798_v14, %s3625_s24 }
 0x7db   :  { %2848 = vrot.lane.b32.xlu1 %v2794_v43, %s3625_s24 }
 0x7dd   :  { %v6595_v56 = vpop.permute.xlu0 %2919 }
 0x7de   :  { %v6599_v23 = vpop.permute.xlu1 %2914  ;;  %2840 = vrot.lane.b32.xlu0 %v2790_v45, %s3625_s24 }
 0x7df   :  { %2854 = vrot.lane.b32.xlu1 %v2797_v38, %s3625_s24 }
 0x7e1   :  { %v2533_v53 = vpop.permute.xlu0 %2532 }
 0x7e2   :  { %v2572_v47 = vsel %vm1241_vm8, %v2533_v53, %v2535_v29  ;;  %v2265_v49 = vpop.permute.xlu1 %2264  ;;  %3018 = vperm.xlu0 %3515, %v3014_v40  }
 0x7e3   :  { %v2604_v42 = vadd.f32 %v2572_v47, %v6438_v17  ;;  %v2292_v10 = vsel %vm951_vm6, %v2265_v49, %v6452_v58  ;;  %2858 = vrot.lane.b32.xlu1 %v2799_v32, %s3625_s24  ;;  %v3015_v17 = vld [vmem:[%s6818_s4 + $0x8] sm:$0xff] }
 0x7e4   :  { %v2324_v55 = vadd.f32 %v2292_v10, %v6412_v2 }
 0x7e5   :  { %v2411_v7 = vpop.permute.xlu0 %2410 }
 0x7e6   :  { %v2275_v21 = vpop.permute.xlu1 %2274 }
 0x7e7   :  { %v2296_v37 = vsel %vm951_vm6, %v2275_v21, %v6501_v30  ;;  %2850 = vrot.lane.b32.xlu1 %v2795_v5, %s3625_s24 }
 0x7e8   :  { %v2328_v31 = vadd.f32 %v2296_v37, %v6404_v44 }
 0x7e9   :  { %v2415_v58 = vpop.permute.xlu0 %2414 }
 0x7ea   :  { %v2543_v29 = vpop.permute.xlu1 %2542 }
 0x7eb   :  { %v2576_v2 = vsel %vm1241_vm8, %v2543_v29, %v2545_v54  ;;  %3023 = vperm.xlu1 %3517, %v3015_v17  }
 0x7ec   :  { %v6625_v22 = vadd.f32 %v2576_v2, %v6431_v16 }
 0x7ed   :  { %v2421_v8 = vpop.permute.xlu0 %2420 }
 0x7ee   :  { %v2413_v19 = vpop.permute.xlu1 %2412 }
 0x7ef   :  { %v2437_v30 = vsel %vm1096_vm7, %v2411_v7, %v2413_v19  ;;  %v2438_v27 = vsel %vm1096_vm7, %v2413_v19, %v2415_v58 }
 0x7f0   :  { %v2469_v44 = vadd.f32 %v2437_v30, %v6470_v52  ;;  %v2470_v36 = vadd.f32 %v2438_v27, %v6492_v50 }
 0x7f1   :  { %v2425_v25 = vpop.permute.xlu0 %2424 }
 0x7f2   :  { %v2417_v48 = vpop.permute.xlu1 %2416 }
 0x7f3   :  { %v2439_v4 = vsel %vm1096_vm7, %v2415_v58, %v2417_v48 }
 0x7f4   :  { %v2471_v13 = vadd.f32 %v2439_v4, %v6494_v35 }
 0x7f5   :  { %v2679_v62 = vpop.permute.xlu0 %2678 }
 0x7f6   :  { %v2423_v33 = vpop.permute.xlu1 %2422 }
 0x7f7   :  { %v2441_v16 = vsel %vm1096_vm7, %v2421_v8, %v2423_v33  ;;  %v2442_v54 = vsel %vm1096_vm7, %v2423_v33, %v2425_v25  ;;  %v6635_v11 = vpop.f32.mrb[0].mxu0 }
 0x7f8   :  { %v2473_v9 = vadd.f32 %v2441_v16, %v6511_v34  ;;  %v2474_v52 = vadd.f32 %v2442_v54, %v6521_v12  ;;  %v6639_v46 = vpop.f32.mrb[1].mxu0 }
 0x7f9   :  { %v2683_v50 = vpop.permute.xlu0 %2682 }
 0x7fa   :  { %v2427_v28 = vpop.permute.xlu1 %2426  ;;  %v6641_v24 = vpop.f32.mrb[0].mxu1 }
 0x7fb   :  { %v2443_v35 = vsel %vm1096_vm7, %v2425_v25, %v2427_v28  ;;  %v6644_v26 = vpop.f32.mrb[1].mxu1  ;;  %v6646_v61 = vpop.f32.mrb[2].mxu0 }
 0x7fc   :  { %v2475_v3 = vadd.f32 %v2443_v35, %v6524_v0  ;;  %v6649_v60 = vpop.f32.mrb[3].mxu0 }
 0x7fd   :  { %v6651_v20 = vpop.permute.xlu0 %2688 }
 0x7fe   :  { %v2681_v34 = vpop.permute.xlu1 %2680  ;;  %v6653_v12 = vpop.f32.mrb[2].mxu1 }
 0x7ff   :  { %v6655_v63 = vpop.f32.mrb[3].mxu1  ;;  %v2718_v28 = vsel %vm215_vm2, %v2681_v34, %v2683_v50 }
 0x801   :  { %v2693_v41 = vpop.permute.xlu0 %2692 }
 0x802   :  { %v2685_v1 = vpop.permute.xlu1 %2684 }
 0x805   :  { %v2409_v51 = vpop.permute.xlu0 %2408 }
 0x806   :  { %v2436_v14 = vsel %vm1096_vm7, %v2409_v51, %v2411_v7  ;;  %v2691_v43 = vpop.permute.xlu1 %2690 }
 0x807   :  { %v6658_v45 = vadd.f32 %v2436_v14, %v2324_v55  ;;  %v2750_v14 = vadd.f32 %v2718_v28, %v6545_v18 }
 0x809   :  { %v2677_v38 = vpop.permute.xlu0 %2676 }
 0x80a   :  { %v2716_v0 = vsel %vm215_vm2, %v2677_v38, %v2679_v62  ;;  %v2695_v40 = vpop.permute.xlu1 %2694 }
 0x80b   :  { %v6661_v53 = vadd.f32 %v2716_v0, %v2604_v42  ;;  %v2719_v0 = vsel %vm215_vm2, %v2683_v50, %v2685_v1  ;;  %v2723_v50 = vsel %vm215_vm2, %v2693_v41, %v2695_v40 }
 0x80d   :  { %v2555_v32 = vpop.permute.xlu0 %2554 }
 0x80e   :  { %v2419_v47 = vpop.permute.xlu1 %2418 }
 0x80f   :  { %v2440_v49 = vsel %vm1096_vm7, %v2419_v47, %v2421_v8  ;;  %v2721_v47 = vsel %vm215_vm2, %v6651_v20, %v2691_v43 }
 0x810   :  { %v6664_v10 = vadd.f32 %v2440_v49, %v2328_v31 }
 0x811   :  { %v2559_v5 = vpop.permute.xlu0 %2558 }
 0x812   :  { %v6666_v21 = vpop.permute.xlu1 %2686 }
 0x815   :  { %v6668_v37 = vpop.permute.xlu0 %2564 }
 0x816   :  { %v2557_v7 = vpop.permute.xlu1 %2556 }
 0x817   :  { %v2581_v55 = vsel %vm1241_vm8, %v2555_v32, %v2557_v7  ;;  %v2582_v17 = vsel %vm1241_vm8, %v2557_v7, %v2559_v5 }
 0x818   :  { %v6672_v58 = vadd.f32 %v2581_v55, %v2469_v44  ;;  %v6674_v42 = vadd.f32 %v2582_v17, %v2470_v36  ;;  %v2751_v55 = vadd.f32 %v2719_v0, %v6548_v15 }
 0x819   :  { %v2569_v29 = vpop.permute.xlu0 %2568 }
 0x81a   :  { %v2561_v2 = vpop.permute.xlu1 %2560 }
 0x81b   :  { %v2583_v8 = vsel %vm1241_vm8, %v2559_v5, %v2561_v2 }
 0x81c   :  { %v6677_v31 = vadd.f32 %v2583_v8, %v2471_v13  ;;  %v2717_v13 = vsel %vm215_vm2, %v2679_v62, %v2681_v34  ;;  %v2722_v62 = vsel %vm215_vm2, %v2691_v43, %v2693_v41 }
 0x81d   :  { %v2823_v19 = vpop.permute.xlu0 %2822  ;;  %v2754_v18 = vadd.f32 %v2722_v62, %v6569_v57 }
 0x81e   :  { %v2567_v30 = vpop.permute.xlu1 %2566 }
 0x81f   :  { %v2585_v27 = vsel %vm1241_vm8, %v6668_v37, %v2567_v30  ;;  %v2586_v25 = vsel %vm1241_vm8, %v2567_v30, %v2569_v29 }
 0x820   :  { %v6682_v48 = vadd.f32 %v2585_v27, %v2473_v9  ;;  %v6684_v4 = vadd.f32 %v2586_v25, %v2474_v52  ;;  %v2749_v52 = vadd.f32 %v2717_v13, %v6534_v39  ;;  %v2753_v39 = vadd.f32 %v2721_v47, %v6558_v6 }
 0x821   :  { %v2827_v44 = vpop.permute.xlu0 %2826  ;;  %v2755_v6 = vadd.f32 %v2723_v50, %v6572_v59 }
 0x822   :  { %v2571_v36 = vpop.permute.xlu1 %2570 }
 0x823   :  { %v2587_v33 = vsel %vm1241_vm8, %v2569_v29, %v2571_v36 }
 0x824   :  { %v6687_v16 = vadd.f32 %v2587_v33, %v2475_v3 }
 0x825   :  { %v6689_v54 = vpop.permute.xlu0 %2832 }
 0x826   :  { %v2825_v35 = vpop.permute.xlu1 %2824 }
 0x827   :  { %v2861_v51 = vsel %vm1530_vm9, %v2823_v19, %v2825_v35  ;;  %v2862_v9 = vsel %vm1530_vm9, %v2825_v35, %v2827_v44 }
 0x828   :  { %v2893_v49 = vadd.f32 %v2861_v51, %v2749_v52  ;;  %v2894_v34 = vadd.f32 %v2862_v9, %v2750_v14 }
 0x829   :  { %v2837_v38 = vpop.permute.xlu0 %2836 }
 0x82a   :  { %v2829_v3 = vpop.permute.xlu1 %2828  ;;  %v2933_v17 = vadd.f32 %v6599_v23, %v2893_v49  ;;  %v2934_v29 = vadd.f32 %v6599_v23, %v2894_v34  ;;  %v2720_v34 = vsel %vm215_vm2, %v6666_v21, %v6651_v20 }
 0x82b   :  { %v2863_v5 = vsel %vm1530_vm9, %v2827_v44, %v2829_v3 }
 0x82c   :  { %v2895_v8 = vadd.f32 %v2863_v5, %v2751_v55  ;;  %v2949_v44 = vmax.f32 %v2933_v17, 0.0  ;;  %v2950_v36 = vmax.f32 %v2934_v29, 0.0 }
 0x82d   :  { %v6702_v7 = vpop.permute.xlu0 %2924 }
 0x82e   :  { %v2835_v1 = vpop.permute.xlu1 %2834  ;;  %v2935_v28 = vadd.f32 %v6599_v23, %v2895_v8 }
 0x82f   :  { %v2865_v43 = vsel %vm1530_vm9, %v6689_v54, %v2835_v1  ;;  %v2866_v2 = vsel %vm1530_vm9, %v2835_v1, %v2837_v38 }
 0x830   :  { %v2897_v30 = vadd.f32 %v2865_v43, %v2753_v39  ;;  %v2898_v27 = vadd.f32 %v2866_v2, %v2754_v18  ;;  %v2951_v3 = vmax.f32 %v2935_v28, 0.0 }
 0x831   :  { %v2553_v15 = vpop.permute.xlu0 %2552 }
 0x832   :  { %v2937_v57 = vadd.f32 %v6595_v56, %v2897_v30  ;;  %v2938_v41 = vadd.f32 %v6595_v56, %v2898_v27  ;;  %v2580_v40 = vsel %vm1241_vm8, %v2553_v15, %v2555_v32  ;;  %v2839_v25 = vpop.permute.xlu1 %2838 }
 0x833   :  { %v6718_v33 = vadd.f32 %v2580_v40, %v6658_v45  ;;  %v2867_v13 = vsel %vm1530_vm9, %v2837_v38, %v2839_v25 }
 0x834   :  { %v2953_v35 = vmax.f32 %v2937_v57, 0.0  ;;  %v2954_v51 = vmax.f32 %v2938_v41, 0.0  ;;  %v2899_v9 = vadd.f32 %v2867_v13, %v2755_v6 }
 0x835   :  { %v2821_v59 = vpop.permute.xlu0 %2820 }
 0x836   :  { %v3423_v52 = vpack.c.bf16 %v2954_v51, %v2950_v36  ;;  %v2939_v14 = vadd.f32 %v6595_v56, %v2899_v9  ;;  %v6723_v0 = vpop.permute.xlu1 %2929  ;;  %v3413_v32 = vpack.c.bf16 %v2953_v35, %v2949_v44  ;;  %v2860_v45 = vsel %vm1530_vm9, %v2821_v59, %v2823_v19 }
 0x837   :  { %v2892_v55 = vadd.f32 %v2860_v45, %v6661_v53  ;;  %v2752_v19 = vadd.f32 %v2720_v34, %v6625_v22 }
 0x838   :  { %v2955_v47 = vmax.f32 %v2939_v14, 0.0  ;;  %3414 = vmatprep.subr.bf16.mxu0 %v3413_v32 }
 0x839   :  { %v2699_v62 = vpop.permute.xlu0 %2698  ;;  %v2932_v17 = vadd.f32 %v6599_v23, %v2892_v55 }
 0x83a   :  { %v2563_v49 = vpop.permute.xlu1 %2562  ;;  %v3421_v38 = vpack.c.bf16 %v2955_v47, %v2951_v3 }
 0x83b   :  { %v2584_v5 = vsel %vm1241_vm8, %v2563_v49, %v6668_v37  ;;  %v2948_v53 = vmax.f32 %v2932_v17, 0.0 }
 0x83c   :  { %v6733_v39 = vadd.f32 %v2584_v5, %v6664_v10  ;;  %3422 = vmatprep.subr.bf16.mxu1 %v3421_v38 }
 0x83d   :  { %3424 = vmatpush1.bf16.msra.mxu1 %v3423_v52  ;;  %v2703_v18 = vpop.permute.xlu0 %2702 }
 0x83e   :  { %v2831_v50 = vpop.permute.xlu1 %2830 }
 0x83f   :  { %v2864_v1 = vsel %vm1530_vm9, %v2831_v50, %v6689_v54 }
 0x840   :  { %v2896_v20 = vadd.f32 %v2864_v1, %v2752_v19 }
 0x841   :  { %v2709_v21 = vpop.permute.xlu0 %2708 }
 0x842   :  { %v2936_v37 = vadd.f32 %v6595_v56, %v2896_v20  ;;  %v2701_v29 = vpop.permute.xlu1 %2700 }
 0x843   :  { %v2725_v54 = vsel %vm215_vm2, %v2699_v62, %v2701_v29  ;;  %v2726_v23 = vsel %vm215_vm2, %v2701_v29, %v2703_v18 }
 0x844   :  { %v2952_v43 = vmax.f32 %v2936_v37, 0.0  ;;  %v2757_v56 = vadd.f32 %v2725_v54, %v6672_v58  ;;  %v2758_v25 = vadd.f32 %v2726_v23, %v6674_v42 }
 0x845   :  { %v2713_v10 = vpop.permute.xlu0 %2712 }
 0x846   :  { %v3415_v2 = vpack.c.bf16 %v2952_v43, %v2948_v53  ;;  %v2705_v8 = vpop.permute.xlu1 %2704 }
 0x847   :  { %v2727_v13 = vsel %vm215_vm2, %v2703_v18, %v2705_v8 }
 0x848   :  { %3416 = vmatpush1.bf16.msra.mxu0 %v3415_v2  ;;  %v2759_v59 = vadd.f32 %v2727_v13, %v6677_v31 }
 0x849   :  { %v2697_v30 = vpop.permute.xlu0 %2696 }
 0x84a   :  { %v2711_v27 = vpop.permute.xlu1 %2710  ;;  %v2724_v42 = vsel %vm215_vm2, %v2697_v30, %v2699_v62 }
 0x84b   :  { %v2729_v52 = vsel %vm215_vm2, %v2709_v21, %v2711_v27  ;;  %v2730_v14 = vsel %vm215_vm2, %v2711_v27, %v2713_v10  ;;  %v2756_v5 = vadd.f32 %v2724_v42, %v6718_v33 }
 0x84c   :  { %v2761_v38 = vadd.f32 %v2729_v52, %v6682_v48  ;;  %v2762_v31 = vadd.f32 %v2730_v14, %v6684_v4 }
 0x84d   :  { %v2843_v22 = vpop.permute.xlu0 %2842 }
 0x84e   :  { %v2715_v15 = vpop.permute.xlu1 %2714 }
 0x84f   :  { %v2731_v32 = vsel %vm215_vm2, %v2713_v10, %v2715_v15 }
 0x850   :  { %v2763_v62 = vadd.f32 %v2731_v32, %v6687_v16 }
 0x851   :  { %v2847_v6 = vpop.permute.xlu0 %2846 }
 0x852   :  { %v2707_v57 = vpop.permute.xlu1 %2706 }
 0x853   :  { %v2728_v17 = vsel %vm215_vm2, %v2707_v57, %v2709_v21 }
 0x854   :  { %v2760_v15 = vadd.f32 %v2728_v17, %v6733_v39 }
 0x855   :  { %v2853_v41 = vpop.permute.xlu0 %2852 }
 0x856   :  { %v2845_v40 = vpop.permute.xlu1 %2844 }
 0x857   :  { %v2869_v44 = vsel %vm1530_vm9, %v2843_v22, %v2845_v40  ;;  %v2870_v36 = vsel %vm1530_vm9, %v2845_v40, %v2847_v6 }
 0x858   :  { %v2901_v28 = vadd.f32 %v2869_v44, %v2757_v56  ;;  %v2902_v35 = vadd.f32 %v2870_v36, %v2758_v25 }
 0x859   :  { %v2857_v51 = vpop.permute.xlu0 %2856 }
 0x85a   :  { %v2849_v9 = vpop.permute.xlu1 %2848  ;;  %v2941_v3 = vadd.f32 %v6702_v7, %v2901_v28  ;;  %v2942_v47 = vadd.f32 %v6702_v7, %v2902_v35 }
 0x85b   :  { %v2871_v58 = vsel %vm1530_vm9, %v2847_v6, %v2849_v9 }
 0x85c   :  { %v2903_v45 = vadd.f32 %v2871_v58, %v2759_v59  ;;  %v2957_v20 = vmax.f32 %v2941_v3, 0.0  ;;  %v2958_v37 = vmax.f32 %v2942_v47, 0.0 }
 0x85d   :  { %v2841_v49 = vpop.permute.xlu0 %2840 }
 0x85e   :  { %v2855_v34 = vpop.permute.xlu1 %2854  ;;  %v2868_v19 = vsel %vm1530_vm9, %v2841_v49, %v2843_v22  ;;  %v2943_v48 = vadd.f32 %v6702_v7, %v2903_v45 }
 0x85f   :  { %v2873_v55 = vsel %vm1530_vm9, %v2853_v41, %v2855_v34  ;;  %v2874_v18 = vsel %vm1530_vm9, %v2855_v34, %v2857_v51  ;;  %v2900_v10 = vadd.f32 %v2868_v19, %v2756_v5 }
 0x860   :  { %v2905_v50 = vadd.f32 %v2873_v55, %v2761_v38  ;;  %v2906_v1 = vadd.f32 %v2874_v18, %v2762_v31  ;;  %v2959_v54 = vmax.f32 %v2943_v48, 0.0 }
 0x861   :  { %v6764_v4 = vpop.permute.xlu0 %3018 }
 0x862   :  { %v2945_v33 = vadd.f32 %v6723_v0, %v2905_v50  ;;  %v2946_v29 = vadd.f32 %v6723_v0, %v2906_v1  ;;  %v3100_v53 = vadd.f32 %v6635_v11, %v6764_v4  ;;  %v3102_v16 = vadd.f32 %v6639_v46, %v6764_v4  ;;  %v2859_v43 = vpop.permute.xlu1 %2858 }
 0x863   :  { %v3177_v21 = vadd.f32 %v6641_v24, %v6764_v4  ;;  %v3179_v2 = vadd.f32 %v6644_v26, %v6764_v4  ;;  %v2875_v8 = vsel %vm1530_vm9, %v2857_v51, %v2859_v43  ;;  %v2940_v26 = vadd.f32 %v6702_v7, %v2900_v10 }
 0x864   :  { %v2961_v30 = vmax.f32 %v2945_v33, 0.0  ;;  %v2962_v27 = vmax.f32 %v2946_v29, 0.0  ;;  %3518 = vtanh.f32 %v3100_v53  ;;  %v2907_v22 = vadd.f32 %v2875_v8, %v2763_v62 }
 0x865   :  { %3520 = vtanh.f32 %v3102_v16  ;;  %v2956_v28 = vmax.f32 %v2940_v26, 0.0 }
 0x866   :  { %v3427_v11 = vpack.c.bf16 %v2962_v27, %v2958_v37  ;;  %3522 = vtanh.f32 %v3177_v21  ;;  %v2947_v46 = vadd.f32 %v6723_v0, %v2907_v22  ;;  %v2851_v6 = vpop.permute.xlu1 %2850  ;;  %v3417_v57 = vpack.c.bf16 %v2961_v30, %v2957_v20 }
 0x867   :  { %3524 = vtanh.f32 %v3179_v2  ;;  %v2872_v24 = vsel %vm1530_vm9, %v2851_v6, %v2853_v41 }
 0x868   :  { %v2963_v23 = vmax.f32 %v2947_v46, 0.0  ;;  %v2904_v40 = vadd.f32 %v2872_v24, %v2760_v15  ;;  %3418 = vmatprep.subr.bf16.mxu0 %v3417_v57 }
 0x86a   :  { %v2944_v56 = vadd.f32 %v6723_v0, %v2904_v40  ;;  %v3024_v25 = vpop.permute.xlu1 %3023  ;;  %v3425_v39 = vpack.c.bf16 %v2963_v23, %v2959_v54 }
 0x86b   :  { %v3106_v44 = vadd.f32 %v6646_v61, %v3024_v25  ;;  %v3108_v36 = vadd.f32 %v6649_v60, %v3024_v25  ;;  %v3183_v13 = vadd.f32 %v6653_v12, %v3024_v25  ;;  %v3185_v41 = vadd.f32 %v6655_v63, %v3024_v25  ;;  %v3555_v61 = vld [vmem:[%s6817_s3] sm:$0xff]  ;;  %v3556_v63 = vld [vmem:[%s6817_s3 + $0x8] sm:$0xff]  ;;  %s3626_s3 = smov [#allocation4]  }
 0x86c   :  { %v2960_v35 = vmax.f32 %v2944_v56, 0.0  ;;  %3426 = vmatprep.subr.bf16.mxu1 %v3425_v39  ;;  %v7536_v12 = vmov 0.0   ;;  %s3378_s0 = sshll.u32 %s3626_s3, 4  ;;  %s3379_s0 = int_to_ptr.vmem [resolvable:$true] %s3378_s0 }
 0x86d   :  { %3526 = vtanh.f32 %v3106_v44  ;;  %3428 = vmatpush1.bf16.msra.mxu1 %v3427_v11  ;;  %s3557_s8 = scalar_lea.vmem %s3379_s0, 2048  ;;  %p3562_p1 = scmp.lt.s32.totalorder %s3379_s0, %s3379_s0 }
 0x86e   :  { %v3519_v7 = vpop.eup %3518  ;;  %v3419_v51 = vpack.c.bf16 %v2960_v35, %v2956_v28  ;;  %3528 = vtanh.f32 %v3108_v36  ;;  %p3558_p0 = scmp.ne.s32.totalorder %s3379_s0, %s3557_s8  ;;  %p3563_p2 = scmp.lt.s32.totalorder %s3557_s8, %s3557_s8 }
 0x86f   :  { %v3521_v9 = vpop.eup %3520  ;;  %3357 = vst [vmem:[#allocation4] sm:$0xff] %v3519_v7  ;;  %3530 = vtanh.f32 %v3183_v13 }
 0x870   :  { %v3523_v0 = vpop.eup %3522  ;;  %3358 = vst [vmem:[#allocation4 + $0x8] sm:$0xff] %v3521_v9  ;;  %3532 = vtanh.f32 %v3185_v41  ;;  %3420 = vmatpush1.bf16.msra.mxu0 %v3419_v51  ;;  %3395 = vmatmul.mubr.msk.f32.vlgmr.msra.gmra.mrb[4].mxu1 %vm3026_vm10, %v3555_v61  ;;  %p3564_p3 = por %p3563_p2, %p3562_p1 }
 0x871   :  { %v3525_v60 = vpop.eup %3524  ;;  %3359 = vst [vmem:[#allocation4 + $0x10] sm:$0xff] %v3523_v0  ;;  %3334 = vmatprep.mubr.f32.mxu1 %v7536_v12 }
 0x872   :  { %3360 = vst [vmem:[#allocation4 + $0x18] sm:$0xff] %v3525_v60  ;;  %p3565_p4 = pnand %p3564_p3, %p3558_p0 }
 0x873   :  { %3393 = vmatmul.mubr.msk.f32.vlgmr.msra.gmra.mrb[4].mxu0 %vm3026_vm10, %v3555_v61 }
 0x874   :  { %3396 = vmatmul.mubr.msk.f32.gmra.mrb[6].mxu1 %vm3026_vm10, %v3556_v63  ;;  %3257 = vmatprep.mubr.f32.mxu0 %v7536_v12 }
 0x877   :  { %v3527_v59 = vpop.eup %3526  ;;  %3394 = vmatmul.mubr.msk.f32.gmra.mrb[6].mxu0 %vm3026_vm10, %v3556_v63 }
 0x878   :  { %v3529_v52 = vpop.eup %3528  ;;  %3365 = vst [vmem:[#allocation4 + $0x40] sm:$0xff] %v3527_v59 }
 0x879   :  { %v3531_v14 = vpop.eup %3530  ;;  %3366 = vst [vmem:[#allocation4 + $0x48] sm:$0xff] %v3529_v52 }
 0x87a   :  { %v3533_v58 = vpop.eup %3532  ;;  %3367 = vst [vmem:[#allocation4 + $0x50] sm:$0xff] %v3531_v14 }
 0x87b   :  { %3368 = vst [vmem:[#allocation4 + $0x58] sm:$0xff] %v3533_v58 }
 0x943   :  { %v3330_v42 = vpop.f32.mrb[4].mxu1 }
 0x944   :  { %v3331_v32 = vadd.f32 %v3330_v42, %v6764_v4  ;;  %v3332_v3 = vpop.f32.mrb[5].mxu1 }
 0x945   :  { %v3333_v47 = vadd.f32 %v3332_v3, %v6764_v4 }
 0x946   :  { %3534 = vtanh.f32 %v3331_v32  ;;  %v3253_v45 = vpop.f32.mrb[4].mxu0 }
 0x947   :  { %3536 = vtanh.f32 %v3333_v47  ;;  %v3254_v49 = vadd.f32 %v3253_v45, %v6764_v4  ;;  %v3255_v38 = vpop.f32.mrb[5].mxu0  ;;  %v3336_v31 = vpop.f32.mrb[6].mxu1 }
 0x948   :  { %v3256_v34 = vadd.f32 %v3255_v38, %v6764_v4  ;;  %v3337_v5 = vadd.f32 %v3336_v31, %v3024_v25  ;;  %v3338_v55 = vpop.f32.mrb[7].mxu1 }
 0x949   :  { %3538 = vtanh.f32 %v3254_v49  ;;  %v3339_v18 = vadd.f32 %v3338_v55, %v3024_v25 }
 0x94a   :  { %3540 = vtanh.f32 %v3256_v34  ;;  %v3259_v62 = vpop.f32.mrb[6].mxu0 }
 0x94b   :  { %3542 = vtanh.f32 %v3337_v5  ;;  %v3260_v19 = vadd.f32 %v3259_v62, %v3024_v25  ;;  %v3261_v50 = vpop.f32.mrb[7].mxu0 }
 0x94c   :  { %3544 = vtanh.f32 %v3339_v18  ;;  %v3262_v1 = vadd.f32 %v3261_v50, %v3024_v25 }
 0x94d   :  { %3546 = vtanh.f32 %v3260_v19 }
 0x94e   :  { %3548 = vtanh.f32 %v3262_v1 }
 0x950   :  { %v3535_v17 = vpop.eup %3534 }
 0x951   :  { %v3537_v20 = vpop.eup %3536  ;;  %3363 = vst [vmem:[#allocation4 + $0x30] sm:$0xff] %v3535_v17 }
 0x952   :  { %3364 = vst [vmem:[#allocation4 + $0x38] sm:$0xff] %v3537_v20 }
 0x953   :  { %v3539_v37 = vpop.eup %3538 }
 0x954   :  { %v3541_v48 = vpop.eup %3540  ;;  %3361 = vst [vmem:[#allocation4 + $0x20] sm:$0xff] %v3539_v37 }
 0x955   :  { %v3543_v4 = vpop.eup %3542  ;;  %3362 = vst [vmem:[#allocation4 + $0x28] sm:$0xff] %v3541_v48 }
 0x956   :  { %v3545_v33 = vpop.eup %3544  ;;  %3371 = vst [vmem:[#allocation4 + $0x70] sm:$0xff] %v3543_v4 }
 0x957   :  { %v3547_v29 = vpop.eup %3546  ;;  %3372 = vst [vmem:[#allocation4 + $0x78] sm:$0xff] %v3545_v33 }
 0x958   :  { %v3549_v53 = vpop.eup %3548  ;;  %3369 = vst [vmem:[#allocation4 + $0x60] sm:$0xff] %v3547_v29 }
 0x959   :  { %3370 = vst [vmem:[#allocation4 + $0x68] sm:$0xff] %v3549_v53 }
 0x95a   :  { %3568 = shalt.err (!%p3565_p4)
}
 0x95b   :  { %s3569_s16 = scalar_lea.hbm %s6819_s5, 2048 }
 0x95c   :  { %p3570_p5 = scmp.ne.s32.totalorder %s6819_s5, %s3569_s16  ;;  %p3573_p6 = scmp.lt.u32.totalorder %s3569_s16, %s6819_s5 }
 0x95e   :  { %p3575_p7 = pnand %p3573_p6, %p3570_p5 }
 0x960   :  { %3578 = shalt.err (!%p3575_p7)
}
 0x961   :  { %s3627_s11 = smov 1024   ;;  %s3628_s19 = smov 64  }
 0x962   :  { %3384 = dma.vmem_to_hbm [thread:$0]  %s3379_s0, 2048, %s6819_s5, [#allocation5], %s3627_s11, %s3627_s11, %s3628_s19  }
 0x963   :  { %3579 = dma.done.wait [#allocation5], 2048  }
 0x964   :  { %3580 = vsyncadd [#allocation5], 4294965248 }
 0x965   :  { %3388 = vsyncpa [#allocation5], 1 }

</bundles_post_ra>
